<compile_context>
chip_gen: v7x
topology: tpu7x:2x2x1
jax: 0.10.0
libtpu: 0.0.40
codegen_flags: <defaults>
</compile_context>

<pallas_src>
import jax
import jax.numpy as jnp
from jax.experimental import pallas as pl
from jax.experimental.pallas import tpu as pltpu


def _round_up(x, m):
    return (x + m - 1) // m * m


def _vmem_capacity_bytes():
    try:
        return int(pltpu.get_tpu_info().vmem_capacity_bytes)
    except Exception:  # pragma: no cover - conservative fallback
        return 128 * 1024 * 1024


def _phase2x2_conv_weight(k_hwio):
    """3x3 HWIO conv weight -> equivalent 3x3 weight in 2x2-phase layout.

    Phase layout: I[2Y+py, 2X+px, c] == P[Y, X, (py*2+px)*C + c].  A 3x3 conv
    (pad=1) on I equals a 3x3 conv (pad=1) on P over the half-resolution grid
    with this (4*Cin, 4*Cout) weight (most entries structurally zero).
    """
    kh, kw, cin, cout = k_hwio.shape
    assert kh == 3 and kw == 3
    wp = jnp.zeros((3, 3, 4 * cin, 4 * cout), k_hwio.dtype)
    for dy in range(3):
        for dx in range(3):
            for py in range(2):
                for px in range(2):
                    sy, qy = divmod(py + dy - 1, 2)
                    sx, qx = divmod(px + dx - 1, 2)
                    qi = qy * 2 + qx
                    po = py * 2 + px
                    wp = wp.at[sy + 1, sx + 1,
                               qi * cin:(qi + 1) * cin,
                               po * cout:(po + 1) * cout].set(k_hwio[dy, dx])
    return wp


def _pick_tile_phase_rows(h2, bytes_per_phase_row, budget_bytes):
    """Largest divisor of h2 whose (tile+halo) footprint fits the VMEM budget,
    preferring >=2 row-tiles per image so the grid has steps to pipeline."""
    divisors = [d for d in range(1, h2 + 1) if h2 % d == 0]
    fits = [d for d in divisors if (d + 4) * bytes_per_phase_row <= budget_bytes]
    if not fits:
        # TODO(synk): for extremely wide feature maps also tile the W axis.
        return 1
    multi = [d for d in fits if h2 // d >= 2]
    return max(multi) if multi else max(fits)


def unet_up_forward(inputs1_nchw, inputs2_nchw, params,
                    compute_dtype=jnp.bfloat16, tile_phase_rows=None):
    # NCHW -> NHWC, cast once so all later pads/reshapes move bf16 (half bytes).
    # TODO(synk): keep the surrounding model NHWC end-to-end to drop the transposes.
    x1 = jnp.transpose(inputs1_nchw, (0, 2, 3, 1)).astype(compute_dtype)
    x2 = jnp.transpose(inputs2_nchw, (0, 2, 3, 1)).astype(compute_dtype)

    N, H2, W2, C2 = x2.shape
    H, W = 2 * H2, 2 * W2
    C1 = x1.shape[-1]
    Cout = params["b_up"].shape[0]
    C1p, Cp4 = 4 * C1, 4 * Cout          # phase-packed channel widths
    Ck = C1p + Cp4                        # merged conv1 input channels

    # F.pad(inputs1, offset//2).  (Odd offsets would break torch.cat as well.)
    o2 = (H - x1.shape[1]) // 2
    if o2:
        x1 = jnp.pad(x1, ((0, 0), (o2, o2), (o2, o2), (0, 0)))
    assert x1.shape[1] == H and x1.shape[2] == W, (x1.shape, H, W)

    # 2x2 space-to-depth of the skip input: (N,H,W,C1) -> (N,H2,W2,4*C1).
    x1p = x1.reshape(N, H2, 2, W2, 2, C1).transpose(0, 1, 3, 2, 4, 5)
    x1p = x1p.reshape(N, H2, W2, C1p)

    # Column geometry: >=1 zero halo column, padded so slab row blocks are
    # multiples of 8 sublanes.
    W2p = _round_up(W2 + 1, 8)

    itemsize = jnp.dtype(compute_dtype).itemsize
    bytes_per_phase_row = W2p * (
        Ck * itemsize + Cp4 * itemsize           # cat + mid slabs
        + 2 * Cp4 * 4                            # f32 accumulators
        + 2 * (C1p + C2 + Cp4) * itemsize)       # double-buffered in/out blocks
    if tile_phase_rows is None:
        budget = max(_vmem_capacity_bytes() // 12, 2 << 20)   # ~5 MiB on v7x, ~10 MiB on v5e/v6e
        TH2 = _pick_tile_phase_rows(H2, bytes_per_phase_row, budget)
    else:
        TH2 = tile_phase_rows
    assert H2 % TH2 == 0, (H2, TH2)
    n_t = H2 // TH2

    TOP = BOT = 8                       # 8-row-aligned zero halo above/below interiors
    R1 = (TH2 + 4) * W2p                # cat slab interior rows (tile + 2-row halo/side)
    R1m = (TH2 + 2) * W2p               # mid slab interior rows (tile + 1-row halo/side)
    R0 = TH2 * W2p                      # output rows per tile
    R_cat = TOP + R1 + BOT
    R_mid = TOP + R1m + BOT

    # --- overlapping row-tile windows (2 phase-row halo each side) for x1 / x2.
    # TODO(synk): production: fetch halos with in-kernel manual DMA instead.
    def _tiles(img):                               # img: (N, H2, W2, C)
        c = img.shape[-1]
        p = jnp.pad(img, ((0, 0), (2, 2), (0, W2p - W2), (0, 0)))
        idx = jnp.arange(n_t)[:, None] * TH2 + jnp.arange(TH2 + 4)[None, :]
        return p[:, idx].reshape(N, n_t, R1, c)

    x1_t = _tiles(x1p)                             # (N, n_t, R1, 4*C1)
    x2_t = _tiles(x2)                              # (N, n_t, R1, C2)

    # --- per-tile validity masks (row inside image && column < W2).
    def _mask(row_lo, n_rows):
        g = row_lo + jnp.arange(n_rows)
        rv = (g >= 0) & (g < H2)
        cv = jnp.arange(W2p) < W2
        return (rv[:, None] & cv[None, :]).astype(jnp.float32).reshape(n_rows * W2p, 1)

    m_cat = jnp.stack([_mask(t * TH2 - 2, TH2 + 4) for t in range(n_t)])   # (n_t, R1, 1)
    m_mid = jnp.stack([_mask(t * TH2 - 1, TH2 + 2) for t in range(n_t)])   # (n_t, R1m, 1)

    # --- weights rearranged to the 2x2-phase layout (tiny one-time prep).
    w_up = params["w_up"]                                            # (C2, Cout, 2, 2)
    wup = jnp.transpose(w_up, (0, 2, 3, 1)).reshape(C2, Cp4).astype(compute_dtype)
    bup = jnp.tile(params["b_up"], 4).reshape(1, Cp4).astype(jnp.float32)

    w1 = params["w1_hwio"]                                           # (3,3,C1+Cout,Cout)
    w1m = jnp.concatenate(
        [_phase2x2_conv_weight(w1[:, :, :C1, :]),                    # skip half
         _phase2x2_conv_weight(w1[:, :, C1:, :])], axis=2)           # up half
    w1m = w1m.reshape(9, Ck, Cp4).astype(compute_dtype)
    b1 = jnp.tile(params["b1"], 4).reshape(1, Cp4).astype(jnp.float32)

    w2m = _phase2x2_conv_weight(params["w2_hwio"]).reshape(9, Cp4, Cp4).astype(compute_dtype)
    b2 = jnp.tile(params["b2"], 4).reshape(1, Cp4).astype(jnp.float32)

    def kernel(x1_ref, x2_ref, mcat_ref, mmid_ref, wup_ref, bup_ref,
               w1_ref, b1_ref, w2_ref, b2_ref, o_ref,
               cat_ref, mid_ref, acc1_ref, acc2_ref):
        # Re-zero the slab halo rows EVERY step (do NOT guard with program_id:
        # under "parallel" megacore sharding each core owns its own scratch).
        cat_ref[pl.ds(0, TOP), :] = jnp.zeros((TOP, Ck), cat_ref.dtype)
        cat_ref[pl.ds(TOP + R1, BOT), :] = jnp.zeros((BOT, Ck), cat_ref.dtype)
        mid_ref[pl.ds(0, TOP), :] = jnp.zeros((TOP, Cp4), mid_ref.dtype)
        mid_ref[pl.ds(TOP + R1m, BOT), :] = jnp.zeros((BOT, Cp4), mid_ref.dtype)

        # --- stage the skip path (wrapper padding already zeroed halo rows/cols).
        cat_ref[pl.ds(TOP, R1), pl.ds(0, C1p)] = x1_ref[0, 0, :, :]

        # --- ConvTranspose2d(k=2, s=2) == 1x1 conv in 2x2-phase space: ONE matmul.
        up = jnp.dot(x2_ref[0, 0, :, :], wup_ref[:, :],
                     preferred_element_type=jnp.float32)
        up = (up + bup_ref[:, :]) * mcat_ref[0, :, :]
        cat_ref[pl.ds(TOP, R1), pl.ds(C1p, Cp4)] = up.astype(cat_ref.dtype)

        # --- conv1 (3x3, pad 1) + ReLU: 9 merged skip|up taps, f32 VMEM accumulator.
        for k in range(9):
            dy, dj = divmod(k, 3)
            v = jnp.dot(cat_ref[pl.ds(TOP + dy * W2p + dj - 1, R1m), :],
                        w1_ref[k, :, :], preferred_element_type=jnp.float32)
            if k == 0:
                acc1_ref[...] = v
            else:
                acc1_ref[...] += v
        h1 = jnp.maximum(acc1_ref[...] + b1_ref[:, :], 0.0) * mmid_ref[0, :, :]
        mid_ref[pl.ds(TOP, R1m), :] = h1.astype(mid_ref.dtype)

        # --- conv2 (3x3, pad 1) + ReLU.
        for k in range(9):
            dy, dj = divmod(k, 3)
            v = jnp.dot(mid_ref[pl.ds(TOP + dy * W2p + dj - 1, R0), :],
                        w2_ref[k, :, :], preferred_element_type=jnp.float32)
            if k == 0:
                acc2_ref[...] = v
            else:
                acc2_ref[...] += v
        o_ref[0, 0, :, :] = jnp.maximum(acc2_ref[...] + b2_ref[:, :],
                                        0.0).astype(o_ref.dtype)

    # Explicit scoped-VMEM budget (defaults are 16/32 MiB which silently shrink blocks).
    scratch_bytes = (R_cat * Ck + R_mid * Cp4) * itemsize + (R1m + R0) * Cp4 * 4
    block_bytes = 2 * (R1 * (C1p + C2) + R0 * Cp4) * itemsize + 2 * (R1 + R1m) * 4
    weight_bytes = ((wup.size + w1m.size + w2m.size) * itemsize
                    + (bup.size + b1.size + b2.size) * 4)
    vmem_limit = int(min(max(2 * (scratch_bytes + block_bytes + 2 * weight_bytes),
                             32 * 1024 * 1024), 64 * 1024 * 1024))

    out_t = pl.pallas_call(
        kernel,
        out_shape=jax.ShapeDtypeStruct((N, n_t, R0, Cp4), compute_dtype),
        grid=(N, n_t),
        in_specs=[
            pl.BlockSpec((1, 1, R1, C1p), lambda n, t: (n, t, 0, 0)),   # skip tile
            pl.BlockSpec((1, 1, R1, C2), lambda n, t: (n, t, 0, 0)),    # x2 tile
            pl.BlockSpec((1, R1, 1), lambda n, t: (t, 0, 0)),           # up/cat mask
            pl.BlockSpec((1, R1m, 1), lambda n, t: (t, 0, 0)),          # mid mask
            pl.BlockSpec((C2, Cp4), lambda n, t: (0, 0)),               # deconv weight
            pl.BlockSpec((1, Cp4), lambda n, t: (0, 0)),                # deconv bias
            pl.BlockSpec((9, Ck, Cp4), lambda n, t: (0, 0, 0)),         # conv1 weight (merged)
            pl.BlockSpec((1, Cp4), lambda n, t: (0, 0)),                # conv1 bias
            pl.BlockSpec((9, Cp4, Cp4), lambda n, t: (0, 0, 0)),        # conv2 weight
            pl.BlockSpec((1, Cp4), lambda n, t: (0, 0)),                # conv2 bias
        ],
        out_specs=pl.BlockSpec((1, 1, R0, Cp4), lambda n, t: (n, t, 0, 0)),
        scratch_shapes=[
            pltpu.VMEM((R_cat, Ck), compute_dtype),    # merged skip|up slab (+halo)
            pltpu.VMEM((R_mid, Cp4), compute_dtype),   # relu(conv1) slab (+halo)
            pltpu.VMEM((R1m, Cp4), jnp.float32),       # conv1 f32 accumulator
            pltpu.VMEM((R0, Cp4), jnp.float32),        # conv2 f32 accumulator
        ],
        compiler_params=pltpu.CompilerParams(
            dimension_semantics=("parallel", "parallel"),
            vmem_limit_bytes=vmem_limit),
    )(x1_t, x2_t, m_cat, m_mid, wup, bup, w1m, b1, w2m, b2)

    # un-phase (bf16 reshapes, one small transpose, halo-column slice):
    out = out_t.reshape(N, H2, W2p, 2, 2, Cout)[:, :, :W2]
    out = out.transpose(0, 1, 3, 2, 4, 5).reshape(N, H, W, Cout)
    return jnp.transpose(out, (0, 3, 1, 2))           # NCHW, compute_dtype


# ---------------------------------------------------------------------------
# Pure-JAX reference.  Operands are quantized to bf16 at the same points the
# kernel does (accumulation in f32), so the comparison is apples-to-apples.
# ---------------------------------------------------------------------------
def ref_forward(inputs1_nchw, inputs2_nchw, params):
    q = lambda t: t.astype(jnp.bfloat16).astype(jnp.float32)
    hi = jax.lax.Precision.HIGHEST

    x1 = jnp.transpose(inputs1_nchw, (0, 2, 3, 1))
    x2 = jnp.transpose(inputs2_nchw, (0, 2, 3, 1))

    # ConvTranspose2d(k=2, s=2)
    up = jnp.einsum("nhwc,cokl->nhkwlo", q(x2), q(params["w_up"]), precision=hi)
    N, H2, _, W2, _, Cout = up.shape
    up = up.reshape(N, 2 * H2, 2 * W2, Cout) + params["b_up"]

    o2 = (up.shape[1] - x1.shape[1]) // 2
    if o2:
        x1 = jnp.pad(x1, ((0, 0), (o2, o2), (o2, o2), (0, 0)))
    cat = jnp.concatenate([q(x1), q(up)], axis=-1)

    def conv(x, w, b):
        y = jax.lax.conv_general_dilated(
            x, q(w), window_strides=(1, 1), padding=((1, 1), (1, 1)),
            dimension_numbers=("NHWC", "HWIO", "NHWC"), precision=hi)
        return jnp.maximum(y + b, 0.0)

    h = q(conv(cat, params["w1_hwio"], params["b1"]))
    h = conv(h, params["w2_hwio"], params["b2"])
    return jnp.transpose(h, (0, 3, 1, 2))


if __name__ == "__main__":
    # Shapes consistent with unetUp(in_size=16, out_size=8, is_deconv=True):
    #   inputs2: (2, in_size, 8, 8)              -> up -> (2, out_size, 16, 16)
    #   inputs1: (2, in_size - out_size, 16, 16)    (skip connection)
    in_size, out_size = 16, 8
    N, H1, W1 = 2, 16, 16
    H2, W2 = H1 // 2, W1 // 2

    key = jax.random.PRNGKey(0)
    ks = jax.random.split(key, 8)
    params = {
        # ConvTranspose2d weight: (in_channels, out_channels, kH, kW)
        "w_up": jax.random.normal(ks[0], (in_size, out_size, 2, 2), jnp.float32) * 0.1,
        "b_up": jax.random.normal(ks[1], (out_size,), jnp.float32) * 0.1,
        # Conv2d weights converted to HWIO (dy, dx, Cin, Cout)
        "w1_hwio": jnp.transpose(
            jax.random.normal(ks[2], (out_size, in_size, 3, 3), jnp.float32) * 0.1,
            (2, 3, 1, 0)),
        "b1": jax.random.normal(ks[3], (out_size,), jnp.float32) * 0.1,
        "w2_hwio": jnp.transpose(
            jax.random.normal(ks[4], (out_size, out_size, 3, 3), jnp.float32) * 0.1,
            (2, 3, 1, 0)),
        "b2": jax.random.normal(ks[5], (out_size,), jnp.float32) * 0.1,
    }
    inputs1 = jax.random.normal(ks[6], (N, in_size - out_size, H1, W1), jnp.float32)
    inputs2 = jax.random.normal(ks[7], (N, in_size, H2, W2), jnp.float32)

    fwd = jax.jit(unet_up_forward)
    out = jax.block_until_ready(fwd(inputs1, inputs2, params)).astype(jnp.float32)
    ref = jax.block_until_ready(ref_forward(inputs1, inputs2, params))
    ref = ref.astype(jnp.bfloat16).astype(jnp.float32)   # kernel emits bf16

    assert out.shape == (N, out_size, H1, W1), out.shape
    max_err = float(jnp.max(jnp.abs(out - ref)))
    assert jnp.allclose(out, ref, rtol=5e-3, atol=5e-3), max_err
    print("KERNEL_OK")
</pallas_src>

<mosaic_0001>
module attributes {stable_mosaic.version = 11 : i64} {
  func.func @kernel(%arg0: i32, %arg1: i32, %arg2: memref<1x1x128x32xbf16, #tpu.memory_space<vmem>>, %arg3: memref<1x1x128x16xbf16, #tpu.memory_space<vmem>>, %arg4: memref<1x128x1xf32, #tpu.memory_space<vmem>>, %arg5: memref<1x96x1xf32, #tpu.memory_space<vmem>>, %arg6: memref<16x32xbf16, #tpu.memory_space<vmem>>, %arg7: memref<1x32xf32, #tpu.memory_space<vmem>>, %arg8: memref<9x64x32xbf16, #tpu.memory_space<vmem>>, %arg9: memref<1x32xf32, #tpu.memory_space<vmem>>, %arg10: memref<9x32x32xbf16, #tpu.memory_space<vmem>>, %arg11: memref<1x32xf32, #tpu.memory_space<vmem>>, %arg12: memref<1x1x64x32xbf16, #tpu.memory_space<vmem>>, %arg13: memref<144x64xbf16, #tpu.memory_space<vmem>>, %arg14: memref<112x32xbf16, #tpu.memory_space<vmem>>, %arg15: memref<96x32xf32, #tpu.memory_space<vmem>>, %arg16: memref<64x32xf32, #tpu.memory_space<vmem>>) attributes {dimension_semantics = [#tpu.dimension_semantics<parallel>, #tpu.dimension_semantics<parallel>], iteration_bounds = array<i64: 2, 2>, scalar_prefetch = 0 : i64, scratch_operands = 4 : i64, tpu.core_type = #tpu.core_type<tc>, window_params = [{transform_indices = @transform_0, window_bounds = array<i64: 1, 1, 128, 32>}, {transform_indices = @transform_1, window_bounds = array<i64: 1, 1, 128, 16>}, {transform_indices = @transform_2, window_bounds = array<i64: 1, 128, 1>}, {transform_indices = @transform_3, window_bounds = array<i64: 1, 96, 1>}, {pipeline_mode = #tpu.pipeline_mode<synchronous>, transform_indices = @transform_4, window_bounds = array<i64: 16, 32>}, {pipeline_mode = #tpu.pipeline_mode<synchronous>, transform_indices = @transform_5, window_bounds = array<i64: 1, 32>}, {pipeline_mode = #tpu.pipeline_mode<synchronous>, transform_indices = @transform_6, window_bounds = array<i64: 9, 64, 32>}, {pipeline_mode = #tpu.pipeline_mode<synchronous>, transform_indices = @transform_7, window_bounds = array<i64: 1, 32>}, {pipeline_mode = #tpu.pipeline_mode<synchronous>, transform_indices = @transform_8, window_bounds = array<i64: 9, 32, 32>}, {pipeline_mode = #tpu.pipeline_mode<synchronous>, transform_indices = @transform_9, window_bounds = array<i64: 1, 32>}, {transform_indices = @transform_10, window_bounds = array<i64: 1, 1, 64, 32>}]} {
    %cst = arith.constant 0.000000e+00 : bf16
    %0 = vector.broadcast %cst : bf16 to vector<8x64xbf16>
    %c0 = arith.constant 0 : index
    %c0_0 = arith.constant 0 : index
    %1 = vector.load %arg13[%c0, %c0_0] : memref<144x64xbf16, #tpu.memory_space<vmem>>, vector<8x64xbf16>
    tpu.vector_store %arg13[%c0, %c0_0], %0 {strides = array<i32>} : memref<144x64xbf16, #tpu.memory_space<vmem>>, vector<8x64xbf16>,
    %cst_1 = arith.constant 0.000000e+00 : bf16
    %2 = vector.broadcast %cst_1 : bf16 to vector<8x64xbf16>
    %c136 = arith.constant 136 : index
    %c0_2 = arith.constant 0 : index
    %3 = vector.load %arg13[%c136, %c0_2] : memref<144x64xbf16, #tpu.memory_space<vmem>>, vector<8x64xbf16>
    tpu.vector_store %arg13[%c136, %c0_2], %2 {strides = array<i32>} : memref<144x64xbf16, #tpu.memory_space<vmem>>, vector<8x64xbf16>,
    %cst_3 = arith.constant 0.000000e+00 : bf16
    %4 = vector.broadcast %cst_3 : bf16 to vector<8x32xbf16>
    %c0_4 = arith.constant 0 : index
    %c0_5 = arith.constant 0 : index
    %5 = vector.load %arg14[%c0_4, %c0_5] : memref<112x32xbf16, #tpu.memory_space<vmem>>, vector<8x32xbf16>
    tpu.vector_store %arg14[%c0_4, %c0_5], %4 {strides = array<i32>} : memref<112x32xbf16, #tpu.memory_space<vmem>>, vector<8x32xbf16>,
    %cst_6 = arith.constant 0.000000e+00 : bf16
    %6 = vector.broadcast %cst_6 : bf16 to vector<8x32xbf16>
    %c104 = arith.constant 104 : index
    %c0_7 = arith.constant 0 : index
    %7 = vector.load %arg14[%c104, %c0_7] : memref<112x32xbf16, #tpu.memory_space<vmem>>, vector<8x32xbf16>
    tpu.vector_store %arg14[%c104, %c0_7], %6 {strides = array<i32>} : memref<112x32xbf16, #tpu.memory_space<vmem>>, vector<8x32xbf16>,
    %c0_8 = arith.constant 0 : index
    %c0_9 = arith.constant 0 : index
    %c0_10 = arith.constant 0 : index
    %c0_11 = arith.constant 0 : index
    %8 = vector.load %arg2[%c0_8, %c0_9, %c0_10, %c0_11] : memref<1x1x128x32xbf16, #tpu.memory_space<vmem>>, vector<1x1x128x32xbf16>
    %9 = vector.shape_cast %8 : vector<1x1x128x32xbf16> to vector<128x32xbf16>
    %c8 = arith.constant 8 : index
    %c0_12 = arith.constant 0 : index
    %10 = vector.load %arg13[%c8, %c0_12] : memref<144x64xbf16, #tpu.memory_space<vmem>>, vector<128x32xbf16>
    tpu.vector_store %arg13[%c8, %c0_12], %9 {strides = array<i32>} : memref<144x64xbf16, #tpu.memory_space<vmem>>, vector<128x32xbf16>,
    %c0_13 = arith.constant 0 : index
    %c0_14 = arith.constant 0 : index
    %c0_15 = arith.constant 0 : index
    %c0_16 = arith.constant 0 : index
    %11 = vector.load %arg3[%c0_13, %c0_14, %c0_15, %c0_16] : memref<1x1x128x16xbf16, #tpu.memory_space<vmem>>, vector<1x1x128x16xbf16>
    %12 = vector.shape_cast %11 : vector<1x1x128x16xbf16> to vector<128x16xbf16>
    %c0_17 = arith.constant 0 : index
    %c0_18 = arith.constant 0 : index
    %13 = vector.load %arg6[%c0_17, %c0_18] : memref<16x32xbf16, #tpu.memory_space<vmem>>, vector<16x32xbf16>
    %cst_19 = arith.constant dense<0.000000e+00> : vector<128x32xf32>
    %14 = tpu.matmul %12, %13, %cst_19 {dimension_numbers = #tpu.dot_dimension_numbers<[1], [0], [0], [1], [0, 0, 1, 1], [], []>} : vector<128x16xbf16>, vector<16x32xbf16>, vector<128x32xf32> -> vector<128x32xf32>
    %c0_20 = arith.constant 0 : index
    %c0_21 = arith.constant 0 : index
    %15 = vector.load %arg7[%c0_20, %c0_21] : memref<1x32xf32, #tpu.memory_space<vmem>>, vector<1x32xf32>
    %16 = vector.broadcast %15 : vector<1x32xf32> to vector<128x32xf32>
    %17 = arith.addf %14, %16 : vector<128x32xf32>
    %c0_22 = arith.constant 0 : index
    %c0_23 = arith.constant 0 : index
    %c0_24 = arith.constant 0 : index
    %18 = vector.load %arg4[%c0_22, %c0_23, %c0_24] : memref<1x128x1xf32, #tpu.memory_space<vmem>>, vector<1x128x1xf32>
    %19 = vector.shape_cast %18 : vector<1x128x1xf32> to vector<128x1xf32>
    %20 = vector.broadcast %19 : vector<128x1xf32> to vector<128x32xf32>
    %21 = arith.mulf %17, %20 : vector<128x32xf32>
    %22 = arith.truncf %21 : vector<128x32xf32> to vector<128x32xbf16>
    %c8_25 = arith.constant 8 : index
    %c32 = arith.constant 32 : index
    %23 = vector.load %arg13[%c8_25, %c32] : memref<144x64xbf16, #tpu.memory_space<vmem>>, vector<128x32xbf16>
    tpu.vector_store %arg13[%c8_25, %c32], %22 {strides = array<i32>} : memref<144x64xbf16, #tpu.memory_space<vmem>>, vector<128x32xbf16>,
    %c7 = arith.constant 7 : index
    %c0_26 = arith.constant 0 : index
    %24 = vector.load %arg13[%c7, %c0_26] : memref<144x64xbf16, #tpu.memory_space<vmem>>, vector<96x64xbf16>
    %c0_27 = arith.constant 0 : index
    %c0_28 = arith.constant 0 : index
    %c0_29 = arith.constant 0 : index
    %25 = vector.load %arg8[%c0_27, %c0_28, %c0_29] : memref<9x64x32xbf16, #tpu.memory_space<vmem>>, vector<1x64x32xbf16>
    %26 = vector.shape_cast %25 : vector<1x64x32xbf16> to vector<64x32xbf16>
    %cst_30 = arith.constant dense<0.000000e+00> : vector<96x32xf32>
    %27 = tpu.matmul %24, %26, %cst_30 {dimension_numbers = #tpu.dot_dimension_numbers<[1], [0], [0], [1], [0, 0, 1, 1], [], []>} : vector<96x64xbf16>, vector<64x32xbf16>, vector<96x32xf32> -> vector<96x32xf32>
    %c0_31 = arith.constant 0 : index
    %c0_32 = arith.constant 0 : index
    %28 = vector.load %arg15[%c0_31, %c0_32] : memref<96x32xf32, #tpu.memory_space<vmem>>, vector<96x32xf32>
    tpu.vector_store %arg15[%c0_31, %c0_32], %27 {strides = array<i32>} : memref<96x32xf32, #tpu.memory_space<vmem>>, vector<96x32xf32>,
    %c8_33 = arith.constant 8 : index
    %c0_34 = arith.constant 0 : index
    %29 = vector.load %arg13[%c8_33, %c0_34] : memref<144x64xbf16, #tpu.memory_space<vmem>>, vector<96x64xbf16>
    %c1 = arith.constant 1 : index
    %c0_35 = arith.constant 0 : index
    %c0_36 = arith.constant 0 : index
    %30 = vector.load %arg8[%c1, %c0_35, %c0_36] : memref<9x64x32xbf16, #tpu.memory_space<vmem>>, vector<1x64x32xbf16>
    %31 = vector.shape_cast %30 : vector<1x64x32xbf16> to vector<64x32xbf16>
    %cst_37 = arith.constant dense<0.000000e+00> : vector<96x32xf32>
    %32 = tpu.matmul %29, %31, %cst_37 {dimension_numbers = #tpu.dot_dimension_numbers<[1], [0], [0], [1], [0, 0, 1, 1], [], []>} : vector<96x64xbf16>, vector<64x32xbf16>, vector<96x32xf32> -> vector<96x32xf32>
    %c0_38 = arith.constant 0 : index
    %c0_39 = arith.constant 0 : index
    %33 = vector.load %arg15[%c0_38, %c0_39] : memref<96x32xf32, #tpu.memory_space<vmem>>, vector<96x32xf32>
    %34 = arith.addf %33, %32 : vector<96x32xf32>
    %c0_40 = arith.constant 0 : index
    %c0_41 = arith.constant 0 : index
    %35 = vector.load %arg15[%c0_40, %c0_41] : memref<96x32xf32, #tpu.memory_space<vmem>>, vector<96x32xf32>
    tpu.vector_store %arg15[%c0_40, %c0_41], %34 {strides = array<i32>} : memref<96x32xf32, #tpu.memory_space<vmem>>, vector<96x32xf32>,
    %c9 = arith.constant 9 : index
    %c0_42 = arith.constant 0 : index
    %36 = vector.load %arg13[%c9, %c0_42] : memref<144x64xbf16, #tpu.memory_space<vmem>>, vector<96x64xbf16>
    %c2 = arith.constant 2 : index
    %c0_43 = arith.constant 0 : index
    %c0_44 = arith.constant 0 : index
    %37 = vector.load %arg8[%c2, %c0_43, %c0_44] : memref<9x64x32xbf16, #tpu.memory_space<vmem>>, vector<1x64x32xbf16>
    %38 = vector.shape_cast %37 : vector<1x64x32xbf16> to vector<64x32xbf16>
    %cst_45 = arith.constant dense<0.000000e+00> : vector<96x32xf32>
    %39 = tpu.matmul %36, %38, %cst_45 {dimension_numbers = #tpu.dot_dimension_numbers<[1], [0], [0], [1], [0, 0, 1, 1], [], []>} : vector<96x64xbf16>, vector<64x32xbf16>, vector<96x32xf32> -> vector<96x32xf32>
    %c0_46 = arith.constant 0 : index
    %c0_47 = arith.constant 0 : index
    %40 = vector.load %arg15[%c0_46, %c0_47] : memref<96x32xf32, #tpu.memory_space<vmem>>, vector<96x32xf32>
    %41 = arith.addf %40, %39 : vector<96x32xf32>
    %c0_48 = arith.constant 0 : index
    %c0_49 = arith.constant 0 : index
    %42 = vector.load %arg15[%c0_48, %c0_49] : memref<96x32xf32, #tpu.memory_space<vmem>>, vector<96x32xf32>
    tpu.vector_store %arg15[%c0_48, %c0_49], %41 {strides = array<i32>} : memref<96x32xf32, #tpu.memory_space<vmem>>, vector<96x32xf32>,
    %c23 = arith.constant 23 : index
    %c0_50 = arith.constant 0 : index
    %43 = vector.load %arg13[%c23, %c0_50] : memref<144x64xbf16, #tpu.memory_space<vmem>>, vector<96x64xbf16>
    %c3 = arith.constant 3 : index
    %c0_51 = arith.constant 0 : index
    %c0_52 = arith.constant 0 : index
    %44 = vector.load %arg8[%c3, %c0_51, %c0_52] : memref<9x64x32xbf16, #tpu.memory_space<vmem>>, vector<1x64x32xbf16>
    %45 = vector.shape_cast %44 : vector<1x64x32xbf16> to vector<64x32xbf16>
    %cst_53 = arith.constant dense<0.000000e+00> : vector<96x32xf32>
    %46 = tpu.matmul %43, %45, %cst_53 {dimension_numbers = #tpu.dot_dimension_numbers<[1], [0], [0], [1], [0, 0, 1, 1], [], []>} : vector<96x64xbf16>, vector<64x32xbf16>, vector<96x32xf32> -> vector<96x32xf32>
    %c0_54 = arith.constant 0 : index
    %c0_55 = arith.constant 0 : index
    %47 = vector.load %arg15[%c0_54, %c0_55] : memref<96x32xf32, #tpu.memory_space<vmem>>, vector<96x32xf32>
    %48 = arith.addf %47, %46 : vector<96x32xf32>
    %c0_56 = arith.constant 0 : index
    %c0_57 = arith.constant 0 : index
    %49 = vector.load %arg15[%c0_56, %c0_57] : memref<96x32xf32, #tpu.memory_space<vmem>>, vector<96x32xf32>
    tpu.vector_store %arg15[%c0_56, %c0_57], %48 {strides = array<i32>} : memref<96x32xf32, #tpu.memory_space<vmem>>, vector<96x32xf32>,
    %c24 = arith.constant 24 : index
    %c0_58 = arith.constant 0 : index
    %50 = vector.load %arg13[%c24, %c0_58] : memref<144x64xbf16, #tpu.memory_space<vmem>>, vector<96x64xbf16>
    %c4 = arith.constant 4 : index
    %c0_59 = arith.constant 0 : index
    %c0_60 = arith.constant 0 : index
    %51 = vector.load %arg8[%c4, %c0_59, %c0_60] : memref<9x64x32xbf16, #tpu.memory_space<vmem>>, vector<1x64x32xbf16>
    %52 = vector.shape_cast %51 : vector<1x64x32xbf16> to vector<64x32xbf16>
    %cst_61 = arith.constant dense<0.000000e+00> : vector<96x32xf32>
    %53 = tpu.matmul %50, %52, %cst_61 {dimension_numbers = #tpu.dot_dimension_numbers<[1], [0], [0], [1], [0, 0, 1, 1], [], []>} : vector<96x64xbf16>, vector<64x32xbf16>, vector<96x32xf32> -> vector<96x32xf32>
    %c0_62 = arith.constant 0 : index
    %c0_63 = arith.constant 0 : index
    %54 = vector.load %arg15[%c0_62, %c0_63] : memref<96x32xf32, #tpu.memory_space<vmem>>, vector<96x32xf32>
    %55 = arith.addf %54, %53 : vector<96x32xf32>
    %c0_64 = arith.constant 0 : index
    %c0_65 = arith.constant 0 : index
    %56 = vector.load %arg15[%c0_64, %c0_65] : memref<96x32xf32, #tpu.memory_space<vmem>>, vector<96x32xf32>
    tpu.vector_store %arg15[%c0_64, %c0_65], %55 {strides = array<i32>} : memref<96x32xf32, #tpu.memory_space<vmem>>, vector<96x32xf32>,
    %c25 = arith.constant 25 : index
    %c0_66 = arith.constant 0 : index
    %57 = vector.load %arg13[%c25, %c0_66] : memref<144x64xbf16, #tpu.memory_space<vmem>>, vector<96x64xbf16>
    %c5 = arith.constant 5 : index
    %c0_67 = arith.constant 0 : index
    %c0_68 = arith.constant 0 : index
    %58 = vector.load %arg8[%c5, %c0_67, %c0_68] : memref<9x64x32xbf16, #tpu.memory_space<vmem>>, vector<1x64x32xbf16>
    %59 = vector.shape_cast %58 : vector<1x64x32xbf16> to vector<64x32xbf16>
    %cst_69 = arith.constant dense<0.000000e+00> : vector<96x32xf32>
    %60 = tpu.matmul %57, %59, %cst_69 {dimension_numbers = #tpu.dot_dimension_numbers<[1], [0], [0], [1], [0, 0, 1, 1], [], []>} : vector<96x64xbf16>, vector<64x32xbf16>, vector<96x32xf32> -> vector<96x32xf32>
    %c0_70 = arith.constant 0 : index
    %c0_71 = arith.constant 0 : index
    %61 = vector.load %arg15[%c0_70, %c0_71] : memref<96x32xf32, #tpu.memory_space<vmem>>, vector<96x32xf32>
    %62 = arith.addf %61, %60 : vector<96x32xf32>
    %c0_72 = arith.constant 0 : index
    %c0_73 = arith.constant 0 : index
    %63 = vector.load %arg15[%c0_72, %c0_73] : memref<96x32xf32, #tpu.memory_space<vmem>>, vector<96x32xf32>
    tpu.vector_store %arg15[%c0_72, %c0_73], %62 {strides = array<i32>} : memref<96x32xf32, #tpu.memory_space<vmem>>, vector<96x32xf32>,
    %c39 = arith.constant 39 : index
    %c0_74 = arith.constant 0 : index
    %64 = vector.load %arg13[%c39, %c0_74] : memref<144x64xbf16, #tpu.memory_space<vmem>>, vector<96x64xbf16>
    %c6 = arith.constant 6 : index
    %c0_75 = arith.constant 0 : index
    %c0_76 = arith.constant 0 : index
    %65 = vector.load %arg8[%c6, %c0_75, %c0_76] : memref<9x64x32xbf16, #tpu.memory_space<vmem>>, vector<1x64x32xbf16>
    %66 = vector.shape_cast %65 : vector<1x64x32xbf16> to vector<64x32xbf16>
    %cst_77 = arith.constant dense<0.000000e+00> : vector<96x32xf32>
    %67 = tpu.matmul %64, %66, %cst_77 {dimension_numbers = #tpu.dot_dimension_numbers<[1], [0], [0], [1], [0, 0, 1, 1], [], []>} : vector<96x64xbf16>, vector<64x32xbf16>, vector<96x32xf32> -> vector<96x32xf32>
    %c0_78 = arith.constant 0 : index
    %c0_79 = arith.constant 0 : index
    %68 = vector.load %arg15[%c0_78, %c0_79] : memref<96x32xf32, #tpu.memory_space<vmem>>, vector<96x32xf32>
    %69 = arith.addf %68, %67 : vector<96x32xf32>
    %c0_80 = arith.constant 0 : index
    %c0_81 = arith.constant 0 : index
    %70 = vector.load %arg15[%c0_80, %c0_81] : memref<96x32xf32, #tpu.memory_space<vmem>>, vector<96x32xf32>
    tpu.vector_store %arg15[%c0_80, %c0_81], %69 {strides = array<i32>} : memref<96x32xf32, #tpu.memory_space<vmem>>, vector<96x32xf32>,
    %c40 = arith.constant 40 : index
    %c0_82 = arith.constant 0 : index
    %71 = vector.load %arg13[%c40, %c0_82] : memref<144x64xbf16, #tpu.memory_space<vmem>>, vector<96x64xbf16>
    %c7_83 = arith.constant 7 : index
    %c0_84 = arith.constant 0 : index
    %c0_85 = arith.constant 0 : index
    %72 = vector.load %arg8[%c7_83, %c0_84, %c0_85] : memref<9x64x32xbf16, #tpu.memory_space<vmem>>, vector<1x64x32xbf16>
    %73 = vector.shape_cast %72 : vector<1x64x32xbf16> to vector<64x32xbf16>
    %cst_86 = arith.constant dense<0.000000e+00> : vector<96x32xf32>
    %74 = tpu.matmul %71, %73, %cst_86 {dimension_numbers = #tpu.dot_dimension_numbers<[1], [0], [0], [1], [0, 0, 1, 1], [], []>} : vector<96x64xbf16>, vector<64x32xbf16>, vector<96x32xf32> -> vector<96x32xf32>
    %c0_87 = arith.constant 0 : index
    %c0_88 = arith.constant 0 : index
    %75 = vector.load %arg15[%c0_87, %c0_88] : memref<96x32xf32, #tpu.memory_space<vmem>>, vector<96x32xf32>
    %76 = arith.addf %75, %74 : vector<96x32xf32>
    %c0_89 = arith.constant 0 : index
    %c0_90 = arith.constant 0 : index
    %77 = vector.load %arg15[%c0_89, %c0_90] : memref<96x32xf32, #tpu.memory_space<vmem>>, vector<96x32xf32>
    tpu.vector_store %arg15[%c0_89, %c0_90], %76 {strides = array<i32>} : memref<96x32xf32, #tpu.memory_space<vmem>>, vector<96x32xf32>,
    %c41 = arith.constant 41 : index
    %c0_91 = arith.constant 0 : index
    %78 = vector.load %arg13[%c41, %c0_91] : memref<144x64xbf16, #tpu.memory_space<vmem>>, vector<96x64xbf16>
    %c8_92 = arith.constant 8 : index
    %c0_93 = arith.constant 0 : index
    %c0_94 = arith.constant 0 : index
    %79 = vector.load %arg8[%c8_92, %c0_93, %c0_94] : memref<9x64x32xbf16, #tpu.memory_space<vmem>>, vector<1x64x32xbf16>
    %80 = vector.shape_cast %79 : vector<1x64x32xbf16> to vector<64x32xbf16>
    %cst_95 = arith.constant dense<0.000000e+00> : vector<96x32xf32>
    %81 = tpu.matmul %78, %80, %cst_95 {dimension_numbers = #tpu.dot_dimension_numbers<[1], [0], [0], [1], [0, 0, 1, 1], [], []>} : vector<96x64xbf16>, vector<64x32xbf16>, vector<96x32xf32> -> vector<96x32xf32>
    %c0_96 = arith.constant 0 : index
    %c0_97 = arith.constant 0 : index
    %82 = vector.load %arg15[%c0_96, %c0_97] : memref<96x32xf32, #tpu.memory_space<vmem>>, vector<96x32xf32>
    %83 = arith.addf %82, %81 : vector<96x32xf32>
    %c0_98 = arith.constant 0 : index
    %c0_99 = arith.constant 0 : index
    %84 = vector.load %arg15[%c0_98, %c0_99] : memref<96x32xf32, #tpu.memory_space<vmem>>, vector<96x32xf32>
    tpu.vector_store %arg15[%c0_98, %c0_99], %83 {strides = array<i32>} : memref<96x32xf32, #tpu.memory_space<vmem>>, vector<96x32xf32>,
    %c0_100 = arith.constant 0 : index
    %c0_101 = arith.constant 0 : index
    %85 = vector.load %arg15[%c0_100, %c0_101] : memref<96x32xf32, #tpu.memory_space<vmem>>, vector<96x32xf32>
    %c0_102 = arith.constant 0 : index
    %c0_103 = arith.constant 0 : index
    %86 = vector.load %arg9[%c0_102, %c0_103] : memref<1x32xf32, #tpu.memory_space<vmem>>, vector<1x32xf32>
    %87 = vector.broadcast %86 : vector<1x32xf32> to vector<96x32xf32>
    %88 = arith.addf %85, %87 : vector<96x32xf32>
    %cst_104 = arith.constant 0.000000e+00 : f32
    %89 = vector.broadcast %cst_104 : f32 to vector<96x32xf32>
    %90 = arith.maximumf %88, %89 : vector<96x32xf32>
    %c0_105 = arith.constant 0 : index
    %c0_106 = arith.constant 0 : index
    %c0_107 = arith.constant 0 : index
    %91 = vector.load %arg5[%c0_105, %c0_106, %c0_107] : memref<1x96x1xf32, #tpu.memory_space<vmem>>, vector<1x96x1xf32>
    %92 = vector.shape_cast %91 : vector<1x96x1xf32> to vector<96x1xf32>
    %93 = vector.broadcast %92 : vector<96x1xf32> to vector<96x32xf32>
    %94 = arith.mulf %90, %93 : vector<96x32xf32>
    %95 = arith.truncf %94 : vector<96x32xf32> to vector<96x32xbf16>
    %c8_108 = arith.constant 8 : index
    %c0_109 = arith.constant 0 : index
    %96 = vector.load %arg14[%c8_108, %c0_109] : memref<112x32xbf16, #tpu.memory_space<vmem>>, vector<96x32xbf16>
    tpu.vector_store %arg14[%c8_108, %c0_109], %95 {strides = array<i32>} : memref<112x32xbf16, #tpu.memory_space<vmem>>, vector<96x32xbf16>,
    %c7_110 = arith.constant 7 : index
    %c0_111 = arith.constant 0 : index
    %97 = vector.load %arg14[%c7_110, %c0_111] : memref<112x32xbf16, #tpu.memory_space<vmem>>, vector<64x32xbf16>
    %c0_112 = arith.constant 0 : index
    %c0_113 = arith.constant 0 : index
    %c0_114 = arith.constant 0 : index
    %98 = vector.load %arg10[%c0_112, %c0_113, %c0_114] : memref<9x32x32xbf16, #tpu.memory_space<vmem>>, vector<1x32x32xbf16>
    %99 = vector.shape_cast %98 : vector<1x32x32xbf16> to vector<32x32xbf16>
    %cst_115 = arith.constant dense<0.000000e+00> : vector<64x32xf32>
    %100 = tpu.matmul %97, %99, %cst_115 {dimension_numbers = #tpu.dot_dimension_numbers<[1], [0], [0], [1], [0, 0, 1, 1], [], []>} : vector<64x32xbf16>, vector<32x32xbf16>, vector<64x32xf32> -> vector<64x32xf32>
    %c0_116 = arith.constant 0 : index
    %c0_117 = arith.constant 0 : index
    %101 = vector.load %arg16[%c0_116, %c0_117] : memref<64x32xf32, #tpu.memory_space<vmem>>, vector<64x32xf32>
    tpu.vector_store %arg16[%c0_116, %c0_117], %100 {strides = array<i32>} : memref<64x32xf32, #tpu.memory_space<vmem>>, vector<64x32xf32>,
    %c8_118 = arith.constant 8 : index
    %c0_119 = arith.constant 0 : index
    %102 = vector.load %arg14[%c8_118, %c0_119] : memref<112x32xbf16, #tpu.memory_space<vmem>>, vector<64x32xbf16>
    %c1_120 = arith.constant 1 : index
    %c0_121 = arith.constant 0 : index
    %c0_122 = arith.constant 0 : index
    %103 = vector.load %arg10[%c1_120, %c0_121, %c0_122] : memref<9x32x32xbf16, #tpu.memory_space<vmem>>, vector<1x32x32xbf16>
    %104 = vector.shape_cast %103 : vector<1x32x32xbf16> to vector<32x32xbf16>
    %cst_123 = arith.constant dense<0.000000e+00> : vector<64x32xf32>
    %105 = tpu.matmul %102, %104, %cst_123 {dimension_numbers = #tpu.dot_dimension_numbers<[1], [0], [0], [1], [0, 0, 1, 1], [], []>} : vector<64x32xbf16>, vector<32x32xbf16>, vector<64x32xf32> -> vector<64x32xf32>
    %c0_124 = arith.constant 0 : index
    %c0_125 = arith.constant 0 : index
    %106 = vector.load %arg16[%c0_124, %c0_125] : memref<64x32xf32, #tpu.memory_space<vmem>>, vector<64x32xf32>
    %107 = arith.addf %106, %105 : vector<64x32xf32>
    %c0_126 = arith.constant 0 : index
    %c0_127 = arith.constant 0 : index
    %108 = vector.load %arg16[%c0_126, %c0_127] : memref<64x32xf32, #tpu.memory_space<vmem>>, vector<64x32xf32>
    tpu.vector_store %arg16[%c0_126, %c0_127], %107 {strides = array<i32>} : memref<64x32xf32, #tpu.memory_space<vmem>>, vector<64x32xf32>,
    %c9_128 = arith.constant 9 : index
    %c0_129 = arith.constant 0 : index
    %109 = vector.load %arg14[%c9_128, %c0_129] : memref<112x32xbf16, #tpu.memory_space<vmem>>, vector<64x32xbf16>
    %c2_130 = arith.constant 2 : index
    %c0_131 = arith.constant 0 : index
    %c0_132 = arith.constant 0 : index
    %110 = vector.load %arg10[%c2_130, %c0_131, %c0_132] : memref<9x32x32xbf16, #tpu.memory_space<vmem>>, vector<1x32x32xbf16>
    %111 = vector.shape_cast %110 : vector<1x32x32xbf16> to vector<32x32xbf16>
    %cst_133 = arith.constant dense<0.000000e+00> : vector<64x32xf32>
    %112 = tpu.matmul %109, %111, %cst_133 {dimension_numbers = #tpu.dot_dimension_numbers<[1], [0], [0], [1], [0, 0, 1, 1], [], []>} : vector<64x32xbf16>, vector<32x32xbf16>, vector<64x32xf32> -> vector<64x32xf32>
    %c0_134 = arith.constant 0 : index
    %c0_135 = arith.constant 0 : index
    %113 = vector.load %arg16[%c0_134, %c0_135] : memref<64x32xf32, #tpu.memory_space<vmem>>, vector<64x32xf32>
    %114 = arith.addf %113, %112 : vector<64x32xf32>
    %c0_136 = arith.constant 0 : index
    %c0_137 = arith.constant 0 : index
    %115 = vector.load %arg16[%c0_136, %c0_137] : memref<64x32xf32, #tpu.memory_space<vmem>>, vector<64x32xf32>
    tpu.vector_store %arg16[%c0_136, %c0_137], %114 {strides = array<i32>} : memref<64x32xf32, #tpu.memory_space<vmem>>, vector<64x32xf32>,
    %c23_138 = arith.constant 23 : index
    %c0_139 = arith.constant 0 : index
    %116 = vector.load %arg14[%c23_138, %c0_139] : memref<112x32xbf16, #tpu.memory_space<vmem>>, vector<64x32xbf16>
    %c3_140 = arith.constant 3 : index
    %c0_141 = arith.constant 0 : index
    %c0_142 = arith.constant 0 : index
    %117 = vector.load %arg10[%c3_140, %c0_141, %c0_142] : memref<9x32x32xbf16, #tpu.memory_space<vmem>>, vector<1x32x32xbf16>
    %118 = vector.shape_cast %117 : vector<1x32x32xbf16> to vector<32x32xbf16>
    %cst_143 = arith.constant dense<0.000000e+00> : vector<64x32xf32>
    %119 = tpu.matmul %116, %118, %cst_143 {dimension_numbers = #tpu.dot_dimension_numbers<[1], [0], [0], [1], [0, 0, 1, 1], [], []>} : vector<64x32xbf16>, vector<32x32xbf16>, vector<64x32xf32> -> vector<64x32xf32>
    %c0_144 = arith.constant 0 : index
    %c0_145 = arith.constant 0 : index
    %120 = vector.load %arg16[%c0_144, %c0_145] : memref<64x32xf32, #tpu.memory_space<vmem>>, vector<64x32xf32>
    %121 = arith.addf %120, %119 : vector<64x32xf32>
    %c0_146 = arith.constant 0 : index
    %c0_147 = arith.constant 0 : index
    %122 = vector.load %arg16[%c0_146, %c0_147] : memref<64x32xf32, #tpu.memory_space<vmem>>, vector<64x32xf32>
    tpu.vector_store %arg16[%c0_146, %c0_147], %121 {strides = array<i32>} : memref<64x32xf32, #tpu.memory_space<vmem>>, vector<64x32xf32>,
    %c24_148 = arith.constant 24 : index
    %c0_149 = arith.constant 0 : index
    %123 = vector.load %arg14[%c24_148, %c0_149] : memref<112x32xbf16, #tpu.memory_space<vmem>>, vector<64x32xbf16>
    %c4_150 = arith.constant 4 : index
    %c0_151 = arith.constant 0 : index
    %c0_152 = arith.constant 0 : index
    %124 = vector.load %arg10[%c4_150, %c0_151, %c0_152] : memref<9x32x32xbf16, #tpu.memory_space<vmem>>, vector<1x32x32xbf16>
    %125 = vector.shape_cast %124 : vector<1x32x32xbf16> to vector<32x32xbf16>
    %cst_153 = arith.constant dense<0.000000e+00> : vector<64x32xf32>
    %126 = tpu.matmul %123, %125, %cst_153 {dimension_numbers = #tpu.dot_dimension_numbers<[1], [0], [0], [1], [0, 0, 1, 1], [], []>} : vector<64x32xbf16>, vector<32x32xbf16>, vector<64x32xf32> -> vector<64x32xf32>
    %c0_154 = arith.constant 0 : index
    %c0_155 = arith.constant 0 : index
    %127 = vector.load %arg16[%c0_154, %c0_155] : memref<64x32xf32, #tpu.memory_space<vmem>>, vector<64x32xf32>
    %128 = arith.addf %127, %126 : vector<64x32xf32>
    %c0_156 = arith.constant 0 : index
    %c0_157 = arith.constant 0 : index
    %129 = vector.load %arg16[%c0_156, %c0_157] : memref<64x32xf32, #tpu.memory_space<vmem>>, vector<64x32xf32>
    tpu.vector_store %arg16[%c0_156, %c0_157], %128 {strides = array<i32>} : memref<64x32xf32, #tpu.memory_space<vmem>>, vector<64x32xf32>,
    %c25_158 = arith.constant 25 : index
    %c0_159 = arith.constant 0 : index
    %130 = vector.load %arg14[%c25_158, %c0_159] : memref<112x32xbf16, #tpu.memory_space<vmem>>, vector<64x32xbf16>
    %c5_160 = arith.constant 5 : index
    %c0_161 = arith.constant 0 : index
    %c0_162 = arith.constant 0 : index
    %131 = vector.load %arg10[%c5_160, %c0_161, %c0_162] : memref<9x32x32xbf16, #tpu.memory_space<vmem>>, vector<1x32x32xbf16>
    %132 = vector.shape_cast %131 : vector<1x32x32xbf16> to vector<32x32xbf16>
    %cst_163 = arith.constant dense<0.000000e+00> : vector<64x32xf32>
    %133 = tpu.matmul %130, %132, %cst_163 {dimension_numbers = #tpu.dot_dimension_numbers<[1], [0], [0], [1], [0, 0, 1, 1], [], []>} : vector<64x32xbf16>, vector<32x32xbf16>, vector<64x32xf32> -> vector<64x32xf32>
    %c0_164 = arith.constant 0 : index
    %c0_165 = arith.constant 0 : index
    %134 = vector.load %arg16[%c0_164, %c0_165] : memref<64x32xf32, #tpu.memory_space<vmem>>, vector<64x32xf32>
    %135 = arith.addf %134, %133 : vector<64x32xf32>
    %c0_166 = arith.constant 0 : index
    %c0_167 = arith.constant 0 : index
    %136 = vector.load %arg16[%c0_166, %c0_167] : memref<64x32xf32, #tpu.memory_space<vmem>>, vector<64x32xf32>
    tpu.vector_store %arg16[%c0_166, %c0_167], %135 {strides = array<i32>} : memref<64x32xf32, #tpu.memory_space<vmem>>, vector<64x32xf32>,
    %c39_168 = arith.constant 39 : index
    %c0_169 = arith.constant 0 : index
    %137 = vector.load %arg14[%c39_168, %c0_169] : memref<112x32xbf16, #tpu.memory_space<vmem>>, vector<64x32xbf16>
    %c6_170 = arith.constant 6 : index
    %c0_171 = arith.constant 0 : index
    %c0_172 = arith.constant 0 : index
    %138 = vector.load %arg10[%c6_170, %c0_171, %c0_172] : memref<9x32x32xbf16, #tpu.memory_space<vmem>>, vector<1x32x32xbf16>
    %139 = vector.shape_cast %138 : vector<1x32x32xbf16> to vector<32x32xbf16>
    %cst_173 = arith.constant dense<0.000000e+00> : vector<64x32xf32>
    %140 = tpu.matmul %137, %139, %cst_173 {dimension_numbers = #tpu.dot_dimension_numbers<[1], [0], [0], [1], [0, 0, 1, 1], [], []>} : vector<64x32xbf16>, vector<32x32xbf16>, vector<64x32xf32> -> vector<64x32xf32>
    %c0_174 = arith.constant 0 : index
    %c0_175 = arith.constant 0 : index
    %141 = vector.load %arg16[%c0_174, %c0_175] : memref<64x32xf32, #tpu.memory_space<vmem>>, vector<64x32xf32>
    %142 = arith.addf %141, %140 : vector<64x32xf32>
    %c0_176 = arith.constant 0 : index
    %c0_177 = arith.constant 0 : index
    %143 = vector.load %arg16[%c0_176, %c0_177] : memref<64x32xf32, #tpu.memory_space<vmem>>, vector<64x32xf32>
    tpu.vector_store %arg16[%c0_176, %c0_177], %142 {strides = array<i32>} : memref<64x32xf32, #tpu.memory_space<vmem>>, vector<64x32xf32>,
    %c40_178 = arith.constant 40 : index
    %c0_179 = arith.constant 0 : index
    %144 = vector.load %arg14[%c40_178, %c0_179] : memref<112x32xbf16, #tpu.memory_space<vmem>>, vector<64x32xbf16>
    %c7_180 = arith.constant 7 : index
    %c0_181 = arith.constant 0 : index
    %c0_182 = arith.constant 0 : index
    %145 = vector.load %arg10[%c7_180, %c0_181, %c0_182] : memref<9x32x32xbf16, #tpu.memory_space<vmem>>, vector<1x32x32xbf16>
    %146 = vector.shape_cast %145 : vector<1x32x32xbf16> to vector<32x32xbf16>
    %cst_183 = arith.constant dense<0.000000e+00> : vector<64x32xf32>
    %147 = tpu.matmul %144, %146, %cst_183 {dimension_numbers = #tpu.dot_dimension_numbers<[1], [0], [0], [1], [0, 0, 1, 1], [], []>} : vector<64x32xbf16>, vector<32x32xbf16>, vector<64x32xf32> -> vector<64x32xf32>
    %c0_184 = arith.constant 0 : index
    %c0_185 = arith.constant 0 : index
    %148 = vector.load %arg16[%c0_184, %c0_185] : memref<64x32xf32, #tpu.memory_space<vmem>>, vector<64x32xf32>
    %149 = arith.addf %148, %147 : vector<64x32xf32>
    %c0_186 = arith.constant 0 : index
    %c0_187 = arith.constant 0 : index
    %150 = vector.load %arg16[%c0_186, %c0_187] : memref<64x32xf32, #tpu.memory_space<vmem>>, vector<64x32xf32>
    tpu.vector_store %arg16[%c0_186, %c0_187], %149 {strides = array<i32>} : memref<64x32xf32, #tpu.memory_space<vmem>>, vector<64x32xf32>,
    %c41_188 = arith.constant 41 : index
    %c0_189 = arith.constant 0 : index
    %151 = vector.load %arg14[%c41_188, %c0_189] : memref<112x32xbf16, #tpu.memory_space<vmem>>, vector<64x32xbf16>
    %c8_190 = arith.constant 8 : index
    %c0_191 = arith.constant 0 : index
    %c0_192 = arith.constant 0 : index
    %152 = vector.load %arg10[%c8_190, %c0_191, %c0_192] : memref<9x32x32xbf16, #tpu.memory_space<vmem>>, vector<1x32x32xbf16>
    %153 = vector.shape_cast %152 : vector<1x32x32xbf16> to vector<32x32xbf16>
    %cst_193 = arith.constant dense<0.000000e+00> : vector<64x32xf32>
    %154 = tpu.matmul %151, %153, %cst_193 {dimension_numbers = #tpu.dot_dimension_numbers<[1], [0], [0], [1], [0, 0, 1, 1], [], []>} : vector<64x32xbf16>, vector<32x32xbf16>, vector<64x32xf32> -> vector<64x32xf32>
    %c0_194 = arith.constant 0 : index
    %c0_195 = arith.constant 0 : index
    %155 = vector.load %arg16[%c0_194, %c0_195] : memref<64x32xf32, #tpu.memory_space<vmem>>, vector<64x32xf32>
    %156 = arith.addf %155, %154 : vector<64x32xf32>
    %c0_196 = arith.constant 0 : index
    %c0_197 = arith.constant 0 : index
    %157 = vector.load %arg16[%c0_196, %c0_197] : memref<64x32xf32, #tpu.memory_space<vmem>>, vector<64x32xf32>
    tpu.vector_store %arg16[%c0_196, %c0_197], %156 {strides = array<i32>} : memref<64x32xf32, #tpu.memory_space<vmem>>, vector<64x32xf32>,
    %c0_198 = arith.constant 0 : index
    %c0_199 = arith.constant 0 : index
    %158 = vector.load %arg16[%c0_198, %c0_199] : memref<64x32xf32, #tpu.memory_space<vmem>>, vector<64x32xf32>
    %c0_200 = arith.constant 0 : index
    %c0_201 = arith.constant 0 : index
    %159 = vector.load %arg11[%c0_200, %c0_201] : memref<1x32xf32, #tpu.memory_space<vmem>>, vector<1x32xf32>
    %160 = vector.broadcast %159 : vector<1x32xf32> to vector<64x32xf32>
    %161 = arith.addf %158, %160 : vector<64x32xf32>
    %cst_202 = arith.constant 0.000000e+00 : f32
    %162 = vector.broadcast %cst_202 : f32 to vector<64x32xf32>
    %163 = arith.maximumf %161, %162 : vector<64x32xf32>
    %164 = arith.truncf %163 : vector<64x32xf32> to vector<64x32xbf16>
    %c0_203 = arith.constant 0 : index
    %c0_204 = arith.constant 0 : index
    %c0_205 = arith.constant 0 : index
    %c0_206 = arith.constant 0 : index
    %165 = vector.load %arg12[%c0_203, %c0_204, %c0_205, %c0_206] : memref<1x1x64x32xbf16, #tpu.memory_space<vmem>>, vector<1x1x64x32xbf16>
    %166 = vector.shape_cast %165 : vector<1x1x64x32xbf16> to vector<64x32xbf16>
    %167 = vector.shape_cast %164 : vector<64x32xbf16> to vector<1x1x64x32xbf16>
    tpu.vector_store %arg12[%c0_203, %c0_204, %c0_205, %c0_206], %167 {strides = array<i32>} : memref<1x1x64x32xbf16, #tpu.memory_space<vmem>>, vector<1x1x64x32xbf16>,
    return
  }
  func.func @transform_0(%arg0: i32, %arg1: i32) -> (i32, i32, i32, i32) {
    %c0_i32 = arith.constant 0 : i32
    %c0_i32_0 = arith.constant 0 : i32
    %c0_i32_1 = arith.constant 0 : i32
    return %arg0, %arg1, %c0_i32, %c0_i32_0 : i32, i32, i32, i32
  }
  func.func @transform_1(%arg0: i32, %arg1: i32) -> (i32, i32, i32, i32) {
    %c0_i32 = arith.constant 0 : i32
    %c0_i32_0 = arith.constant 0 : i32
    %c0_i32_1 = arith.constant 0 : i32
    return %arg0, %arg1, %c0_i32, %c0_i32_0 : i32, i32, i32, i32
  }
  func.func @transform_2(%arg0: i32, %arg1: i32) -> (i32, i32, i32) {
    %c0_i32 = arith.constant 0 : i32
    %c0_i32_0 = arith.constant 0 : i32
    %c0_i32_1 = arith.constant 0 : i32
    return %arg1, %c0_i32, %c0_i32_0 : i32, i32, i32
  }
  func.func @transform_3(%arg0: i32, %arg1: i32) -> (i32, i32, i32) {
    %c0_i32 = arith.constant 0 : i32
    %c0_i32_0 = arith.constant 0 : i32
    %c0_i32_1 = arith.constant 0 : i32
    return %arg1, %c0_i32, %c0_i32_0 : i32, i32, i32
  }
  func.func @transform_4(%arg0: i32, %arg1: i32) -> (i32, i32) {
    %c0_i32 = arith.constant 0 : i32
    %c0_i32_0 = arith.constant 0 : i32
    %c0_i32_1 = arith.constant 0 : i32
    return %c0_i32, %c0_i32_0 : i32, i32
  }
  func.func @transform_5(%arg0: i32, %arg1: i32) -> (i32, i32) {
    %c0_i32 = arith.constant 0 : i32
    %c0_i32_0 = arith.constant 0 : i32
    %c0_i32_1 = arith.constant 0 : i32
    return %c0_i32, %c0_i32_0 : i32, i32
  }
  func.func @transform_6(%arg0: i32, %arg1: i32) -> (i32, i32, i32) {
    %c0_i32 = arith.constant 0 : i32
    %c0_i32_0 = arith.constant 0 : i32
    %c0_i32_1 = arith.constant 0 : i32
    %c0_i32_2 = arith.constant 0 : i32
    return %c0_i32, %c0_i32_0, %c0_i32_1 : i32, i32, i32
  }
  func.func @transform_7(%arg0: i32, %arg1: i32) -> (i32, i32) {
    %c0_i32 = arith.constant 0 : i32
    %c0_i32_0 = arith.constant 0 : i32
    %c0_i32_1 = arith.constant 0 : i32
    return %c0_i32, %c0_i32_0 : i32, i32
  }
  func.func @transform_8(%arg0: i32, %arg1: i32) -> (i32, i32, i32) {
    %c0_i32 = arith.constant 0 : i32
    %c0_i32_0 = arith.constant 0 : i32
    %c0_i32_1 = arith.constant 0 : i32
    %c0_i32_2 = arith.constant 0 : i32
    return %c0_i32, %c0_i32_0, %c0_i32_1 : i32, i32, i32
  }
  func.func @transform_9(%arg0: i32, %arg1: i32) -> (i32, i32) {
    %c0_i32 = arith.constant 0 : i32
    %c0_i32_0 = arith.constant 0 : i32
    %c0_i32_1 = arith.constant 0 : i32
    return %c0_i32, %c0_i32_0 : i32, i32
  }
  func.func @transform_10(%arg0: i32, %arg1: i32) -> (i32, i32, i32, i32) {
    %c0_i32 = arith.constant 0 : i32
    %c0_i32_0 = arith.constant 0 : i32
    %c0_i32_1 = arith.constant 0 : i32
    return %arg0, %arg1, %c0_i32, %c0_i32_0 : i32, i32, i32, i32
  }
}

</mosaic_0001>

<bundles_post_ra>
// kernel: tile.23
= control target key start
LH: loop header
LB: loop body
LE: loop exit
PB: predicated region body
PF: predicated region fallthrough
CT: control target
= control target key end

     0   :  { %s22_s0 = inlined_call_operand.vmem [shape: f32[8], index: 0, kind: input, shape index: {}]   ;;  %s23_s1 = inlined_call_operand.vmem [shape: f32[4,8], index: 1, kind: output, shape index: {}]  }
   0x1   :  { %v4_v0 = vld [vmem:[%s22_s0] ss:$0 sm:$0xff] }
   0x2   :  { %5 = vst [vmem:[%s23_s1] sm:$0xf] %v4_v0 }

// kernel: tile.24
= control target key start
LH: loop header
LB: loop body
LE: loop exit
PB: predicated region body
PF: predicated region fallthrough
CT: control target
= control target key end

     0   :  { %vm7_vm0 = vcmask 64512   ;;  %s37_s8 = smov 8   ;;  %s38_s9 = smov 16   ;;  %vm13_vm1 = vcmask 261312   ;;  %vm19_vm2 = vcmask 195712   ;;  %vm25_vm3 = vcmask 130112   ;;  %s55_s0 = inlined_call_operand.vmem [shape: f32[4,8], index: 0, kind: input, shape index: {}]   ;;  %s56_s1 = inlined_call_operand.vmem [shape: f32[1,32], index: 1, kind: output, shape index: {}]  }
   0x1   :  { %v4_v0 = vld [vmem:[%s55_s0] sm:$0xf]  ;;  %s36_s0 = smov 24  }
   0x2   :  { %5 = vst [vmem:[#allocation1] sm:$0xf] %v4_v0 }
   0x9   :  { %v10_v1 = vld [vmem:[#allocation1 + $0x3] sm:$0x1]   ;;  %v22_v2 = vld [vmem:[#allocation1 + $0x1] sm:$0x1]   ;;  %v6_v3 = vld [vmem:[#allocation1] sm:$0x1]  }
   0xa   :  { %11 = vrot.lane.b32.xlu0 %v10_v1, %s36_s0  ;;  %23 = vrot.lane.b32.xlu1 %v22_v2, %s37_s8  ;;  %v16_v4 = vld [vmem:[#allocation1 + $0x2] sm:$0x1]   ;;  %8 = vst.msk [vmem:[#allocation0] sm:$0x1] %vm7_vm0, %v6_v3  }
   0xe   :  { %17 = vrot.lane.b32.xlu0 %v16_v4, %s38_s9 }
  0x7c   :  { %v12_v5 = vpop.permute.xlu0 %11   ;;  %v24_v6 = vpop.permute.xlu1 %23  }
  0x7d   :  { %14 = vst.msk [vmem:[#allocation0] sm:$0x1] %vm13_vm1, %v12_v5  }
  0x80   :  { %v18_v7 = vpop.permute.xlu0 %17  }
  0x81   :  { %20 = vst.msk [vmem:[#allocation0] sm:$0x1] %vm19_vm2, %v18_v7  }
  0x82   :  { %26 = vst.msk [vmem:[#allocation0] sm:$0x1] %vm25_vm3, %v24_v6  }
  0x89   :  { %v30_v8 = vld [vmem:[#allocation0] sm:$0x1] }
  0x8a   :  { %32 = vst [vmem:[%s56_s1] sm:$0x1] %v30_v8 }

// kernel: unet_up_forward.1
= control target key start
LH: loop header
LB: loop body
LE: loop exit
PB: predicated region body
PF: predicated region fallthrough
CT: control target
= control target key end

     0   :  { %s5667_s13 = smov 0   ;;  %s5669_s14 = smov 0   ;;  %s6806_s0 = inlined_call_operand.vmem [shape: bf16[2,2,128,32], index: 0, kind: input, shape index: {}]   ;;  %s6807_s1 = inlined_call_operand.vmem [shape: bf16[2,2,128,16], index: 1, kind: input, shape index: {}]   ;;  %s6808_s2 = inlined_call_operand.vmem [shape: f32[2,128,1], index: 2, kind: input, shape index: {}]   ;;  %s6809_s3 = inlined_call_operand.vmem [shape: f32[2,96,1], index: 3, kind: input, shape index: {}]   ;;  %s6810_s4 = inlined_call_operand.vmem [shape: bf16[16,32], index: 4, kind: input, shape index: {}]   ;;  %s6811_s5 = inlined_call_operand.vmem [shape: f32[1,32], index: 5, kind: input, shape index: {}]   ;;  %s6812_s6 = inlined_call_operand.vmem [shape: bf16[9,64,32], index: 6, kind: input, shape index: {}]   ;;  %s6813_s7 = inlined_call_operand.vmem [shape: f32[1,32], index: 7, kind: input, shape index: {}]   ;;  %s6814_s8 = inlined_call_operand.vmem [shape: bf16[9,32,32], index: 8, kind: input, shape index: {}]   ;;  %s6815_s9 = inlined_call_operand.vmem [shape: f32[1,32], index: 9, kind: input, shape index: {}]   ;;  %s6816_s10 = inlined_call_operand.vmem [shape: bf16[2,2,64,32], index: 10, kind: output, shape index: {}]  }
   0x1   :  { %s5671_s15 = smov 0   ;;  %s5673_s16 = smov 0  }
   0x2   :  { %s5675_s17 = smov 0  }
   0x3 LB: > { %s29_s18 = sadd.s32 1, %s5600_s15  ;;  %s32_s19 = sadd.s32 1, %s5604_s16  ;;  %s5608_s17 = sphi %s5675_s17, %s20_s17   ;;  %s5604_s16 = sphi %s5673_s16, %s6820_s16   ;;  %s5600_s15 = sphi %s5671_s15, %s6819_s15   ;;  %s5596_s14 = sphi %s5669_s14, %s6818_s14   ;;  %s5592_s13 = sphi %s5667_s13, %s6817_s13  }
   0x4   : > { %p30_p0 = scmp.ge.s32.totalorder %s29_s18, 2  ;;  %p4691_p1 = scmp.ge.s32.totalorder %s5608_s17, 1 }
   0x5   : > { %p368_p2 = scmp.lt.s32.totalorder %s5608_s17, 5 }
   0x6   : > { %s6822_s18 = smov (%p30_p0, %s29_s18), 0  ;;  %s6824_s19 = smov (!%p30_p0, %s32_s19), %s5604_s16 }
   0x7   : > { %p369_p3 = pnand %p4691_p1, %p368_p2  ;;  %p34_p4 = scmp.ge.s32.totalorder %s6824_s19, 2 }
   0x8   : > { %v5498_v0 = vld [vmem:[%s6810_s4] sm:$0xff] (!%p369_p3)   ;;  %p433_p5 = scmp.lt.s32.totalorder (!%p369_p3), %s5596_s14, 1  ;;  %p435_p6 = scmp.lt.s32.totalorder (!%p369_p3), %s5592_s13, 1  ;;  %vm473_vm0 = vcmask (!%p369_p3), 523268   ;;  %vm475_vm1 = vcmask (!%p369_p3), 257024   ;;  %vm471_vm2 = vcmask (!%p369_p3), 519168  }
   0x9   : > { %s6826_s19 = smov (%p34_p4, %s6824_s19), 0  ;;  %372 = sbr.rel (%p369_p3) target bundleno = 1059 (0x423), region = 60 }
   0xa   : > { %5145 = vmatprep.subr.bf16.mxu0 (!%p369_p3), %v5498_v0  ;;  %5451 = vmatprep.subr.bf16.mxu1 (!%p369_p3), %v5498_v0  ;;  %v5610_v1 = vmov (!%p369_p3), 0   ;;  %vm626_vm3 = vcmask (!%p369_p3), 130048   ;;  %vm477_vm4 = vcmask (!%p369_p3), 261124   ;;  %v5774_v37 = vld [vmem:[%s6811_s5] ss:$0 sm:$0xff] (!%p369_p3)  ;;  %vm546_vm5 = vcmask (!%p369_p3), 261120  }
   0xb   : > { %474 = vst.msk [vmem:[#allocation2 + $0x40] sm:$0xf0] (!%p369_p3), %vm473_vm0, %v5610_v1  ;;  %5146 = vmatpush3.bf16.msra.mxu0 (!%p369_p3), %v5498_v0  ;;  %5452 = vmatpush3.bf16.msra.mxu1 (!%p369_p3), %v5498_v0  ;;  %v5509_v46 = vld [vmem:[%s6812_s6 + $0x20] sm:$0xff] (!%p369_p3)   ;;  %v5511_v48 = vld [vmem:[%s6812_s6 + $0x28] sm:$0xff] (!%p369_p3)   ;;  %vm876_vm6 = vcmask (!%p369_p3), 1043456   ;;  %vm919_vm7 = vcmask (!%p369_p3), 523524  }
   0xc   : > { %476 = vst.msk [vmem:[#allocation3] sm:$0xf] (!%p369_p3), %vm475_vm1, %v5610_v1  ;;  %5497 = vset.pattern.permute.xlu1 (!%p369_p3), %v5610_v1  ;;  %5496 = vset.pattern.permute.xlu0 (!%p369_p3), %v5610_v1  ;;  %v5510_v47 = vld [vmem:[%s6812_s6] sm:$0xff] (!%p369_p3)   ;;  %vm921_vm8 = vcmask (!%p369_p3), 523520   ;;  %vm1033_vm9 = vcmask (!%p369_p3), 523264   ;;  %vm929_vm11 = vcmask (!%p369_p3), 519424  }
   0xd   : > { %472 = vst.msk [vmem:[#allocation2] sm:$0xf] (!%p369_p3), %vm471_vm2, %v5610_v1  ;;  %5183 = vmatprep.subr.bf16.mxu0 (!%p369_p3), %v5509_v46  ;;  %5163 = vmatprep.subr.bf16.mxu1 (!%p369_p3), %v5510_v47  ;;  %vm946_vm10 = vsmask.f32 (!%p369_p3), 4352  ;;  %vm1356_vm12 = vsmask.f32 (!%p369_p3), 3328 }
   0xe   : > { %478 = vst.msk [vmem:[#allocation3 + $0x30] sm:$0xf0] (!%p369_p3), %vm477_vm4, %v5610_v1 }
  0x10   : > { %s6828_s14 = smov (!%p433_p5, %s5596_s14), 1  ;;  %s6830_s13 = smov (!%p435_p6, %s5592_s13), 1 }
  0x11   : > { %s4693_s22 = sshll.u32 %s6828_s14, 5  ;;  %s4692_s23 = sshll.u32 %s6830_s13, 4 }
  0x12   : > { %s4983_s24 = sshll.u32 %s6830_s13, 7  ;;  %s5717_s25 = sadd.s32 %s4693_s22, %s4692_s23 }
  0x13   : > { %s5722_s28 = scalar_lea.vmem %s6808_s2, %s4983_s24  ;;  %s4694_s29 = sshll.u32 %s5717_s25, 2 }
  0x14   : > { %v750_v2 = vld [vmem:[%s5722_s28 + $0x10] sm:$0xff]  ;;  %v748_v3 = vld [vmem:[%s5722_s28] sm:$0xff]  ;;  %s450_s12 = scalar_lea.vmem %s6807_s1, %s4694_s29  ;;  %v751_v4 = vld [vmem:[%s5722_s28 + $0x18] sm:$0xff]  ;;  %s5749_s22 = scalar_lea.vmem %s6806_s0, %s4694_s29 }
  0x15   : > { %776 = vperm.xlu1 %5497, %v750_v2   ;;  %766 = vperm.xlu0 %5496, %v748_v3   ;;  %v749_v5 = vld [vmem:[%s5722_s28 + $0x8] sm:$0xff]  ;;  %v5499_v6 = vld [vmem:[%s450_s12] sm:$0xff]   ;;  %v5503_v12 = vld [vmem:[%s450_s12 + $0x10] sm:$0xff]   ;;  %s5611_s23 = smov 32   ;;  %s4701_s25 = sshll.u32 %s6830_s13, 3 }
  0x16   : > { %v5500_v7 = vld [vmem:[%s450_s12 + $0x20] sm:$0xff]   ;;  %5147 = vmatprep.mubr.msk.bf16.mxu0 %vm626_vm3, %v5499_v6  ;;  %v5501_v8 = vld [vmem:[%s450_s12 + $0x8] sm:$0xff]   ;;  %v5504_v13 = vld [vmem:[%s450_s12 + $0x30] sm:$0xff]  }
  0x17   : > { %v753_v9 = vld [vmem:[%s5722_s28 + $0x28] sm:$0xff]  ;;  %5155 = vmatprep.mubr.msk.bf16.mxu1 %vm626_vm3, %v5500_v7  ;;  %v752_v11 = vld [vmem:[%s5722_s28 + $0x20] sm:$0xff]  ;;  %5148 = vmatmul.mubr.msk.bf16.vlgmr.msra.gmra.mrb[0].mxu0 %vm626_vm3, %v5501_v8  ;;  %v5505_v14 = vld [vmem:[%s450_s12 + $0x18] sm:$0xff]  }
  0x18   : > { %v5502_v10 = vld [vmem:[%s450_s12 + $0x28] sm:$0xff]   ;;  %5151 = vmatprep.mubr.msk.bf16.mxu0 %vm626_vm3, %v5503_v12  ;;  %v755_v15 = vld [vmem:[%s5722_s28 + $0x38] sm:$0xff]  ;;  %v754_v17 = vld [vmem:[%s5722_s28 + $0x30] sm:$0xff]  ;;  %5184 = vmatpush3.bf16.msra.mxu0 %v5509_v46 }
  0x19   : > { %781 = vperm.xlu1 %5497, %v751_v4   ;;  %771 = vperm.xlu0 %5496, %v749_v5   ;;  %v5506_v16 = vld [vmem:[%s450_s12 + $0x38] sm:$0xff]   ;;  %v757_v18 = vld [vmem:[%s5722_s28 + $0x48] sm:$0xff]  ;;  %v756_v19 = vld [vmem:[%s5722_s28 + $0x40] sm:$0xff] }
  0x1a   : > { %5156 = vmatmul.mubr.msk.bf16.vlgmr.msra.gmra.mrb[0].mxu1 %vm626_vm3, %v5502_v10  ;;  %v759_v20 = vld [vmem:[%s5722_s28 + $0x58] sm:$0xff]  ;;  %v758_v21 = vld [vmem:[%s5722_s28 + $0x50] sm:$0xff]  ;;  %v761_v22 = vld [vmem:[%s5722_s28 + $0x68] sm:$0xff]  ;;  %5185 = vmatprep.subr.bf16.mxu0 %v5511_v48 }
  0x1b   : > { %5159 = vmatprep.mubr.msk.bf16.mxu1 %vm626_vm3, %v5504_v13  ;;  %v760_v23 = vld [vmem:[%s5722_s28 + $0x60] sm:$0xff]  ;;  %v763_v24 = vld [vmem:[%s5722_s28 + $0x78] sm:$0xff]  ;;  %v762_v25 = vld [vmem:[%s5722_s28 + $0x70] sm:$0xff]  ;;  %5164 = vmatpush3.bf16.msra.mxu1 %v5510_v47 }
  0x1c   : > { %v5507_v38 = vld [vmem:[%s5749_s22] ss:$0 sps:$4 sm:$0xff]   ;;  %v5508_v40 = vld [vmem:[%s5749_s22 + $0x4] sm:$0xff]   ;;  %v5512_v7 = vld [vmem:[%s5749_s22 + $0xc] sm:$0xff]   ;;  %5186 = vmatpush3.bf16.msra.mxu0 %v5511_v48 }
  0x1d   : > { %791 = vperm.xlu1 %5497, %v753_v9   ;;  %786 = vperm.xlu0 %5496, %v752_v11   ;;  %545 = vst.msk [vmem:[#allocation2] sm:$0xf0] %vm477_vm4, %v5507_v38  ;;  %v5513_v8 = vld [vmem:[%s5749_s22 + $0x14] sm:$0xff]   ;;  %v5514_v13 = vld [vmem:[%s6812_s6 + $0x8] sm:$0xff]  }
  0x1e   : > { %547 = vst.msk [vmem:[#allocation2 + $0x8] sm:$0xff] %vm546_vm5, %v5508_v40  ;;  %548 = vst.msk [vmem:[#allocation2 + $0x10] sm:$0xff] %vm546_vm5, %v5512_v7  ;;  %5165 = vmatprep.subr.bf16.mxu1 %v5514_v13 }
  0x1f   : > { %5152 = vmatmul.mubr.msk.bf16.gmra.mrb[4].mxu0 %vm626_vm3, %v5505_v14  ;;  %v5515_v14 = vld [vmem:[%s6812_s6 + $0x30] sm:$0xff]   ;;  %549 = vst.msk [vmem:[#allocation2 + $0x18] sm:$0xff] %vm546_vm5, %v5513_v8  ;;  %5166 = vmatpush3.bf16.msra.mxu1 %v5514_v13 }
  0x20   : > { %5187 = vmatprep.subr.bf16.mxu0 %v5515_v14 }
  0x21   : > { %801 = vperm.xlu1 %5497, %v755_v15   ;;  %796 = vperm.xlu0 %5496, %v754_v17  }
  0x22   : > { %5160 = vmatmul.mubr.msk.bf16.gmra.mrb[4].mxu1 %vm626_vm3, %v5506_v16  ;;  %5188 = vmatpush3.bf16.msra.mxu0 %v5515_v14 }
  0x25   : > { %811 = vperm.xlu1 %5497, %v757_v18   ;;  %806 = vperm.xlu0 %5496, %v756_v19  }
  0x29   : > { %821 = vperm.xlu1 %5497, %v759_v20   ;;  %816 = vperm.xlu0 %5496, %v758_v21  }
  0x2d   : > { %831 = vperm.xlu1 %5497, %v761_v22   ;;  %826 = vperm.xlu0 %5496, %v760_v23  }
  0x31   : > { %841 = vperm.xlu1 %5497, %v763_v24   ;;  %836 = vperm.xlu0 %5496, %v762_v25  }
  0x94   : > { %v767_v26 = vpop.permute.xlu0 %766  ;;  %v777_v27 = vpop.permute.xlu1 %776 }
  0x98   : > { %v772_v28 = vpop.permute.xlu0 %771  ;;  %v782_v29 = vpop.permute.xlu1 %781 }
  0x9c   : > { %v5763_v30 = vpop.permute.xlu0 %786  ;;  %v5765_v31 = vpop.permute.xlu1 %791 }
  0xa0   : > { %v5767_v32 = vpop.permute.xlu0 %796  ;;  %v5769_v33 = vpop.permute.xlu1 %801 }
  0xa4   : > { %v807_v34 = vpop.permute.xlu0 %806  ;;  %v812_v35 = vpop.permute.xlu1 %811 }
  0xa8   : > { %v817_v36 = vpop.permute.xlu0 %816  ;;  %v822_v39 = vpop.permute.xlu1 %821 }
  0xac   : > { %v5778_v42 = vpop.permute.xlu0 %826  ;;  %v832_v4 = vpop.permute.xlu1 %831 }
  0xb0   : > { %v837_v10 = vpop.permute.xlu0 %836  ;;  %v842_v46 = vpop.permute.xlu1 %841 }
  0xea   : > { %v5149_v41 = vpop.f32.mrb[0].mxu0 }
  0xeb   : > { %v694_v43 = vadd.f32 %v5149_v41, %v5774_v37  ;;  %v685_v45 = vpop.f32.mrb[1].mxu0 }
  0xec   : > { %v686_v50 = vadd.f32 %v5774_v37, %v685_v45  ;;  %v5150_v52 = vpop.f32.mrb[2].mxu0  ;;  %v5519_v45 = vld [vmem:[%s6812_s6 + $0x38] sm:$0xff]  }
  0xed   : > { %v5157_v44 = vpop.f32.mrb[0].mxu1  ;;  %v697_v54 = vadd.f32 %v5150_v52, %v5774_v37  ;;  %v688_v56 = vpop.f32.mrb[3].mxu0  ;;  %v846_v57 = vmul.f32 %v777_v27, %v694_v43  ;;  %5189 = vmatprep.subr.bf16.mxu0 %v5519_v45 }
  0xee   : > { %v726_v49 = vadd.f32 %v5157_v44, %v5774_v37  ;;  %v717_v51 = vpop.f32.mrb[1].mxu1  ;;  %v689_v60 = vadd.f32 %v5774_v37, %v688_v56  ;;  %v844_v1 = vmul.f32 %v767_v26, %v686_v50  ;;  %v5518_v44 = vld [vmem:[%s6812_s6 + $0x10] sm:$0xff]   ;;  %5190 = vmatpush3.bf16.msra.mxu0 %v5519_v45 }
  0xef   : > { %v718_v53 = vadd.f32 %v5774_v37, %v717_v51  ;;  %v5158_v55 = vpop.f32.mrb[2].mxu1  ;;  %v847_v63 = vmul.f32 %v782_v29, %v697_v54  ;;  %5167 = vmatprep.subr.bf16.mxu1 %v5518_v44  ;;  %v5521_v54 = vld [vmem:[%s5749_s22 + $0x34] sm:$0xff]  }
  0xf0   : > { %v854_v58 = vmul.f32 %v817_v36, %v726_v49  ;;  %v729_v59 = vadd.f32 %v5158_v55, %v5774_v37  ;;  %v720_v61 = vpop.f32.mrb[3].mxu1  ;;  %v845_v3 = vmul.f32 %v772_v28, %v689_v60  ;;  %v5517_v36 = vld [vmem:[%s5749_s22 + $0x24] sm:$0xff]   ;;  %5168 = vmatpush3.bf16.msra.mxu1 %v5518_v44  ;;  %553 = vst.msk [vmem:[#allocation2 + $0x38] sm:$0xff] %vm546_vm5, %v5521_v54 }
  0xf1   : > { %v852_v62 = vmul.f32 %v807_v34, %v718_v53  ;;  %v721_v0 = vadd.f32 %v5774_v37, %v720_v61  ;;  %v861_v5 = vpack.c.bf16 %v847_v63, %v846_v57  ;;  %551 = vst.msk [vmem:[#allocation2 + $0x28] sm:$0xff] %vm546_vm5, %v5517_v36  ;;  %v5520_v53 = vld [vmem:[%s5749_s22 + $0x2c] sm:$0xff]  }
  0xf2   : > { %v855_v2 = vmul.f32 %v822_v39, %v729_v59  ;;  %v5153_v11 = vpop.f32.mrb[4].mxu0  ;;  %v860_v12 = vpack.c.bf16 %v845_v3, %v844_v1  ;;  %552 = vst.msk [vmem:[#allocation2 + $0x30] sm:$0xff] %vm546_vm5, %v5520_v53  ;;  %v5857_v1 = vld [vmem:[%s6812_s6 + $0x40] sm:$0xff]  }
  0xf3   : > { %v853_v6 = vmul.f32 %v812_v35, %v721_v0  ;;  %v5807_v15 = vrot.slane %v861_v5, 4  ;;  %v710_v17 = vadd.f32 %v5153_v11, %v5774_v37  ;;  %v701_v19 = vpop.f32.mrb[5].mxu0  ;;  %v5516_v35 = vld [vmem:[%s5749_s22 + $0x1c] sm:$0xff]  }
  0xf4   : > { %v865_v9 = vpack.c.bf16 %v855_v2, %v854_v58  ;;  %v702_v22 = vadd.f32 %v5774_v37, %v701_v19  ;;  %v5154_v24 = vpop.f32.mrb[6].mxu0  ;;  %v877_v25 = vrot.slane %v860_v12, 4  ;;  %550 = vst.msk [vmem:[#allocation2 + $0x20] sm:$0xff] %vm546_vm5, %v5516_v35 }
  0xf5   : > { %v864_v16 = vpack.c.bf16 %v853_v6, %v852_v62  ;;  %v5161_v18 = vpop.f32.mrb[4].mxu1  ;;  %v713_v28 = vadd.f32 %v5154_v24, %v5774_v37  ;;  %v704_v34 = vpop.f32.mrb[7].mxu0  ;;  %v850_v38 = vmul.f32 %v5767_v32, %v710_v17  ;;  %v5523_v62 = vld [vmem:[%s5749_s22 + $0x3c] ss:$0 sps:$4 sm:$0xff]   ;;  %s5453_s22 = smul.u32 96, %s6830_s13 }
  0xf6   : > { %v5812_v20 = vrot.slane %v865_v9, 4  ;;  %v742_v21 = vadd.f32 %v5161_v18, %v5774_v37  ;;  %v733_v23 = vpop.f32.mrb[5].mxu1  ;;  %v705_v41 = vadd.f32 %v5774_v37, %v704_v34  ;;  %892 = vrot.lane.b32.xlu0 %v877_v25, %s5611_s23  ;;  %v848_v32 = vmul.f32 %v5763_v30, %v702_v22  ;;  %554 = vst.msk [vmem:[#allocation2 + $0x40] sm:$0xf] %vm475_vm1, %v5523_v62 }
  0xf7   : > { %v884_v26 = vrot.slane %v864_v16, 4  ;;  %v734_v27 = vadd.f32 %v5774_v37, %v733_v23  ;;  %v5162_v29 = vpop.f32.mrb[6].mxu1  ;;  %v851_v47 = vmul.f32 %v5769_v33, %v713_v28  ;;  %v879_v49 = vsel %vm876_vm6, %v877_v25, %v5807_v15  ;;  %s460_s21 = scalar_lea.vmem %s6809_s3, %s5453_s22 }
  0xf8   : > { %v858_v39 = vmul.f32 %v837_v10, %v742_v21  ;;  %v745_v40 = vadd.f32 %v5162_v29, %v5774_v37  ;;  %v736_v43 = vpop.f32.mrb[7].mxu1  ;;  %v849_v51 = vmul.f32 %v5765_v31, %v705_v41  ;;  %894 = vrot.lane.b32.xlu1 %v879_v49, %s5611_s23  ;;  %v5522_v31 = vld [vmem:[%s6812_s6 + $0x18] sm:$0xff]   ;;  %v2959_v5 = vld [vmem:[%s460_s21] sm:$0xff]  ;;  %v2960_v6 = vld [vmem:[%s460_s21 + $0x8] sm:$0xff] }
  0xf9   : > { %v737_v48 = vadd.f32 %v5774_v37, %v736_v43  ;;  %v887_v30 = vsel %vm876_vm6, %v884_v26, %v5812_v20  ;;  %v856_v33 = vmul.f32 %v5778_v42, %v734_v27  ;;  %v863_v37 = vpack.c.bf16 %v851_v47, %v850_v38  ;;  %5169 = vmatprep.subr.bf16.mxu1 %v5522_v31  ;;  %v2961_v7 = vld [vmem:[%s460_s21 + $0x10] sm:$0xff]  ;;  %v2962_v8 = vld [vmem:[%s460_s21 + $0x18] sm:$0xff]  ;;  %v2963_v9 = vld [vmem:[%s460_s21 + $0x20] sm:$0xff] }
  0xfa   : > { %v859_v50 = vmul.f32 %v842_v46, %v745_v40  ;;  %v862_v56 = vpack.c.bf16 %v849_v51, %v848_v32  ;;  %5170 = vmatpush3.bf16.msra.mxu1 %v5522_v31  ;;  %v2964_v10 = vld [vmem:[%s460_s21 + $0x28] sm:$0xff]  ;;  %v2965_v11 = vld [vmem:[%s460_s21 + $0x30] sm:$0xff]  ;;  %v2966_v12 = vld [vmem:[%s460_s21 + $0x38] sm:$0xff] }
  0xfb   : > { %v857_v52 = vmul.f32 %v832_v4, %v737_v48  ;;  %v882_v57 = vrot.slane %v863_v37, 4  ;;  %5203 = vmatprep.subr.bf16.mxu1 %v5857_v1  ;;  %v5875_v4 = vld [vmem:[%s6812_s6 + $0x60] sm:$0xff]   ;;  %v2968_v14 = vld [vmem:[%s460_s21 + $0x48] sm:$0xff]  ;;  %v2970_v16 = vld [vmem:[%s460_s21 + $0x58] sm:$0xff] }
  0xfc   : > { %v867_v55 = vpack.c.bf16 %v859_v50, %v858_v39  ;;  %v880_v59 = vrot.slane %v862_v56, 4  ;;  %5223 = vmatprep.subr.bf16.mxu0 %v5875_v4  ;;  %v2967_v13 = vld [vmem:[%s460_s21 + $0x40] sm:$0xff] }
  0xfd   : > { %v866_v58 = vpack.c.bf16 %v857_v52, %v856_v33  ;;  %v885_v61 = vsel %vm876_vm6, %v882_v57, %v884_v26  ;;  %v5527_v52 = vld [vmem:[%s6812_s6 + $0x68] sm:$0xff]  }
  0xfe   : > { %v890_v42 = vrot.slane %v867_v55, 4  ;;  %v881_v63 = vsel %vm876_vm6, %v5807_v15, %v880_v59  ;;  %v883_v0 = vsel %vm876_vm6, %v880_v59, %v882_v57  ;;  %v2969_v15 = vld [vmem:[%s460_s21 + $0x50] sm:$0xff] }
  0xff   : > { %v888_v60 = vrot.slane %v866_v58, 4  ;;  %896 = vrot.lane.b32.xlu0 %v881_v63, %s5611_s23  ;;  %898 = vrot.lane.b32.xlu1 %v883_v0, %s5611_s23 }
 0x101   : > { %v889_v2 = vsel %vm876_vm6, %v5812_v20, %v888_v60  ;;  %v891_v3 = vsel %vm876_vm6, %v888_v60, %v890_v42 }
 0x103   : > { %900 = vrot.lane.b32.xlu0 %v885_v61, %s5611_s23  ;;  %902 = vrot.lane.b32.xlu1 %v887_v30, %s5611_s23 }
 0x107   : > { %904 = vrot.lane.b32.xlu0 %v889_v2, %s5611_s23  ;;  %906 = vrot.lane.b32.xlu1 %v891_v3, %s5611_s23 }
 0x10b   : > { %908 = vrot.lane.b32.xlu0 %v890_v42, %s5611_s23  ;;  %2973 = vperm.xlu1 %5497, %v2959_v5   ;;  %s4702_s23 = sshll.u32 %s6828_s14, 4 }
 0x10c   : > { %s467_s26 = sadd.s32 %s4702_s23, %s4701_s25 }
 0x10d   : > { %s4703_s29 = sshll.u32 %s467_s26, 2 }
 0x10e   : > { %s6772_s30 = scalar_lea.vmem %s6816_s10, %s4703_s29 }
 0x10f   : > { %2978 = vperm.xlu0 %5496, %v2960_v6   ;;  %2983 = vperm.xlu1 %5497, %v2961_v7   ;;  %v5529_v6 = vld [vmem:[%s6812_s6 + $0x70] sm:$0xff]  }
 0x113   : > { %2988 = vperm.xlu0 %5496, %v2962_v8   ;;  %2993 = vperm.xlu1 %5497, %v2963_v9  }
 0x117   : > { %2998 = vperm.xlu0 %5496, %v2964_v10   ;;  %3003 = vperm.xlu1 %5497, %v2965_v11  }
 0x11b   : > { %3008 = vperm.xlu0 %5496, %v2966_v12   ;;  %3013 = vperm.xlu1 %5497, %v2967_v13  }
 0x11f   : > { %3018 = vperm.xlu0 %5496, %v2968_v14   ;;  %3023 = vperm.xlu1 %5497, %v2969_v15  }
 0x123   : > { %3028 = vperm.xlu0 %5496, %v2970_v16  }
 0x168   : > { %v893_v17 = vpop.permute.xlu0 %892 }
 0x169   : > { %920 = vst.msk [vmem:[#allocation2] sm:$0xf0] %vm919_vm7, %v893_v17 }
 0x16a   : > { %v895_v18 = vpop.permute.xlu1 %894 }
 0x16b   : > { %922 = vst.msk [vmem:[#allocation2 + $0x8] sm:$0xff] %vm921_vm8, %v895_v18  ;;  %v5530_v18 = vld [vmem:[%s6812_s6 + $0x78] sm:$0xff]  }
 0x170   : > { %v1145_v19 = vld [vmem:[#allocation2] sm:$0xf0] }
 0x171   : > { %v931_v20 = vld [vmem:[#allocation2] sm:$0xf8]  ;;  %v897_v21 = vpop.permute.xlu0 %896  ;;  %v899_v22 = vpop.permute.xlu1 %898  ;;  %v1168_v23 = vrot.slane %v1145_v19, 4 }
 0x172   : > { %v948_v24 = vshrl.u32 %v931_v20, 16  ;;  %v951_v25 = vshll.u32 %v931_v20, 16  ;;  %923 = vst.msk [vmem:[#allocation2 + $0x10] sm:$0xff] %vm921_vm8, %v897_v21  ;;  %924 = vst.msk [vmem:[#allocation2 + $0x18] sm:$0xff] %vm921_vm8, %v899_v22  ;;  %v5884_v26 = vld [vmem:[#allocation2 + $0x8] sm:$0xff]  ;;  %v5528_v20 = vld [vmem:[%s6812_s6 + $0x50] sm:$0xff]  }
 0x173   : > { %v1169_v27 = vrot.slane %v5884_v26, 4  ;;  %v956_v34 = vshrl.u32 %v5884_v26, 16  ;;  %v959_v35 = vshll.u32 %v5884_v26, 16  ;;  %v1578_v7 = vld [vmem:[#allocation2 + $0x8] sm:$0xf8] }
 0x174   : > { %v950_v28 = vrot.slane %v948_v24, 3  ;;  %v953_v29 = vrot.slane %v951_v25, 4  ;;  %v1340_v12 = vld [vmem:[#allocation2] sm:$0xf0]  ;;  %v1595_v16 = vshrl.u32 %v1578_v7, 16  ;;  %v1598_v17 = vshll.u32 %v1578_v7, 16 }
 0x175   : > { %v901_v36 = vpop.permute.xlu0 %900  ;;  %v903_v38 = vpop.permute.xlu1 %902  ;;  %v1170_v39 = vsel %vm876_vm6, %v1168_v23, %v1169_v27  ;;  %v958_v40 = vrot.slane %v956_v34, 3  ;;  %v961_v43 = vrot.slane %v959_v35, 4 }
 0x176   : > { %925 = vst.msk [vmem:[#allocation2 + $0x20] sm:$0xff] %vm921_vm8, %v901_v36  ;;  %926 = vst.msk [vmem:[#allocation2 + $0x28] sm:$0xff] %vm921_vm8, %v903_v38  ;;  %5191 = vmatprep.mubr.msk.bf16.mxu0 %vm1033_vm9, %v1170_v39  ;;  %v954_v41 = vor.u32 %v953_v29, %v950_v28  ;;  %v1361_v28 = vshll.u32 %v1340_v12, 16  ;;  %v1597_v29 = vrot.slane %v1595_v16, 3  ;;  %v1600_v36 = vrot.slane %v1598_v17, 4  ;;  %v5531_v39 = vld [vmem:[%s6812_s6 + $0x58] sm:$0xff]  }
 0x177   : > { %v962_v44 = vor.u32 %v961_v43, %v958_v40  ;;  %v5533_v40 = vld [vmem:[%s6812_s6 + $0xa0] sm:$0xff]  }
 0x179   : > { %v905_v45 = vpop.permute.xlu0 %904  ;;  %v907_v46 = vpop.permute.xlu1 %906  ;;  %v5897_v32 = vld [vmem:[#allocation2 + $0x10] sm:$0xff]  ;;  %v5899_v47 = vld [vmem:[#allocation2 + $0x18] sm:$0xff]  ;;  %v963_v48 = vsel %vm946_vm10, %v954_v41, %v962_v44 }
 0x17a   : > { %927 = vst.msk [vmem:[#allocation2 + $0x30] sm:$0xff] %vm921_vm8, %v905_v45  ;;  %928 = vst.msk [vmem:[#allocation2 + $0x38] sm:$0xff] %vm921_vm8, %v907_v46  ;;  %v5905_v49 = vrot.slane %v5897_v32, 4  ;;  %v5908_v50 = vrot.slane %v5899_v47, 4  ;;  %v965_v51 = vshrl.u32 %v5897_v32, 16  ;;  %5171 = vmatprep.mubr.msk.bf16.mxu1 %vm1033_vm9, %v963_v48  ;;  %v968_v30 = vshll.u32 %v5897_v32, 16 }
 0x17b   : > { %v974_v33 = vshrl.u32 %v5899_v47, 16  ;;  %v977_v37 = vshll.u32 %v5899_v47, 16  ;;  %v1363_v48 = vrot.slane %v1361_v28, 5 }
 0x17c   : > { %v1172_v53 = vsel %vm876_vm6, %v1169_v27, %v5905_v49  ;;  %v5923_v54 = vsel %vm876_vm6, %v5905_v49, %v5908_v50  ;;  %v967_v55 = vrot.slane %v965_v51, 3  ;;  %v970_v57 = vrot.slane %v968_v30, 4 }
 0x17d   : > { %v909_v56 = vpop.permute.xlu0 %908  ;;  %5192 = vmatmul.mubr.msk.bf16.vlgmr.msra.gmra.mrb[8].mxu0 %vm1033_vm9, %v1172_v53  ;;  %v976_v58 = vrot.slane %v974_v33, 3  ;;  %v979_v31 = vrot.slane %v977_v37, 4  ;;  %v5934_v42 = vld [vmem:[#allocation2 + $0x20] sm:$0xff]  ;;  %v5936_v59 = vld [vmem:[#allocation2 + $0x28] sm:$0xff]  ;;  %v1371_v53 = vrot.slane %v959_v35, 5  ;;  %v1380_v7 = vrot.slane %v968_v30, 5 }
 0x17e   : > { %930 = vst.msk [vmem:[#allocation2 + $0x40] sm:$0xf] %vm929_vm11, %v909_v56  ;;  %5195 = vmatprep.mubr.msk.bf16.mxu0 %vm1033_vm9, %v5923_v54  ;;  %5224 = vmatpush3.bf16.msra.mxu0 %v5875_v4  ;;  %v983_v60 = vshrl.u32 %v5934_v42, 16  ;;  %v986_v61 = vshll.u32 %v5934_v42, 16  ;;  %v5943_v62 = vor.u32 %v970_v57, %v967_v55  ;;  %v992_v0 = vshrl.u32 %v5936_v59, 16  ;;  %v5526_v4 = vld [vmem:[%s6812_s6 + $0x48] sm:$0xff]  }
 0x17f   : > { %v5945_v63 = vor.u32 %v979_v31, %v976_v58  ;;  %5225 = vmatprep.subr.bf16.mxu0 %v5527_v52  ;;  %v995_v2 = vshll.u32 %v5936_v59, 16  ;;  %v1175_v3 = vrot.slane %v5934_v42, 4  ;;  %v5951_v5 = vrot.slane %v5936_v59, 4  ;;  %v5532_v57 = vld [vmem:[%s6812_s6 + $0x80] sm:$0xff]   ;;  %v5538_v59 = vld [vmem:[%s6812_s6 + $0xb8] sm:$0xff]  }
 0x180   : > { %v972_v8 = vsel %vm946_vm10, %v962_v44, %v5943_v62  ;;  %v985_v10 = vrot.slane %v983_v60, 3  ;;  %v988_v11 = vrot.slane %v986_v61, 4  ;;  %v994_v13 = vrot.slane %v992_v0, 3 }
 0x181   : > { %v5964_v9 = vsel %vm946_vm10, %v5943_v62, %v5945_v63  ;;  %5172 = vmatmul.mubr.msk.bf16.vlgmr.msra.gmra.mrb[8].mxu1 %vm1033_vm9, %v972_v8  ;;  %v997_v14 = vrot.slane %v995_v2, 4  ;;  %v937_v15 = vld [vmem:[#allocation2 + $0x30] sm:$0xf]  ;;  %v5983_v19 = vsel %vm876_vm6, %v5908_v50, %v1175_v3  ;;  %v5992_v21 = vsel %vm876_vm6, %v1175_v3, %v5951_v5 }
 0x182   : > { %5226 = vmatpush3.bf16.msra.mxu0 %v5527_v52  ;;  %5204 = vmatpush3.bf16.msra.mxu1 %v5857_v1  ;;  %v1358_v1 = vshrl.u32 %v1340_v12, 16  ;;  %v989_v22 = vor.u32 %v988_v11, %v985_v10  ;;  %v1151_v23 = vld [vmem:[#allocation2 + $0x30] sm:$0xf]  ;;  %v1001_v24 = vshrl.u32 %v937_v15, 16  ;;  %v1004_v25 = vshll.u32 %v937_v15, 16  ;;  %v5535_v12 = vld [vmem:[%s6812_s6 + $0xa8] sm:$0xff]  }
 0x183   : > { %5175 = vmatprep.mubr.msk.bf16.mxu1 %vm1033_vm9, %v5964_v9  ;;  %5205 = vmatprep.subr.bf16.mxu1 %v5526_v4  ;;  %v5996_v27 = vor.u32 %v997_v14, %v994_v13  ;;  %v1179_v38 = vrot.slane %v1151_v23, 4  ;;  %v1368_v52 = vrot.slane %v956_v34, 4  ;;  %v1601_v55 = vor.u32 %v1600_v36, %v1597_v29  ;;  %v6028_v35 = vld [vmem:[#allocation2 + $0x30] sm:$0xff]  ;;  %v2010_v14 = vld [vmem:[#allocation2 + $0x8] sm:$0xf0] }
 0x184   : > { %5227 = vmatprep.subr.bf16.mxu0 %v5529_v6  ;;  %v6006_v41 = vsel %vm946_vm10, %v5945_v63, %v989_v22  ;;  %v1003_v43 = vrot.slane %v1001_v24, 3  ;;  %v1006_v44 = vrot.slane %v1004_v25, 4  ;;  %v1360_v45 = vrot.slane %v1358_v1, 4 }
 0x185   : > { %5196 = vmatmul.mubr.msk.bf16.gmra.mrb[12].mxu0 %vm1033_vm9, %v5983_v19  ;;  %v6012_v46 = vsel %vm946_vm10, %v989_v22, %v5996_v27  ;;  %v1180_v56 = vsel %vm876_vm6, %v5951_v5, %v1179_v38  ;;  %v1610_v26 = vsel %vm946_vm10, %v1601_v55, %v5943_v62  ;;  %v1372_v31 = vor.u32 %v1371_v53, %v1368_v52  ;;  %v1346_v22 = vld [vmem:[#allocation2 + $0x30] sm:$0x1f]  ;;  %v5541_v52 = vld [vmem:[%s6812_s6 + $0xe0] sm:$0xff]  }
 0x186   : > { %5199 = vmatprep.mubr.msk.bf16.mxu0 %vm1033_vm9, %v5992_v21  ;;  %5228 = vmatpush3.bf16.msra.mxu0 %v5529_v6  ;;  %v1007_v34 = vor.u32 %v1006_v44, %v1003_v43  ;;  %v1364_v58 = vor.u32 %v1363_v48, %v1360_v45  ;;  %v1639_v3 = vshrl.u32 %v6028_v35, 16  ;;  %v1377_v62 = vrot.slane %v965_v51, 4  ;;  %v1584_v51 = vld [vmem:[#allocation2 + $0x38] sm:$0xf] }
 0x187   : > { %5206 = vmatpush3.bf16.msra.mxu1 %v5526_v4  ;;  %5229 = vmatprep.subr.bf16.mxu0 %v5530_v18  ;;  %v1642_v4 = vshll.u32 %v6028_v35, 16  ;;  %v1386_v10 = vrot.slane %v974_v33, 4  ;;  %v1389_v11 = vrot.slane %v977_v37, 5  ;;  %v1395_v33 = vrot.slane %v983_v60, 4  ;;  %v5539_v48 = vld [vmem:[%s6812_s6 + $0x98] sm:$0xff]  }
 0x188   : > { %5207 = vmatprep.subr.bf16.mxu1 %v5528_v20  ;;  %v1008_v6 = vsel %vm946_vm10, %v5996_v27, %v1007_v34  ;;  %v1373_v8 = vsel %vm1356_vm12, %v1364_v58, %v1372_v31  ;;  %v1641_v13 = vrot.slane %v1639_v3, 3  ;;  %v6051_v30 = vor.u32 %v1380_v7, %v1377_v62 }
 0x189   : > { %5176 = vmatmul.mubr.msk.bf16.gmra.mrb[12].mxu1 %vm1033_vm9, %v6006_v41  ;;  %v1644_v32 = vrot.slane %v1642_v4, 4  ;;  %v6055_v47 = vor.u32 %v1389_v11, %v1386_v10  ;;  %v1398_v37 = vrot.slane %v986_v61, 5  ;;  %v1648_v15 = vshrl.u32 %v1584_v51, 16  ;;  %v5543_v10 = vld [vmem:[%s6812_s6 + $0xe8] sm:$0xff]   ;;  %v2016_v11 = vld [vmem:[#allocation2 + $0x38] sm:$0x1f] }
 0x18a   : > { %5230 = vmatpush3.bf16.msra.mxu0 %v5530_v18  ;;  %5179 = vmatprep.mubr.msk.bf16.mxu1 %vm1033_vm9, %v6012_v46  ;;  %v1651_v16 = vshll.u32 %v1584_v51, 16  ;;  %v5537_v18 = vld [vmem:[%s6812_s6 + $0xb0] sm:$0xff]   ;;  %v1382_v60 = vsel %vm1356_vm12, %v1372_v31, %v6051_v30  ;;  %v1404_v42 = vrot.slane %v992_v0, 4  ;;  %v1407_v61 = vrot.slane %v995_v2, 5  ;;  %v5540_v31 = vld [vmem:[%s6812_s6 + $0xc0] sm:$0xff]  }
 0x18b   : > { %5208 = vmatpush3.bf16.msra.mxu1 %v5528_v20  ;;  %5263 = vmatprep.subr.bf16.mxu0 %v5533_v40  ;;  %v6061_v17 = vor.u32 %v1644_v32, %v1641_v13  ;;  %v2027_v20 = vshrl.u32 %v2010_v14, 16  ;;  %v2030_v1 = vshll.u32 %v2010_v14, 16  ;;  %v1391_v23 = vsel %vm1356_vm12, %v6051_v30, %v6055_v47  ;;  %v5536_v2 = vld [vmem:[%s6812_s6 + $0x90] sm:$0xff]   ;;  %v5546_v32 = vld [vmem:[%s6812_s6 + $0xf8] sm:$0xff]  }
 0x18c   : > { %5209 = vmatprep.subr.bf16.mxu1 %v5531_v39  ;;  %v1399_v24 = vor.u32 %v1398_v37, %v1395_v33  ;;  %v1650_v25 = vrot.slane %v1648_v15, 3  ;;  %v1653_v28 = vrot.slane %v1651_v16, 4  ;;  %v1411_v29 = vshrl.u32 %v1346_v22, 16  ;;  %v5545_v13 = vld [vmem:[%s6812_s6 + $0xf0] sm:$0xff]  }
 0x18d   : > { %5200 = vmatmul.mubr.msk.bf16.gmra.mrb[16].mxu0 %vm1033_vm9, %v1180_v56  ;;  %v6086_v0 = vsel %vm946_vm10, %v5996_v27, %v6061_v17  ;;  %v1414_v36 = vshll.u32 %v1346_v22, 16  ;;  %v1408_v38 = vor.u32 %v1407_v61, %v1404_v42  ;;  %v2029_v27 = vrot.slane %v2027_v20, 4  ;;  %v5544_v14 = vld [vmem:[%s6812_s6 + $0xd0] sm:$0xff]   ;;  %v5547_v20 = vld [vmem:[%s6812_s6 + $0xd8] sm:$0xff]  }
 0x18e   : > { %5231 = vmatprep.mubr.msk.bf16.mxu0 %vm1033_vm9, %v1610_v26  ;;  %v2032_v43 = vrot.slane %v2030_v1, 5  ;;  %v6097_v44 = vsel %vm1356_vm12, %v6055_v47, %v1399_v24  ;;  %v1654_v45 = vor.u32 %v1653_v28, %v1650_v25  ;;  %v1413_v55 = vrot.slane %v1411_v29, 4  ;;  %v2484_v15 = vld [vmem:[#allocation2 + $0x10] sm:$0xf0] }
 0x18f   : > { %5210 = vmatpush3.bf16.msra.mxu1 %v5531_v39  ;;  %v2733_v39 = vrot.slane %v1639_v3, 4  ;;  %v1416_v56 = vrot.slane %v1414_v36, 5  ;;  %v2080_v51 = vshrl.u32 %v2016_v11, 16  ;;  %v5549_v36 = vld [vmem:[%s6812_s6 + $0x108] sm:$0xff]  }
 0x190   : > { %5243 = vmatprep.subr.bf16.mxu1 %v5532_v57  ;;  %v2033_v34 = vor.u32 %v2032_v43, %v2029_v27  ;;  %v1655_v58 = vsel %vm946_vm10, %v6061_v17, %v1654_v45  ;;  %v2490_v43 = vld [vmem:[#allocation2 + $0x40] sm:$0xf] }
 0x191   : > { %5180 = vmatmul.mubr.msk.bf16.gmra.mrb[16].mxu1 %vm1033_vm9, %v1008_v6  ;;  %v1815_v6 = vld [vmem:[#allocation2 + $0x8] sm:$0xf0]  ;;  %v2082_v33 = vrot.slane %v2080_v51, 4 }
 0x192   : > { %5211 = vmatprep.mubr.msk.bf16.mxu1 %vm1033_vm9, %v1373_v8  ;;  %v2042_v3 = vsel %vm1356_vm12, %v2033_v34, %v6051_v30  ;;  %v1838_v62 = vrot.slane %v1815_v6, 4  ;;  %v2247_v30 = vld [vmem:[#allocation2 + $0x10] sm:$0xf8] }
 0x193   : > { %v2264_v16 = vshrl.u32 %v2247_v30, 16 }
 0x194   : > { %v1840_v8 = vsel %vm876_vm6, %v1838_v62, %v5905_v49  ;;  %v2083_v49 = vshll.u32 %v2016_v11, 16  ;;  %v2685_v11 = vld [vmem:[#allocation2 + $0x40] sm:$0x1f] }
 0x195   : > { %5232 = vmatmul.mubr.msk.bf16.vlgmr.msra.gmra.mrb[20].mxu0 %vm1033_vm9, %v5964_v9  ;;  %v5534_v9 = vld [vmem:[%s6812_s6 + $0x88] sm:$0xff]   ;;  %v2266_v61 = vrot.slane %v2264_v16, 3  ;;  %v2752_v51 = vshll.u32 %v2685_v11, 16 }
 0x196   : > { %5235 = vmatprep.mubr.msk.bf16.mxu0 %vm1033_vm9, %v6006_v41  ;;  %5264 = vmatpush3.bf16.msra.mxu0 %v5533_v40  ;;  %v2736_v40 = vrot.slane %v1642_v4, 5  ;;  %v1417_v4 = vor.u32 %v1416_v56, %v1413_v55  ;;  %v2085_v37 = vrot.slane %v2083_v49, 5  ;;  %v5551_v56 = vld [vmem:[%s6812_s6 + $0x118] sm:$0xff]  }
 0x197   : > { %5265 = vmatprep.subr.bf16.mxu0 %v5535_v12 }
 0x198   : > { %v6105_v53 = vor.u32 %v2736_v40, %v2733_v39  ;;  %v1418_v7 = vsel %vm1356_vm12, %v1408_v38, %v1417_v4  ;;  %v2253_v40 = vld [vmem:[#allocation2 + $0x40] sm:$0xf] }
 0x199   : > { %5212 = vmatmul.mubr.msk.bf16.vlgmr.msra.gmra.mrb[20].mxu1 %vm1033_vm9, %v1382_v60  ;;  %v2507_v60 = vrot.slane %v2484_v15, 4  ;;  %v2317_v45 = vshrl.u32 %v2253_v40, 16 }
 0x19a   : > { %5266 = vmatpush3.bf16.msra.mxu0 %v5535_v12  ;;  %5244 = vmatpush3.bf16.msra.mxu1 %v5532_v57  ;;  %v6108_v57 = vsel %vm1356_vm12, %v1399_v24, %v1408_v38  ;;  %v6114_v26 = vsel %vm1356_vm12, %v1408_v38, %v6105_v53  ;;  %v5542_v12 = vld [vmem:[%s6812_s6 + $0xc8] sm:$0xff]  }
 0x19b   : > { %5215 = vmatprep.mubr.msk.bf16.mxu1 %vm1033_vm9, %v1391_v23  ;;  %5245 = vmatprep.subr.bf16.mxu1 %v5534_v9  ;;  %v2319_v34 = vrot.slane %v2317_v45, 3 }
 0x19c   : > { %5267 = vmatprep.subr.bf16.mxu0 %v5537_v18 }
 0x19d   : > { %5236 = vmatmul.mubr.msk.bf16.gmra.mrb[24].mxu0 %vm1033_vm9, %v6012_v46 }
 0x19e   : > { %5239 = vmatprep.mubr.msk.bf16.mxu0 %vm1033_vm9, %v6086_v0  ;;  %5268 = vmatpush3.bf16.msra.mxu0 %v5537_v18  ;;  %v2086_v18 = vor.u32 %v2085_v37, %v2082_v33 }
 0x19f   : > { %5246 = vmatpush3.bf16.msra.mxu1 %v5534_v9  ;;  %5269 = vmatprep.subr.bf16.mxu0 %v5538_v59  ;;  %v2267_v9 = vshll.u32 %v2247_v30, 16 }
 0x1a0   : > { %5247 = vmatprep.subr.bf16.mxu1 %v5536_v2  ;;  %v2087_v22 = vsel %vm1356_vm12, %v6105_v53, %v2086_v18 }
 0x1a1   : > { %5216 = vmatmul.mubr.msk.bf16.gmra.mrb[24].mxu1 %vm1033_vm9, %v6097_v44  ;;  %v2269_v1 = vrot.slane %v2267_v9, 4 }
 0x1a2   : > { %5270 = vmatpush3.bf16.msra.mxu0 %v5538_v59  ;;  %5219 = vmatprep.mubr.msk.bf16.mxu1 %vm1033_vm9, %v6108_v57 }
 0x1a3   : > { %5248 = vmatpush3.bf16.msra.mxu1 %v5536_v2  ;;  %5303 = vmatprep.subr.bf16.mxu0 %v5541_v52  ;;  %v2270_v25 = vor.u32 %v2269_v1, %v2266_v61  ;;  %v2489_v2 = vld [vmem:[#allocation2 + $0x38] sm:$0xff] }
 0x1a4   : > { %5249 = vmatprep.subr.bf16.mxu1 %v5539_v48  ;;  %v2311_v29 = vshll.u32 %v2489_v2, 16  ;;  %v2516_v38 = vrot.slane %v2489_v2, 4 }
 0x1a5   : > { %5240 = vmatmul.mubr.msk.bf16.gmra.mrb[28].mxu0 %vm1033_vm9, %v1655_v58  ;;  %v2279_v59 = vsel %vm946_vm10, %v2270_v25, %v5945_v63 }
 0x1a6   : > { %5271 = vmatprep.mubr.msk.bf16.mxu0 %vm1033_vm9, %v2042_v3  ;;  %v2313_v39 = vrot.slane %v2311_v29, 4 }
 0x1a7   : > { %5250 = vmatpush3.bf16.msra.mxu1 %v5539_v48 }
 0x1a8   : > { %5283 = vmatprep.subr.bf16.mxu1 %v5540_v31 }
 0x1a9   : > { %5220 = vmatmul.mubr.msk.bf16.gmra.mrb[28].mxu1 %vm1033_vm9, %v1418_v7 }
 0x1aa   : > { %5251 = vmatprep.mubr.msk.bf16.mxu1 %vm1033_vm9, %v1840_v8 }
 0x1ad   : > { %5272 = vmatmul.mubr.msk.bf16.vlgmr.msra.gmra.mrb[32].mxu0 %vm1033_vm9, %v1391_v23  ;;  %v5548_v23 = vld [vmem:[%s6812_s6 + $0x100] sm:$0xff]  }
 0x1ae   : > { %5275 = vmatprep.mubr.msk.bf16.mxu0 %vm1033_vm9, %v6097_v44  ;;  %5304 = vmatpush3.bf16.msra.mxu0 %v5541_v52 }
 0x1af   : > { %5305 = vmatprep.subr.bf16.mxu0 %v5543_v10 }
 0x1b1   : > { %5252 = vmatmul.mubr.msk.bf16.vlgmr.msra.gmra.mrb[32].mxu1 %vm1033_vm9, %v5923_v54  ;;  %v1847_v54 = vrot.slane %v6028_v35, 4  ;;  %v1821_v35 = vld [vmem:[#allocation2 + $0x38] sm:$0xf] }
 0x1b2   : > { %5306 = vmatpush3.bf16.msra.mxu0 %v5543_v10  ;;  %5284 = vmatpush3.bf16.msra.mxu1 %v5540_v31  ;;  %v1849_v24 = vrot.slane %v1821_v35, 4  ;;  %v2745_v10 = vrot.slane %v2311_v29, 5  ;;  %v5554_v35 = vld [vmem:[%s6814_s8 + $0x8] sm:$0xff]  }
 0x1b3   : > { %5255 = vmatprep.mubr.msk.bf16.mxu1 %vm1033_vm9, %v5983_v19  ;;  %5285 = vmatprep.subr.bf16.mxu1 %v5542_v12  ;;  %v1848_v42 = vsel %vm876_vm6, %v5951_v5, %v1847_v54  ;;  %v2509_v5 = vsel %vm876_vm6, %v2507_v60, %v5908_v50  ;;  %v2308_v50 = vshrl.u32 %v2489_v2, 16  ;;  %v2517_v27 = vsel %vm876_vm6, %v1847_v54, %v2516_v38  ;;  %v5552_v60 = vld [vmem:[%s6814_s8] sm:$0xff]  }
 0x1b4   : > { %5307 = vmatprep.subr.bf16.mxu0 %v5545_v13  ;;  %v1850_v28 = vsel %vm876_vm6, %v1847_v54, %v1849_v24  ;;  %v5555_v24 = vld [vmem:[%s6814_s8 + $0x18] sm:$0xff]  }
 0x1b5   : > { %5276 = vmatmul.mubr.msk.bf16.gmra.mrb[36].mxu0 %vm1033_vm9, %v6108_v57  ;;  %v2310_v63 = vrot.slane %v2308_v50, 3 }
 0x1b6   : > { %5279 = vmatprep.mubr.msk.bf16.mxu0 %vm1033_vm9, %v6114_v26  ;;  %5308 = vmatpush3.bf16.msra.mxu0 %v5545_v13 }
 0x1b7   : > { %5286 = vmatpush3.bf16.msra.mxu1 %v5542_v12  ;;  %5309 = vmatprep.subr.bf16.mxu0 %v5546_v32  ;;  %v2314_v48 = vor.u32 %v2313_v39, %v2310_v63  ;;  %v2749_v12 = vshrl.u32 %v2685_v11, 16 }
 0x1b8   : > { %5287 = vmatprep.subr.bf16.mxu1 %v5544_v14 }
 0x1b9   : > { %5256 = vmatmul.mubr.msk.bf16.gmra.mrb[36].mxu1 %vm1033_vm9, %v5992_v21  ;;  %v2315_v31 = vsel %vm946_vm10, %v6061_v17, %v2314_v48  ;;  %v2751_v13 = vrot.slane %v2749_v12, 4 }
 0x1ba   : > { %5310 = vmatpush3.bf16.msra.mxu0 %v5546_v32  ;;  %5259 = vmatprep.mubr.msk.bf16.mxu1 %vm1033_vm9, %v1848_v42  ;;  %v2754_v32 = vrot.slane %v2752_v51, 5 }
 0x1bb   : > { %5288 = vmatpush3.bf16.msra.mxu1 %v5544_v14  ;;  %5343 = vmatprep.subr.bf16.mxu0 %v5552_v60 }
 0x1bc   : > { %5289 = vmatprep.subr.bf16.mxu1 %v5547_v20 }
 0x1bd   : > { %5280 = vmatmul.mubr.msk.bf16.gmra.mrb[40].mxu0 %vm1033_vm9, %v2087_v22 }
 0x1be   : > { %5311 = vmatprep.mubr.msk.bf16.mxu0 %vm1033_vm9, %v2509_v5 }
 0x1bf   : > { %5290 = vmatpush3.bf16.msra.mxu1 %v5547_v20 }
 0x1c0   : > { %5323 = vmatprep.subr.bf16.mxu1 %v5548_v23 }
 0x1c1   : > { %5260 = vmatmul.mubr.msk.bf16.gmra.mrb[40].mxu1 %vm1033_vm9, %v1850_v28 }
 0x1c2   : > { %5291 = vmatprep.mubr.msk.bf16.mxu1 %vm1033_vm9, %v2279_v59 }
 0x1c5   : > { %5312 = vmatmul.mubr.msk.bf16.vlgmr.msra.gmra.mrb[44].mxu0 %vm1033_vm9, %v5983_v19  ;;  %v2679_v19 = vld [vmem:[#allocation2 + $0x10] sm:$0xf0] }
 0x1c6   : > { %5315 = vmatprep.mubr.msk.bf16.mxu0 %vm1033_vm9, %v5992_v21  ;;  %v5550_v21 = vld [vmem:[%s6812_s6 + $0x110] sm:$0xff]   ;;  %v2696_v52 = vshrl.u32 %v2679_v19, 16  ;;  %v2699_v55 = vshll.u32 %v2679_v19, 16  ;;  %5344 = vmatpush3.bf16.msra.mxu0 %v5552_v60 }
 0x1c7   : > { %5345 = vmatprep.subr.bf16.mxu0 %v5554_v35 }
 0x1c8   : > { %v2698_v3 = vrot.slane %v2696_v52, 4  ;;  %v2701_v4 = vrot.slane %v2699_v55, 5 }
 0x1c9   : > { %5292 = vmatmul.mubr.msk.bf16.vlgmr.msra.gmra.mrb[44].mxu1 %vm1033_vm9, %v6006_v41  ;;  %v2320_v41 = vshll.u32 %v2253_v40, 16 }
 0x1ca   : > { %5324 = vmatpush3.bf16.msra.mxu1 %v5548_v23  ;;  %5295 = vmatprep.mubr.msk.bf16.mxu1 %vm1033_vm9, %v6012_v46  ;;  %v2518_v46 = vrot.slane %v2490_v43, 4  ;;  %v2702_v7 = vor.u32 %v2701_v4, %v2698_v3  ;;  %v6260_v4 = vld [vmem:[%s6814_s8 + $0x20] sm:$0xff]  }
 0x1cb   : > { %5325 = vmatprep.subr.bf16.mxu1 %v5549_v36  ;;  %v2322_v58 = vrot.slane %v2320_v41, 4  ;;  %5346 = vmatpush3.bf16.msra.mxu0 %v5554_v35 }
 0x1cc   : > { %v2519_v6 = vsel %vm876_vm6, %v2516_v38, %v2518_v46  ;;  %v2711_v17 = vsel %vm1356_vm12, %v2702_v7, %v6055_v47  ;;  %5367 = vmatprep.subr.bf16.mxu0 %v6260_v4 }
 0x1cd   : > { %5316 = vmatmul.mubr.msk.bf16.gmra.mrb[48].mxu0 %vm1033_vm9, %v1848_v42  ;;  %v2323_v62 = vor.u32 %v2322_v58, %v2319_v34  ;;  %v5553_v42 = vld [vmem:[%s6814_s8 + $0x10] sm:$0xff]  }
 0x1ce   : > { %5319 = vmatprep.mubr.msk.bf16.mxu0 %vm1033_vm9, %v2517_v27  ;;  %5326 = vmatpush3.bf16.msra.mxu1 %v5549_v36 }
 0x1cf   : > { %5327 = vmatprep.subr.bf16.mxu1 %v5550_v21  ;;  %v2324_v8 = vsel %vm946_vm10, %v2314_v48, %v2323_v62  ;;  %v6268_v62 = vld [vmem:[%s6814_s8 + $0x30] sm:$0xff]  }
 0x1d1   : > { %5296 = vmatmul.mubr.msk.bf16.gmra.mrb[48].mxu1 %vm1033_vm9, %v6086_v0  ;;  %v2742_v0 = vrot.slane %v2308_v50, 4 }
 0x1d2   : > { %5299 = vmatprep.mubr.msk.bf16.mxu1 %vm1033_vm9, %v2315_v31  ;;  %5328 = vmatpush3.bf16.msra.mxu1 %v5550_v21 }
 0x1d3   : > { %5329 = vmatprep.subr.bf16.mxu1 %v5551_v56  ;;  %v2746_v49 = vor.u32 %v2745_v10, %v2742_v0 }
 0x1d5   : > { %5320 = vmatmul.mubr.msk.bf16.gmra.mrb[52].mxu0 %vm1033_vm9, %v2519_v6  ;;  %v2747_v47 = vsel %vm1356_vm12, %v6105_v53, %v2746_v49 }
 0x1d6   : > { %5330 = vmatpush3.bf16.msra.mxu1 %v5551_v56 }
 0x1d7   : > { %5355 = vmatprep.subr.bf16.mxu1 %v5553_v42 }
 0x1d9   : > { %5300 = vmatmul.mubr.msk.bf16.gmra.mrb[52].mxu1 %vm1033_vm9, %v2324_v8 }
 0x1da   : > { %5331 = vmatprep.mubr.msk.bf16.mxu1 %vm1033_vm9, %v2711_v17 }
 0x1e1   : > { %5332 = vmatmul.mubr.msk.bf16.vlgmr.msra.gmra.mrb[56].mxu1 %vm1033_vm9, %v6097_v44  ;;  %v2755_v44 = vor.u32 %v2754_v32, %v2751_v13 }
 0x1e2   : > { %5335 = vmatprep.mubr.msk.bf16.mxu1 %vm1033_vm9, %v6108_v57  ;;  %5356 = vmatpush3.bf16.msra.mxu1 %v5553_v42 }
 0x1e3   : > { %v2756_v30 = vsel %vm1356_vm12, %v2746_v49, %v2755_v44  ;;  %5357 = vmatprep.subr.bf16.mxu1 %v5555_v24 }
 0x1e6   : > { %5358 = vmatpush3.bf16.msra.mxu1 %v5555_v24 }
 0x1e7   : > { %5379 = vmatprep.subr.bf16.mxu1 %v6268_v62 }
 0x1e9   : > { %5336 = vmatmul.mubr.msk.bf16.gmra.mrb[60].mxu1 %vm1033_vm9, %v6114_v26 }
 0x1ea   : > { %5339 = vmatprep.mubr.msk.bf16.mxu1 %vm1033_vm9, %v2747_v47 }
 0x1f1   : > { %5340 = vmatmul.mubr.msk.bf16.gmra.mrb[64].mxu1 %vm1033_vm9, %v2756_v30 }
 0x250   : > { %v5193_v14 = vpop.f32.mrb[8].mxu0 }
 0x251   : > { %v1257_v57 = vpop.f32.mrb[9].mxu0 }
 0x252   : > { %v5194_v33 = vpop.f32.mrb[10].mxu0 }
 0x253   : > { %v1260_v37 = vpop.f32.mrb[11].mxu0 }
 0x254   : > { %v5173_v54 = vpop.f32.mrb[8].mxu1 }
 0x255   : > { %1135 = vst.msk [vmem:[#allocation4 + $0x10] sm:$0xff] %vm546_vm5, %v5173_v54  ;;  %v1086_v15 = vpop.f32.mrb[9].mxu1 }
 0x256   : > { %1133 = vst.msk [vmem:[#allocation4] sm:$0xff] %vm546_vm5, %v1086_v15  ;;  %v5174_v26 = vpop.f32.mrb[10].mxu1 }
 0x257   : > { %1136 = vst.msk [vmem:[#allocation4 + $0x18] sm:$0xff] %vm546_vm5, %v5174_v26  ;;  %v1089_v53 = vpop.f32.mrb[11].mxu1 }
 0x258   : > { %v5197_v16 = vpop.f32.mrb[12].mxu0  ;;  %1134 = vst.msk [vmem:[#allocation4 + $0x8] sm:$0xff] %vm546_vm5, %v1089_v53 }
 0x259   : > { %v1273_v9 = vpop.f32.mrb[13].mxu0 }
 0x25a   : > { %v5198_v18 = vpop.f32.mrb[14].mxu0 }
 0x25b   : > { %v1276_v20 = vpop.f32.mrb[15].mxu0 }
 0x25c   : > { %v1306_v61 = vld [vmem:[#allocation4 + $0x10] sm:$0xff]  ;;  %v5177_v1 = vpop.f32.mrb[12].mxu1 }
 0x25d   : > { %v1318_v22 = vadd.f32 %v5193_v14, %v1306_v61  ;;  %v1304_v23 = vld [vmem:[#allocation4] sm:$0xff]  ;;  %1139 = vst.msk [vmem:[#allocation4 + $0x30] sm:$0xff] %vm546_vm5, %v5177_v1  ;;  %v1102_v5 = vpop.f32.mrb[13].mxu1 }
 0x25e   : > { %v1316_v25 = vadd.f32 %v1304_v23, %v1257_v57  ;;  %v1307_v28 = vld [vmem:[#allocation4 + $0x18] sm:$0xff]  ;;  %1137 = vst.msk [vmem:[#allocation4 + $0x20] sm:$0xff] %vm546_vm5, %v1102_v5  ;;  %v5178_v59 = vpop.f32.mrb[14].mxu1 }
 0x25f   : > { %1330 = vst.msk [vmem:[#allocation4 + $0x10] sm:$0xff] %vm546_vm5, %v1318_v22  ;;  %v1319_v2 = vadd.f32 %v5194_v33, %v1307_v28  ;;  %v1305_v50 = vld [vmem:[#allocation4 + $0x8] sm:$0xff]  ;;  %1140 = vst.msk [vmem:[#allocation4 + $0x38] sm:$0xff] %vm546_vm5, %v5178_v59  ;;  %v1105_v29 = vpop.f32.mrb[15].mxu1 }
 0x260   : > { %v5201_v36 = vpop.f32.mrb[16].mxu0  ;;  %1328 = vst.msk [vmem:[#allocation4] sm:$0xff] %vm546_vm5, %v1316_v25  ;;  %v1317_v38 = vadd.f32 %v1305_v50, %v1260_v37  ;;  %1138 = vst.msk [vmem:[#allocation4 + $0x28] sm:$0xff] %vm546_vm5, %v1105_v29 }
 0x261   : > { %v1289_v63 = vpop.f32.mrb[17].mxu0  ;;  %1331 = vst.msk [vmem:[#allocation4 + $0x18] sm:$0xff] %vm546_vm5, %v1319_v2 }
 0x262   : > { %v5202_v39 = vpop.f32.mrb[18].mxu0  ;;  %1329 = vst.msk [vmem:[#allocation4 + $0x8] sm:$0xff] %vm546_vm5, %v1317_v38 }
 0x263   : > { %v1292_v40 = vpop.f32.mrb[19].mxu0 }
 0x264   : > { %v1310_v19 = vld [vmem:[#allocation4 + $0x30] sm:$0xff]  ;;  %v5181_v21 = vpop.f32.mrb[16].mxu1 }
 0x265   : > { %v1322_v27 = vadd.f32 %v5197_v16, %v1310_v19  ;;  %v1308_v43 = vld [vmem:[#allocation4 + $0x20] sm:$0xff]  ;;  %1143 = vst.msk [vmem:[#allocation4 + $0x50] sm:$0xff] %vm546_vm5, %v5181_v21  ;;  %v1118_v45 = vpop.f32.mrb[17].mxu1 }
 0x266   : > { %v1320_v41 = vadd.f32 %v1308_v43, %v1273_v9  ;;  %v1311_v48 = vld [vmem:[#allocation4 + $0x38] sm:$0xff]  ;;  %1141 = vst.msk [vmem:[#allocation4 + $0x40] sm:$0xff] %vm546_vm5, %v1118_v45  ;;  %v5182_v52 = vpop.f32.mrb[18].mxu1  ;;  %v1544_v17 = vld [vmem:[#allocation4 + $0x10] sm:$0xff] }
 0x267   : > { %1334 = vst.msk [vmem:[#allocation4 + $0x30] sm:$0xff] %vm546_vm5, %v1322_v27  ;;  %v1323_v55 = vadd.f32 %v5198_v18, %v1311_v48  ;;  %v1309_v46 = vld [vmem:[#allocation4 + $0x28] sm:$0xff]  ;;  %1144 = vst.msk [vmem:[#allocation4 + $0x58] sm:$0xff] %vm546_vm5, %v5182_v52  ;;  %v1121_v56 = vpop.f32.mrb[19].mxu1  ;;  %v1542_v51 = vld [vmem:[#allocation4] sm:$0xff] }
 0x268   : > { %v5233_v34 = vpop.f32.mrb[20].mxu0  ;;  %1332 = vst.msk [vmem:[#allocation4 + $0x20] sm:$0xff] %vm546_vm5, %v1320_v41  ;;  %v1321_v58 = vadd.f32 %v1309_v46, %v1276_v20  ;;  %1142 = vst.msk [vmem:[#allocation4 + $0x48] sm:$0xff] %vm546_vm5, %v1121_v56  ;;  %v1545_v44 = vld [vmem:[#allocation4 + $0x18] sm:$0xff] }
 0x269   : > { %v1732_v31 = vpop.f32.mrb[21].mxu0  ;;  %1335 = vst.msk [vmem:[#allocation4 + $0x38] sm:$0xff] %vm546_vm5, %v1323_v55  ;;  %v1543_v37 = vld [vmem:[#allocation4 + $0x8] sm:$0xff] }
 0x26a   : > { %v6255_v3 = vpop.f32.mrb[22].mxu0  ;;  %1333 = vst.msk [vmem:[#allocation4 + $0x28] sm:$0xff] %vm546_vm5, %v1321_v58 }
 0x26b   : > { %v6263_v6 = vpop.f32.mrb[23].mxu0 }
 0x26c   : > { %v1314_v7 = vld [vmem:[#allocation4 + $0x50] sm:$0xff]  ;;  %v5213_v8 = vpop.f32.mrb[20].mxu1 }
 0x26d   : > { %v1326_v0 = vadd.f32 %v5201_v36, %v1314_v7  ;;  %v1312_v10 = vld [vmem:[#allocation4 + $0x40] sm:$0xff]  ;;  %v1556_v11 = vadd.f32 %v5213_v8, %v1544_v17  ;;  %v1495_v12 = vpop.f32.mrb[21].mxu1 }
 0x26e   : > { %v1324_v49 = vadd.f32 %v1312_v10, %v1289_v63  ;;  %v1315_v13 = vld [vmem:[#allocation4 + $0x58] sm:$0xff]  ;;  %v1554_v32 = vadd.f32 %v1542_v51, %v1495_v12  ;;  %v5214_v47 = vpop.f32.mrb[22].mxu1  ;;  %v1548_v20 = vld [vmem:[#allocation4 + $0x30] sm:$0xff] }
 0x26f   : > { %1338 = vst.msk [vmem:[#allocation4 + $0x50] sm:$0xff] %vm546_vm5, %v1326_v0  ;;  %v1327_v30 = vadd.f32 %v5202_v39, %v1315_v13  ;;  %v1313_v14 = vld [vmem:[#allocation4 + $0x48] sm:$0xff]  ;;  %1568 = vst.msk [vmem:[#allocation4 + $0x10] sm:$0xff] %vm546_vm5, %v1556_v11  ;;  %v1557_v57 = vadd.f32 %v5214_v47, %v1545_v44  ;;  %v1498_v33 = vpop.f32.mrb[23].mxu1  ;;  %v1546_v35 = vld [vmem:[#allocation4 + $0x20] sm:$0xff] }
 0x270   : > { %v5237_v54 = vpop.f32.mrb[24].mxu0  ;;  %1336 = vst.msk [vmem:[#allocation4 + $0x40] sm:$0xff] %vm546_vm5, %v1324_v49  ;;  %v1325_v15 = vadd.f32 %v1313_v14, %v1292_v40  ;;  %1566 = vst.msk [vmem:[#allocation4] sm:$0xff] %vm546_vm5, %v1554_v32  ;;  %v1555_v26 = vadd.f32 %v1543_v37, %v1498_v33  ;;  %v1549_v22 = vld [vmem:[#allocation4 + $0x38] sm:$0xff] }
 0x271   : > { %v1748_v53 = vpop.f32.mrb[25].mxu0  ;;  %1339 = vst.msk [vmem:[#allocation4 + $0x58] sm:$0xff] %vm546_vm5, %v1327_v30  ;;  %1569 = vst.msk [vmem:[#allocation4 + $0x18] sm:$0xff] %vm546_vm5, %v1557_v57  ;;  %v1547_v25 = vld [vmem:[#allocation4 + $0x28] sm:$0xff] }
 0x272   : > { %v5238_v16 = vpop.f32.mrb[26].mxu0  ;;  %1337 = vst.msk [vmem:[#allocation4 + $0x48] sm:$0xff] %vm546_vm5, %v1325_v15  ;;  %1567 = vst.msk [vmem:[#allocation4 + $0x8] sm:$0xff] %vm546_vm5, %v1555_v26 }
 0x273   : > { %v1751_v9 = vpop.f32.mrb[27].mxu0 }
 0x274   : > { %v5217_v18 = vpop.f32.mrb[24].mxu1 }
 0x275   : > { %v1560_v60 = vadd.f32 %v5217_v18, %v1548_v20  ;;  %v1511_v42 = vpop.f32.mrb[25].mxu1 }
 0x276   : > { %v1558_v61 = vadd.f32 %v1546_v35, %v1511_v42  ;;  %v5218_v1 = vpop.f32.mrb[26].mxu1  ;;  %v1781_v23 = vld [vmem:[#allocation4 + $0x10] sm:$0xff] }
 0x277   : > { %1572 = vst.msk [vmem:[#allocation4 + $0x30] sm:$0xff] %vm546_vm5, %v1560_v60  ;;  %v1561_v5 = vadd.f32 %v5218_v1, %v1549_v22  ;;  %v1514_v24 = vpop.f32.mrb[27].mxu1  ;;  %v1793_v59 = vadd.f32 %v5233_v34, %v1781_v23  ;;  %v1779_v2 = vld [vmem:[#allocation4] sm:$0xff]  ;;  %v1552_v43 = vld [vmem:[#allocation4 + $0x50] sm:$0xff] }
 0x278   : > { %v6281_v28 = vpop.f32.mrb[28].mxu0  ;;  %1570 = vst.msk [vmem:[#allocation4 + $0x20] sm:$0xff] %vm546_vm5, %v1558_v61  ;;  %v1559_v50 = vadd.f32 %v1547_v25, %v1514_v24  ;;  %v1791_v36 = vadd.f32 %v1779_v2, %v1732_v31  ;;  %v1782_v38 = vld [vmem:[#allocation4 + $0x18] sm:$0xff]  ;;  %v1550_v48 = vld [vmem:[#allocation4 + $0x40] sm:$0xff] }
 0x279   : > { %v6284_v29 = vpop.f32.mrb[29].mxu0  ;;  %1573 = vst.msk [vmem:[#allocation4 + $0x38] sm:$0xff] %vm546_vm5, %v1561_v5  ;;  %1805 = vst.msk [vmem:[#allocation4 + $0x10] sm:$0xff] %vm546_vm5, %v1793_v59  ;;  %v1794_v39 = vadd.f32 %v6255_v3, %v1782_v38  ;;  %v1780_v40 = vld [vmem:[#allocation4 + $0x8] sm:$0xff]  ;;  %v1553_v46 = vld [vmem:[#allocation4 + $0x58] sm:$0xff] }
 0x27a   : > { %v6287_v63 = vpop.f32.mrb[30].mxu0  ;;  %1571 = vst.msk [vmem:[#allocation4 + $0x28] sm:$0xff] %vm546_vm5, %v1559_v50  ;;  %1803 = vst.msk [vmem:[#allocation4] sm:$0xff] %vm546_vm5, %v1791_v36  ;;  %v1792_v21 = vadd.f32 %v1780_v40, %v6263_v6  ;;  %v1551_v31 = vld [vmem:[#allocation4 + $0x48] sm:$0xff] }
 0x27b   : > { %v6292_v19 = vpop.f32.mrb[31].mxu0  ;;  %1806 = vst.msk [vmem:[#allocation4 + $0x18] sm:$0xff] %vm546_vm5, %v1794_v39 }
 0x27c   : > { %v5221_v27 = vpop.f32.mrb[28].mxu1  ;;  %1804 = vst.msk [vmem:[#allocation4 + $0x8] sm:$0xff] %vm546_vm5, %v1792_v21 }
 0x27d   : > { %v1564_v45 = vadd.f32 %v5221_v27, %v1552_v43  ;;  %v1527_v41 = vpop.f32.mrb[29].mxu1 }
 0x27e   : > { %v1562_v52 = vadd.f32 %v1550_v48, %v1527_v41  ;;  %v5222_v55 = vpop.f32.mrb[30].mxu1  ;;  %v1785_v56 = vld [vmem:[#allocation4 + $0x30] sm:$0xff] }
 0x27f   : > { %1576 = vst.msk [vmem:[#allocation4 + $0x50] sm:$0xff] %vm546_vm5, %v1564_v45  ;;  %v1565_v34 = vadd.f32 %v5222_v55, %v1553_v46  ;;  %v1530_v58 = vpop.f32.mrb[31].mxu1  ;;  %v1797_v6 = vadd.f32 %v5237_v54, %v1785_v56  ;;  %v1783_v7 = vld [vmem:[#allocation4 + $0x20] sm:$0xff] }
 0x280   : > { %v6299_v3 = vpop.f32.mrb[32].mxu0  ;;  %1574 = vst.msk [vmem:[#allocation4 + $0x40] sm:$0xff] %vm546_vm5, %v1562_v52  ;;  %v1563_v8 = vadd.f32 %v1551_v31, %v1530_v58  ;;  %v1795_v0 = vadd.f32 %v1783_v7, %v1748_v53  ;;  %v1786_v10 = vld [vmem:[#allocation4 + $0x38] sm:$0xff]  ;;  %v1976_v47 = vld [vmem:[#allocation4 + $0x10] sm:$0xff] }
 0x281   : > { %v6302_v17 = vpop.f32.mrb[33].mxu0  ;;  %1577 = vst.msk [vmem:[#allocation4 + $0x58] sm:$0xff] %vm546_vm5, %v1565_v34  ;;  %1809 = vst.msk [vmem:[#allocation4 + $0x30] sm:$0xff] %vm546_vm5, %v1797_v6  ;;  %v1798_v12 = vadd.f32 %v5238_v16, %v1786_v10  ;;  %v1784_v51 = vld [vmem:[#allocation4 + $0x28] sm:$0xff]  ;;  %v1974_v14 = vld [vmem:[#allocation4] sm:$0xff] }
 0x282   : > { %v6305_v11 = vpop.f32.mrb[34].mxu0  ;;  %1575 = vst.msk [vmem:[#allocation4 + $0x48] sm:$0xff] %vm546_vm5, %v1563_v8  ;;  %1807 = vst.msk [vmem:[#allocation4 + $0x20] sm:$0xff] %vm546_vm5, %v1795_v0  ;;  %v1796_v13 = vadd.f32 %v1784_v51, %v1751_v9  ;;  %v1977_v37 = vld [vmem:[#allocation4 + $0x18] sm:$0xff] }
 0x283   : > { %v6309_v49 = vpop.f32.mrb[35].mxu0  ;;  %1810 = vst.msk [vmem:[#allocation4 + $0x38] sm:$0xff] %vm546_vm5, %v1798_v12  ;;  %v1975_v53 = vld [vmem:[#allocation4 + $0x8] sm:$0xff] }
 0x284   : > { %v5253_v32 = vpop.f32.mrb[32].mxu1  ;;  %1808 = vst.msk [vmem:[#allocation4 + $0x28] sm:$0xff] %vm546_vm5, %v1796_v13 }
 0x285   : > { %v1988_v44 = vadd.f32 %v5253_v32, %v1976_v47  ;;  %v1927_v30 = vpop.f32.mrb[33].mxu1 }
 0x286   : > { %v1986_v57 = vadd.f32 %v1974_v14, %v1927_v30  ;;  %v5254_v33 = vpop.f32.mrb[34].mxu1  ;;  %v1789_v54 = vld [vmem:[#allocation4 + $0x50] sm:$0xff] }
 0x287   : > { %2000 = vst.msk [vmem:[#allocation4 + $0x10] sm:$0xff] %vm546_vm5, %v1988_v44  ;;  %v1989_v15 = vadd.f32 %v5254_v33, %v1977_v37  ;;  %v1930_v26 = vpop.f32.mrb[35].mxu1  ;;  %v1801_v9 = vadd.f32 %v6281_v28, %v1789_v54  ;;  %v1787_v18 = vld [vmem:[#allocation4 + $0x40] sm:$0xff] }
 0x288   : > { %v6315_v16 = vpop.f32.mrb[36].mxu0  ;;  %1998 = vst.msk [vmem:[#allocation4] sm:$0xff] %vm546_vm5, %v1986_v57  ;;  %v1987_v20 = vadd.f32 %v1975_v53, %v1930_v26  ;;  %v1799_v42 = vadd.f32 %v1787_v18, %v6284_v29  ;;  %v1790_v35 = vld [vmem:[#allocation4 + $0x58] sm:$0xff]  ;;  %v1980_v25 = vld [vmem:[#allocation4 + $0x30] sm:$0xff] }
 0x289   : > { %v6319_v60 = vpop.f32.mrb[37].mxu0  ;;  %2001 = vst.msk [vmem:[#allocation4 + $0x18] sm:$0xff] %vm546_vm5, %v1989_v15  ;;  %1813 = vst.msk [vmem:[#allocation4 + $0x50] sm:$0xff] %vm546_vm5, %v1801_v9  ;;  %v1802_v1 = vadd.f32 %v6287_v63, %v1790_v35  ;;  %v1788_v22 = vld [vmem:[#allocation4 + $0x48] sm:$0xff]  ;;  %v1978_v2 = vld [vmem:[#allocation4 + $0x20] sm:$0xff] }
 0x28a   : > { %v6323_v61 = vpop.f32.mrb[38].mxu0  ;;  %1999 = vst.msk [vmem:[#allocation4 + $0x8] sm:$0xff] %vm546_vm5, %v1987_v20  ;;  %1811 = vst.msk [vmem:[#allocation4 + $0x40] sm:$0xff] %vm546_vm5, %v1799_v42  ;;  %v1800_v5 = vadd.f32 %v1788_v22, %v6292_v19  ;;  %v1981_v36 = vld [vmem:[#allocation4 + $0x38] sm:$0xff] }
 0x28b   : > { %v6328_v23 = vpop.f32.mrb[39].mxu0  ;;  %1814 = vst.msk [vmem:[#allocation4 + $0x58] sm:$0xff] %vm546_vm5, %v1802_v1  ;;  %v1979_v40 = vld [vmem:[#allocation4 + $0x28] sm:$0xff] }
 0x28c   : > { %v5257_v24 = vpop.f32.mrb[36].mxu1  ;;  %1812 = vst.msk [vmem:[#allocation4 + $0x48] sm:$0xff] %vm546_vm5, %v1800_v5 }
 0x28d   : > { %v1992_v28 = vadd.f32 %v5257_v24, %v1980_v25  ;;  %v1943_v59 = vpop.f32.mrb[37].mxu1 }
 0x28e   : > { %v1990_v50 = vadd.f32 %v1978_v2, %v1943_v59  ;;  %v5258_v29 = vpop.f32.mrb[38].mxu1  ;;  %v2213_v38 = vld [vmem:[#allocation4 + $0x10] sm:$0xff] }
 0x28f   : > { %2004 = vst.msk [vmem:[#allocation4 + $0x30] sm:$0xff] %vm546_vm5, %v1992_v28  ;;  %v1993_v63 = vadd.f32 %v5258_v29, %v1981_v36  ;;  %v1946_v39 = vpop.f32.mrb[39].mxu1  ;;  %v2225_v19 = vadd.f32 %v6299_v3, %v2213_v38  ;;  %v2211_v27 = vld [vmem:[#allocation4] sm:$0xff] }
 0x290   : > { %v6335_v21 = vpop.f32.mrb[40].mxu0  ;;  %2002 = vst.msk [vmem:[#allocation4 + $0x20] sm:$0xff] %vm546_vm5, %v1990_v50  ;;  %v1991_v43 = vadd.f32 %v1979_v40, %v1946_v39  ;;  %v2223_v41 = vadd.f32 %v2211_v27, %v6302_v17  ;;  %v2214_v48 = vld [vmem:[#allocation4 + $0x18] sm:$0xff]  ;;  %v1984_v31 = vld [vmem:[#allocation4 + $0x50] sm:$0xff] }
 0x291   : > { %v6339_v45 = vpop.f32.mrb[41].mxu0  ;;  %2005 = vst.msk [vmem:[#allocation4 + $0x38] sm:$0xff] %vm546_vm5, %v1993_v63  ;;  %2237 = vst.msk [vmem:[#allocation4 + $0x10] sm:$0xff] %vm546_vm5, %v2225_v19  ;;  %v2226_v55 = vadd.f32 %v6305_v11, %v2214_v48  ;;  %v2212_v46 = vld [vmem:[#allocation4 + $0x8] sm:$0xff]  ;;  %v1982_v7 = vld [vmem:[#allocation4 + $0x40] sm:$0xff] }
 0x292   : > { %v6343_v52 = vpop.f32.mrb[42].mxu0  ;;  %2003 = vst.msk [vmem:[#allocation4 + $0x28] sm:$0xff] %vm546_vm5, %v1991_v43  ;;  %2235 = vst.msk [vmem:[#allocation4] sm:$0xff] %vm546_vm5, %v2223_v41  ;;  %v2224_v34 = vadd.f32 %v2212_v46, %v6309_v49  ;;  %v1985_v0 = vld [vmem:[#allocation4 + $0x58] sm:$0xff] }
 0x293   : > { %v6348_v56 = vpop.f32.mrb[43].mxu0  ;;  %2238 = vst.msk [vmem:[#allocation4 + $0x18] sm:$0xff] %vm546_vm5, %v2226_v55  ;;  %v1983_v51 = vld [vmem:[#allocation4 + $0x48] sm:$0xff] }
 0x294   : > { %v5261_v58 = vpop.f32.mrb[40].mxu1  ;;  %2236 = vst.msk [vmem:[#allocation4 + $0x8] sm:$0xff] %vm546_vm5, %v2224_v34 }
 0x295   : > { %v1996_v3 = vadd.f32 %v5261_v58, %v1984_v31  ;;  %v1959_v6 = vpop.f32.mrb[41].mxu1 }
 0x296   : > { %v1994_v8 = vadd.f32 %v1982_v7, %v1959_v6  ;;  %v5262_v17 = vpop.f32.mrb[42].mxu1  ;;  %v2217_v10 = vld [vmem:[#allocation4 + $0x30] sm:$0xff] }
 0x297   : > { %2008 = vst.msk [vmem:[#allocation4 + $0x50] sm:$0xff] %vm546_vm5, %v1996_v3  ;;  %v1997_v11 = vadd.f32 %v5262_v17, %v1985_v0  ;;  %v1962_v12 = vpop.f32.mrb[43].mxu1  ;;  %v2229_v49 = vadd.f32 %v6315_v16, %v2217_v10  ;;  %v2215_v32 = vld [vmem:[#allocation4 + $0x20] sm:$0xff] }
 0x298   : > { %v6355_v13 = vpop.f32.mrb[44].mxu0  ;;  %2006 = vst.msk [vmem:[#allocation4 + $0x40] sm:$0xff] %vm546_vm5, %v1994_v8  ;;  %v1995_v47 = vadd.f32 %v1983_v51, %v1962_v12  ;;  %v2227_v30 = vadd.f32 %v2215_v32, %v6319_v60  ;;  %v2218_v14 = vld [vmem:[#allocation4 + $0x38] sm:$0xff]  ;;  %v2450_v53 = vld [vmem:[#allocation4 + $0x10] sm:$0xff] }
 0x299   : > { %v6359_v44 = vpop.f32.mrb[45].mxu0  ;;  %2009 = vst.msk [vmem:[#allocation4 + $0x58] sm:$0xff] %vm546_vm5, %v1997_v11  ;;  %2241 = vst.msk [vmem:[#allocation4 + $0x30] sm:$0xff] %vm546_vm5, %v2229_v49  ;;  %v2230_v33 = vadd.f32 %v6323_v61, %v2218_v14  ;;  %v2216_v37 = vld [vmem:[#allocation4 + $0x28] sm:$0xff]  ;;  %v2448_v18 = vld [vmem:[#allocation4] sm:$0xff] }
 0x29a   : > { %v6363_v57 = vpop.f32.mrb[46].mxu0  ;;  %2007 = vst.msk [vmem:[#allocation4 + $0x48] sm:$0xff] %vm546_vm5, %v1995_v47  ;;  %2239 = vst.msk [vmem:[#allocation4 + $0x20] sm:$0xff] %vm546_vm5, %v2227_v30  ;;  %v2228_v15 = vadd.f32 %v2216_v37, %v6328_v23  ;;  %v2451_v42 = vld [vmem:[#allocation4 + $0x18] sm:$0xff] }
 0x29b   : > { %v6368_v54 = vpop.f32.mrb[47].mxu0  ;;  %2242 = vst.msk [vmem:[#allocation4 + $0x38] sm:$0xff] %vm546_vm5, %v2230_v33  ;;  %v2449_v22 = vld [vmem:[#allocation4 + $0x8] sm:$0xff] }
 0x29c   : > { %v5293_v26 = vpop.f32.mrb[44].mxu1  ;;  %2240 = vst.msk [vmem:[#allocation4 + $0x28] sm:$0xff] %vm546_vm5, %v2228_v15 }
 0x29d   : > { %v2462_v16 = vadd.f32 %v5293_v26, %v2450_v53  ;;  %v2401_v9 = vpop.f32.mrb[45].mxu1 }
 0x29e   : > { %v2460_v20 = vadd.f32 %v2448_v18, %v2401_v9  ;;  %v5294_v60 = vpop.f32.mrb[46].mxu1  ;;  %v2221_v35 = vld [vmem:[#allocation4 + $0x50] sm:$0xff] }
 0x29f   : > { %2474 = vst.msk [vmem:[#allocation4 + $0x10] sm:$0xff] %vm546_vm5, %v2462_v16  ;;  %v2463_v61 = vadd.f32 %v5294_v60, %v2451_v42  ;;  %v2404_v1 = vpop.f32.mrb[47].mxu1  ;;  %v2233_v23 = vadd.f32 %v6335_v21, %v2221_v35  ;;  %v2219_v24 = vld [vmem:[#allocation4 + $0x40] sm:$0xff]  ;;  %v6414_v60 = vpop.permute.xlu1 %2973 }
 0x2a0   : > { %v6375_v5 = vpop.f32.mrb[48].mxu0  ;;  %2472 = vst.msk [vmem:[#allocation4] sm:$0xff] %vm546_vm5, %v2460_v20  ;;  %v2461_v25 = vadd.f32 %v2449_v22, %v2404_v1  ;;  %v2231_v59 = vadd.f32 %v2219_v24, %v6339_v45  ;;  %v2222_v2 = vld [vmem:[#allocation4 + $0x58] sm:$0xff]  ;;  %v2454_v40 = vld [vmem:[#allocation4 + $0x30] sm:$0xff] }
 0x2a1   : > { %v6379_v28 = vpop.f32.mrb[49].mxu0  ;;  %2475 = vst.msk [vmem:[#allocation4 + $0x18] sm:$0xff] %vm546_vm5, %v2463_v61  ;;  %2245 = vst.msk [vmem:[#allocation4 + $0x50] sm:$0xff] %vm546_vm5, %v2233_v23  ;;  %v2234_v29 = vadd.f32 %v6343_v52, %v2222_v2  ;;  %v2220_v36 = vld [vmem:[#allocation4 + $0x48] sm:$0xff]  ;;  %v2452_v27 = vld [vmem:[#allocation4 + $0x20] sm:$0xff] }
 0x2a2   : > { %v6383_v50 = vpop.f32.mrb[50].mxu0  ;;  %2473 = vst.msk [vmem:[#allocation4 + $0x8] sm:$0xff] %vm546_vm5, %v2461_v25  ;;  %2243 = vst.msk [vmem:[#allocation4 + $0x40] sm:$0xff] %vm546_vm5, %v2231_v59  ;;  %v2232_v63 = vadd.f32 %v2220_v36, %v6348_v56  ;;  %v2455_v41 = vld [vmem:[#allocation4 + $0x38] sm:$0xff] }
 0x2a3   : > { %v2615_v38 = vpop.f32.mrb[51].mxu0  ;;  %2246 = vst.msk [vmem:[#allocation4 + $0x58] sm:$0xff] %vm546_vm5, %v2234_v29  ;;  %v2453_v46 = vld [vmem:[#allocation4 + $0x28] sm:$0xff] }
 0x2a4   : > { %v5297_v39 = vpop.f32.mrb[48].mxu1  ;;  %2244 = vst.msk [vmem:[#allocation4 + $0x48] sm:$0xff] %vm546_vm5, %v2232_v63 }
 0x2a5   : > { %v2466_v21 = vadd.f32 %v5297_v39, %v2454_v40  ;;  %v2417_v19 = vpop.f32.mrb[49].mxu1 }
 0x2a6   : > { %v2464_v43 = vadd.f32 %v2452_v27, %v2417_v19  ;;  %v5298_v45 = vpop.f32.mrb[50].mxu1  ;;  %v2645_v48 = vld [vmem:[#allocation4 + $0x10] sm:$0xff]  ;;  %v2984_v19 = vpop.permute.xlu1 %2983 }
 0x2a7   : > { %2478 = vst.msk [vmem:[#allocation4 + $0x30] sm:$0xff] %vm546_vm5, %v2466_v21  ;;  %v2467_v52 = vadd.f32 %v5298_v45, %v2455_v41  ;;  %v2420_v55 = vpop.f32.mrb[51].mxu1  ;;  %v2657_v56 = vadd.f32 %v6355_v13, %v2645_v48  ;;  %v2643_v58 = vld [vmem:[#allocation4] sm:$0xff] }
 0x2a8   : > { %v5321_v34 = vpop.f32.mrb[52].mxu0  ;;  %2476 = vst.msk [vmem:[#allocation4 + $0x20] sm:$0xff] %vm546_vm5, %v2464_v43  ;;  %v2465_v31 = vadd.f32 %v2453_v46, %v2420_v55  ;;  %v2655_v6 = vadd.f32 %v2643_v58, %v6359_v44  ;;  %v2646_v7 = vld [vmem:[#allocation4 + $0x18] sm:$0xff]  ;;  %v2458_v51 = vld [vmem:[#allocation4 + $0x50] sm:$0xff]  ;;  %v6429_v45 = vld [vmem:[%s6813_s7] ss:$0 sm:$0xff] }
 0x2a9   : > { %v2628_v3 = vpop.f32.mrb[53].mxu0  ;;  %2479 = vst.msk [vmem:[#allocation4 + $0x38] sm:$0xff] %vm546_vm5, %v2467_v52  ;;  %2669 = vst.msk [vmem:[#allocation4 + $0x10] sm:$0xff] %vm546_vm5, %v2657_v56  ;;  %v2658_v17 = vadd.f32 %v6363_v57, %v2646_v7  ;;  %v2644_v0 = vld [vmem:[#allocation4 + $0x8] sm:$0xff]  ;;  %v2456_v32 = vld [vmem:[#allocation4 + $0x40] sm:$0xff] }
 0x2aa   : > { %v5322_v8 = vpop.f32.mrb[54].mxu0  ;;  %2477 = vst.msk [vmem:[#allocation4 + $0x28] sm:$0xff] %vm546_vm5, %v2465_v31  ;;  %2667 = vst.msk [vmem:[#allocation4] sm:$0xff] %vm546_vm5, %v2655_v6  ;;  %v2656_v11 = vadd.f32 %v2644_v0, %v6368_v54  ;;  %v2459_v30 = vld [vmem:[#allocation4 + $0x58] sm:$0xff]  ;;  %v2994_v0 = vpop.permute.xlu1 %2993 }
 0x2ab   : > { %v2631_v10 = vpop.f32.mrb[55].mxu0  ;;  %2670 = vst.msk [vmem:[#allocation4 + $0x18] sm:$0xff] %vm546_vm5, %v2658_v17  ;;  %v2457_v37 = vld [vmem:[#allocation4 + $0x48] sm:$0xff] }
 0x2ac   : > { %v5301_v12 = vpop.f32.mrb[52].mxu1  ;;  %2668 = vst.msk [vmem:[#allocation4 + $0x8] sm:$0xff] %vm546_vm5, %v2656_v11 }
 0x2ad   : > { %v2470_v13 = vadd.f32 %v5301_v12, %v2458_v51  ;;  %v2433_v49 = vpop.f32.mrb[53].mxu1 }
 0x2ae   : > { %v2468_v47 = vadd.f32 %v2456_v32, %v2433_v49  ;;  %v5302_v44 = vpop.f32.mrb[54].mxu1  ;;  %v2649_v14 = vld [vmem:[#allocation4 + $0x30] sm:$0xff] }
 0x2af   : > { %2482 = vst.msk [vmem:[#allocation4 + $0x50] sm:$0xff] %vm546_vm5, %v2470_v13  ;;  %v2471_v57 = vadd.f32 %v5302_v44, %v2459_v30  ;;  %v2436_v33 = vpop.f32.mrb[55].mxu1  ;;  %v2661_v54 = vadd.f32 %v6375_v5, %v2649_v14  ;;  %v2647_v15 = vld [vmem:[#allocation4 + $0x20] sm:$0xff]  ;;  %v6417_v5 = vpop.permute.xlu0 %2978 }
 0x2b0   : > { %2480 = vst.msk [vmem:[#allocation4 + $0x40] sm:$0xff] %vm546_vm5, %v2468_v47  ;;  %v2469_v26 = vadd.f32 %v2457_v37, %v2436_v33  ;;  %v2659_v53 = vadd.f32 %v2647_v15, %v6379_v28  ;;  %v2650_v16 = vld [vmem:[#allocation4 + $0x38] sm:$0xff]  ;;  %v2882_v35 = vld [vmem:[#allocation4 + $0x10] sm:$0xff] }
 0x2b1   : > { %2483 = vst.msk [vmem:[#allocation4 + $0x58] sm:$0xff] %vm546_vm5, %v2471_v57  ;;  %2673 = vst.msk [vmem:[#allocation4 + $0x30] sm:$0xff] %vm546_vm5, %v2661_v54  ;;  %v2662_v9 = vadd.f32 %v6383_v50, %v2650_v16  ;;  %v2648_v18 = vld [vmem:[#allocation4 + $0x28] sm:$0xff]  ;;  %v2880_v22 = vld [vmem:[#allocation4] sm:$0xff]  ;;  %v3004_v16 = vpop.permute.xlu1 %3003 }
 0x2b2   : > { %2481 = vst.msk [vmem:[#allocation4 + $0x48] sm:$0xff] %vm546_vm5, %v2469_v26  ;;  %2671 = vst.msk [vmem:[#allocation4 + $0x20] sm:$0xff] %vm546_vm5, %v2659_v53  ;;  %v2660_v20 = vadd.f32 %v2648_v18, %v2615_v38  ;;  %v2883_v25 = vld [vmem:[#allocation4 + $0x18] sm:$0xff] }
 0x2b3   : > { %2674 = vst.msk [vmem:[#allocation4 + $0x38] sm:$0xff] %vm546_vm5, %v2662_v9  ;;  %v2881_v50 = vld [vmem:[#allocation4 + $0x8] sm:$0xff]  ;;  %v2989_v43 = vpop.permute.xlu0 %2988 }
 0x2b4   : > { %v5333_v42 = vpop.f32.mrb[56].mxu1  ;;  %2672 = vst.msk [vmem:[#allocation4 + $0x28] sm:$0xff] %vm546_vm5, %v2660_v20 }
 0x2b5   : > { %v2894_v61 = vadd.f32 %v5333_v42, %v2882_v35  ;;  %v2833_v1 = vpop.f32.mrb[57].mxu1 }
 0x2b6   : > { %v2892_v23 = vadd.f32 %v2880_v22, %v2833_v1  ;;  %v5334_v24 = vpop.f32.mrb[58].mxu1  ;;  %v2653_v28 = vld [vmem:[#allocation4 + $0x50] sm:$0xff] }
 0x2b7   : > { %2906 = vst.msk [vmem:[#allocation4 + $0x10] sm:$0xff] %vm546_vm5, %v2894_v61  ;;  %v2895_v59 = vadd.f32 %v5334_v24, %v2883_v25  ;;  %v2836_v2 = vpop.f32.mrb[59].mxu1  ;;  %v2665_v29 = vadd.f32 %v5321_v34, %v2653_v28  ;;  %v2651_v36 = vld [vmem:[#allocation4 + $0x40] sm:$0xff]  ;;  %v2999_v32 = vpop.permute.xlu0 %2998 }
 0x2b8   : > { %2904 = vst.msk [vmem:[#allocation4] sm:$0xff] %vm546_vm5, %v2892_v23  ;;  %v2893_v38 = vadd.f32 %v2881_v50, %v2836_v2  ;;  %v2663_v63 = vadd.f32 %v2651_v36, %v2628_v3  ;;  %v2654_v39 = vld [vmem:[#allocation4 + $0x58] sm:$0xff]  ;;  %v2886_v48 = vld [vmem:[#allocation4 + $0x30] sm:$0xff] }
 0x2b9   : > { %2907 = vst.msk [vmem:[#allocation4 + $0x18] sm:$0xff] %vm546_vm5, %v2895_v59  ;;  %2677 = vst.msk [vmem:[#allocation4 + $0x50] sm:$0xff] %vm546_vm5, %v2665_v29  ;;  %v2666_v40 = vadd.f32 %v5322_v8, %v2654_v39  ;;  %v2652_v21 = vld [vmem:[#allocation4 + $0x48] sm:$0xff]  ;;  %v2884_v46 = vld [vmem:[#allocation4 + $0x20] sm:$0xff] }
 0x2ba   : > { %2905 = vst.msk [vmem:[#allocation4 + $0x8] sm:$0xff] %vm546_vm5, %v2893_v38  ;;  %2675 = vst.msk [vmem:[#allocation4 + $0x40] sm:$0xff] %vm546_vm5, %v2663_v63  ;;  %v2664_v27 = vadd.f32 %v2652_v21, %v2631_v10  ;;  %v2887_v31 = vld [vmem:[#allocation4 + $0x38] sm:$0xff] }
 0x2bb   : > { %2678 = vst.msk [vmem:[#allocation4 + $0x58] sm:$0xff] %vm546_vm5, %v2666_v40  ;;  %v2885_v17 = vld [vmem:[#allocation4 + $0x28] sm:$0xff]  ;;  %v3009_v59 = vpop.permute.xlu0 %3008 }
 0x2bc   : > { %v5337_v41 = vpop.f32.mrb[60].mxu1  ;;  %2676 = vst.msk [vmem:[#allocation4 + $0x48] sm:$0xff] %vm546_vm5, %v2664_v27  ;;  %v3014_v27 = vpop.permute.xlu1 %3013 }
 0x2bd   : > { %v2898_v52 = vadd.f32 %v5337_v41, %v2886_v48  ;;  %v2849_v55 = vpop.f32.mrb[61].mxu1 }
 0x2be   : > { %v2918_v34 = vld [vmem:[#allocation4 + $0x10] sm:$0xff]  ;;  %v2896_v56 = vadd.f32 %v2884_v46, %v2849_v55  ;;  %v5338_v58 = vpop.f32.mrb[62].mxu1 }
 0x2bf   : > { %v2937_v3 = vadd.f32 %v6429_v45, %v2918_v34  ;;  %v2916_v6 = vld [vmem:[#allocation4] sm:$0xff]  ;;  %2910 = vst.msk [vmem:[#allocation4 + $0x30] sm:$0xff] %vm546_vm5, %v2898_v52  ;;  %v2899_v7 = vadd.f32 %v5338_v58, %v2887_v31  ;;  %v2852_v8 = vpop.f32.mrb[63].mxu1  ;;  %v3019_v55 = vpop.permute.xlu0 %3018 }
 0x2c0   : > { %v2935_v10 = vadd.f32 %v6429_v45, %v2916_v6  ;;  %v2919_v11 = vld [vmem:[#allocation4 + $0x18] sm:$0xff]  ;;  %2908 = vst.msk [vmem:[#allocation4 + $0x20] sm:$0xff] %vm546_vm5, %v2896_v56  ;;  %v2897_v12 = vadd.f32 %v2885_v17, %v2852_v8  ;;  %v2890_v33 = vld [vmem:[#allocation4 + $0x50] sm:$0xff] }
 0x2c1   : > { %v2949_v51 = vmax.f32 %v2937_v3, 0.0  ;;  %v2938_v13 = vadd.f32 %v6429_v45, %v2919_v11  ;;  %v2917_v49 = vld [vmem:[#allocation4 + $0x8] sm:$0xff]  ;;  %2911 = vst.msk [vmem:[#allocation4 + $0x38] sm:$0xff] %vm546_vm5, %v2899_v7  ;;  %v2888_v53 = vld [vmem:[#allocation4 + $0x40] sm:$0xff] }
 0x2c2   : > { %v2947_v47 = vmax.f32 %v2935_v10, 0.0  ;;  %v2936_v44 = vadd.f32 %v6429_v45, %v2917_v49  ;;  %2909 = vst.msk [vmem:[#allocation4 + $0x28] sm:$0xff] %vm546_vm5, %v2897_v12  ;;  %v2891_v61 = vld [vmem:[#allocation4 + $0x58] sm:$0xff]  ;;  %v3024_v12 = vpop.permute.xlu1 %3023 }
 0x2c3   : > { %v2950_v30 = vmax.f32 %v2938_v13, 0.0  ;;  %v3033_v37 = vmul.f32 %v2984_v19, %v2949_v51  ;;  %v2889_v28 = vld [vmem:[#allocation4 + $0x48] sm:$0xff] }
 0x2c4   : > { %v2948_v14 = vmax.f32 %v2936_v44, 0.0  ;;  %v5341_v57 = vpop.f32.mrb[64].mxu1  ;;  %v3031_v9 = vmul.f32 %v6414_v60, %v2947_v47 }
 0x2c5   : > { %v3034_v54 = vmul.f32 %v2989_v43, %v2950_v30  ;;  %v2902_v15 = vadd.f32 %v5341_v57, %v2890_v33  ;;  %v2865_v26 = vpop.f32.mrb[65].mxu1 }
 0x2c6   : > { %v3032_v18 = vmul.f32 %v6417_v5, %v2948_v14  ;;  %v2922_v20 = vld [vmem:[#allocation4 + $0x30] sm:$0xff]  ;;  %v2900_v42 = vadd.f32 %v2888_v53, %v2865_v26  ;;  %v5342_v35 = vpop.f32.mrb[66].mxu1  ;;  %v3029_v14 = vpop.permute.xlu0 %3028 }
 0x2c7   : > { %v3044_v1 = vpack.c.bf16 %v3034_v54, %v3033_v37  ;;  %v2941_v22 = vadd.f32 %v6429_v45, %v2922_v20  ;;  %v2920_v23 = vld [vmem:[#allocation4 + $0x20] sm:$0xff]  ;;  %2914 = vst.msk [vmem:[#allocation4 + $0x50] sm:$0xff] %vm546_vm5, %v2902_v15  ;;  %v2903_v24 = vadd.f32 %v5342_v35, %v2891_v61  ;;  %v2868_v25 = vpop.f32.mrb[67].mxu1 }
 0x2c8   : > { %v2939_v2 = vadd.f32 %v6429_v45, %v2920_v23  ;;  %v2923_v50 = vld [vmem:[#allocation4 + $0x38] sm:$0xff]  ;;  %2912 = vst.msk [vmem:[#allocation4 + $0x40] sm:$0xff] %vm546_vm5, %v2900_v42  ;;  %v2901_v60 = vadd.f32 %v2889_v28, %v2868_v25  ;;  %v3043_v5 = vpack.c.bf16 %v3032_v18, %v3031_v9 }
 0x2c9   : > { %v3056_v29 = vrot.slane %v3044_v1, 4  ;;  %v2953_v36 = vmax.f32 %v2941_v22, 0.0  ;;  %v2942_v38 = vadd.f32 %v6429_v45, %v2923_v50  ;;  %v2921_v63 = vld [vmem:[#allocation4 + $0x28] sm:$0xff]  ;;  %2915 = vst.msk [vmem:[#allocation4 + $0x58] sm:$0xff] %vm546_vm5, %v2903_v24 }
 0x2ca   : > { %v2951_v39 = vmax.f32 %v2939_v2, 0.0  ;;  %v2940_v40 = vadd.f32 %v6429_v45, %v2921_v63  ;;  %2913 = vst.msk [vmem:[#allocation4 + $0x48] sm:$0xff] %vm546_vm5, %v2901_v60  ;;  %v3055_v21 = vrot.slane %v3043_v5, 4 }
 0x2cb   : > { %v2954_v19 = vmax.f32 %v2942_v38, 0.0  ;;  %v3037_v48 = vmul.f32 %v3004_v16, %v2953_v36 }
 0x2cc   : > { %v2952_v43 = vmax.f32 %v2940_v40, 0.0  ;;  %v3057_v41 = vsel %vm876_vm6, %v3055_v21, %v3056_v29  ;;  %3073 = vst.msk [vmem:[#allocation3] sm:$0xf0] %vm477_vm4, %v3055_v21  ;;  %v3035_v46 = vmul.f32 %v2994_v0, %v2951_v39 }
 0x2cd   : > { %v3038_v52 = vmul.f32 %v3009_v59, %v2954_v19  ;;  %3074 = vst.msk [vmem:[#allocation3 + $0x8] sm:$0xff] %vm546_vm5, %v3057_v41 }
 0x2ce   : > { %v3036_v34 = vmul.f32 %v2999_v32, %v2952_v43  ;;  %v2926_v56 = vld [vmem:[#allocation4 + $0x50] sm:$0xff] }
 0x2cf   : > { %v3046_v58 = vpack.c.bf16 %v3038_v52, %v3037_v48  ;;  %v2945_v31 = vadd.f32 %v6429_v45, %v2926_v56  ;;  %v2924_v3 = vld [vmem:[#allocation4 + $0x40] sm:$0xff]  ;;  %v5558_v52 = vld [vmem:[%s6814_s8 + $0x38] sm:$0xff]  }
 0x2d0   : > { %v3045_v6 = vpack.c.bf16 %v3036_v34, %v3035_v46  ;;  %v2943_v7 = vadd.f32 %v6429_v45, %v2924_v3  ;;  %v2927_v8 = vld [vmem:[#allocation4 + $0x58] sm:$0xff] }
 0x2d1   : > { %v2957_v17 = vmax.f32 %v2945_v31, 0.0  ;;  %v2946_v10 = vadd.f32 %v6429_v45, %v2927_v8  ;;  %v2925_v11 = vld [vmem:[#allocation4 + $0x48] sm:$0xff]  ;;  %v3060_v0 = vrot.slane %v3046_v58, 4 }
 0x2d2   : > { %v3058_v51 = vrot.slane %v3045_v6, 4  ;;  %v2955_v13 = vmax.f32 %v2943_v7, 0.0  ;;  %v2944_v49 = vadd.f32 %v6429_v45, %v2925_v11 }
 0x2d3   : > { %v3041_v32 = vmul.f32 %v3024_v12, %v2957_v17  ;;  %v2958_v47 = vmax.f32 %v2946_v10, 0.0  ;;  %v3230_v44 = vld [vmem:[#allocation3] sm:$0xf0] }
 0x2d4   : > { %v3080_v30 = vld [vmem:[#allocation3] sm:$0xf8]  ;;  %v3039_v57 = vmul.f32 %v3014_v27, %v2955_v13  ;;  %v2956_v33 = vmax.f32 %v2944_v49, 0.0  ;;  %v3231_v37 = vld [vmem:[#allocation3 + $0x8] sm:$0xff]  ;;  %v3245_v54 = vrot.slane %v3230_v44, 4  ;;  %v3059_v45 = vsel %vm876_vm6, %v3056_v29, %v3058_v51 }
 0x2d5   : > { %v3090_v15 = vshrl.u32 %v3080_v30, 16  ;;  %v3042_v26 = vmul.f32 %v3029_v14, %v2958_v47  ;;  %v3246_v53 = vrot.slane %v3231_v37, 4  ;;  %v3093_v16 = vshll.u32 %v3080_v30, 16  ;;  %3075 = vst.msk [vmem:[#allocation3 + $0x10] sm:$0xff] %vm546_vm5, %v3059_v45  ;;  %v3534_v2 = vld [vmem:[#allocation3 + $0x8] sm:$0xf8] }
 0x2d6   : > { %v3098_v9 = vshrl.u32 %v3231_v37, 16  ;;  %v3040_v18 = vmul.f32 %v3019_v55, %v2956_v33  ;;  %v3101_v42 = vshll.u32 %v3231_v37, 16  ;;  %v3061_v25 = vsel %vm876_vm6, %v3058_v51, %v3060_v0  ;;  %v3367_v5 = vld [vmem:[#allocation3] sm:$0xf0]  ;;  %v6502_v51 = vld [vmem:[%s6814_s8 + $0x50] sm:$0xff]  }
 0x2d7   : > { %v3092_v20 = vrot.slane %v3090_v15, 3  ;;  %v3048_v35 = vpack.c.bf16 %v3042_v26, %v3041_v32  ;;  %v3247_v61 = vsel %vm876_vm6, %v3245_v54, %v3246_v53  ;;  %v3095_v1 = vrot.slane %v3093_v16, 4  ;;  %3076 = vst.msk [vmem:[#allocation3 + $0x18] sm:$0xff] %vm546_vm5, %v3061_v25  ;;  %v5559_v10 = vld [vmem:[%s6814_s8 + $0x28] sm:$0xff]  }
 0x2d8   : > { %v3100_v22 = vrot.slane %v3098_v9, 3  ;;  %v3047_v23 = vpack.c.bf16 %v3040_v18, %v3039_v57  ;;  %5359 = vmatprep.mubr.msk.bf16.mxu1 %vm546_vm5, %v3247_v61  ;;  %v3103_v24 = vrot.slane %v3101_v42, 4  ;;  %v3545_v38 = vshrl.u32 %v3534_v2, 16  ;;  %v5561_v18 = vld [vmem:[%s6814_s8 + $0x40] sm:$0xff]  }
 0x2d9   : > { %v3064_v28 = vrot.slane %v3048_v35, 4  ;;  %v3096_v59 = vor.u32 %v3095_v1, %v3092_v20  ;;  %v3548_v40 = vshll.u32 %v3534_v2, 16  ;;  %v3378_v21 = vshrl.u32 %v3367_v5, 16 }
 0x2da   : > { %v3062_v50 = vrot.slane %v3047_v23, 4  ;;  %v3104_v60 = vor.u32 %v3103_v24, %v3100_v22  ;;  %v3547_v48 = vrot.slane %v3545_v38, 3  ;;  %v3381_v55 = vshll.u32 %v3367_v5, 16 }
 0x2db   : > { %3079 = vst.msk [vmem:[#allocation3 + $0x30] sm:$0xf] %vm475_vm1, %v3064_v28  ;;  %v3550_v6 = vrot.slane %v3548_v40, 4  ;;  %v3380_v7 = vrot.slane %v3378_v21, 4  ;;  %v3388_v11 = vrot.slane %v3098_v9, 4  ;;  %v3391_v12 = vrot.slane %v3101_v42, 5 }
 0x2dc   : > { %v3105_v29 = vsel %vm946_vm10, %v3096_v59, %v3104_v60  ;;  %v3063_v36 = vsel %vm876_vm6, %v3060_v0, %v3062_v50  ;;  %v3065_v63 = vsel %vm876_vm6, %v3062_v50, %v3064_v28  ;;  %v6470_v39 = vld [vmem:[#allocation3 + $0x10] sm:$0xff]  ;;  %v3383_v30 = vrot.slane %v3381_v55, 5  ;;  %v3838_v59 = vld [vmem:[#allocation3 + $0x8] sm:$0xf0] }
 0x2dd   : > { %5347 = vmatprep.mubr.msk.bf16.mxu0 %vm546_vm5, %v3105_v29  ;;  %3077 = vst.msk [vmem:[#allocation3 + $0x20] sm:$0xff] %vm546_vm5, %v3063_v36  ;;  %3078 = vst.msk [vmem:[#allocation3 + $0x28] sm:$0xff] %vm546_vm5, %v3065_v63  ;;  %v6473_v19 = vrot.slane %v6470_v39, 4  ;;  %v3107_v27 = vshrl.u32 %v6470_v39, 16  ;;  %v3110_v43 = vshll.u32 %v6470_v39, 16  ;;  %v3551_v16 = vor.u32 %v3550_v6, %v3547_v48  ;;  %v5562_v39 = vld [vmem:[%s6814_s8 + $0x58] sm:$0xff]  }
 0x2de   : > { %v6477_v41 = vld [vmem:[#allocation3 + $0x18] sm:$0xff]  ;;  %v3392_v20 = vor.u32 %v3391_v12, %v3388_v11  ;;  %v3849_v38 = vshrl.u32 %v3838_v59, 16  ;;  %v3852_v63 = vshll.u32 %v3838_v59, 16  ;;  %v5564_v6 = vld [vmem:[%s6814_s8 + $0x70] sm:$0xff]  }
 0x2df   : > { %v3249_v46 = vsel %vm876_vm6, %v3246_v53, %v6473_v19  ;;  %v6485_v34 = vrot.slane %v6477_v41, 4  ;;  %v3109_v56 = vrot.slane %v3107_v27, 3  ;;  %v3112_v58 = vrot.slane %v3110_v43, 4 }
 0x2e0   : > { %5360 = vmatmul.mubr.msk.bf16.vlgmr.msra.gmra.mrb[68].mxu1 %vm546_vm5, %v3249_v46  ;;  %v3116_v31 = vshrl.u32 %v6477_v41, 16  ;;  %v3119_v3 = vshll.u32 %v6477_v41, 16  ;;  %v3397_v23 = vrot.slane %v3107_v27, 4  ;;  %v3400_v24 = vrot.slane %v3110_v43, 5  ;;  %v5563_v46 = vld [vmem:[%s6814_s8 + $0x48] sm:$0xff]  }
 0x2e1   : > { %v6493_v8 = vsel %vm876_vm6, %v6473_v19, %v6485_v34  ;;  %v3113_v17 = vor.u32 %v3112_v58, %v3109_v56  ;;  %5380 = vmatpush3.bf16.msra.mxu1 %v6268_v62  ;;  %v3854_v55 = vrot.slane %v3852_v63, 5 }
 0x2e2   : > { %5363 = vmatprep.mubr.msk.bf16.mxu1 %vm546_vm5, %v6493_v8  ;;  %v3118_v13 = vrot.slane %v3116_v31, 3  ;;  %v3121_v49 = vrot.slane %v3119_v3, 4  ;;  %5381 = vmatprep.subr.bf16.mxu1 %v5558_v52  ;;  %v3409_v5 = vrot.slane %v3119_v3, 5  ;;  %v3401_v36 = vor.u32 %v3400_v24, %v3397_v23  ;;  %v5568_v23 = vld [vmem:[%s6814_s8 + $0x80] sm:$0xff]   ;;  %v4009_v63 = vld [vmem:[#allocation3 + $0x30] sm:$0xf] }
 0x2e3   : > { %v3114_v62 = vsel %vm946_vm10, %v3104_v60, %v3113_v17  ;;  %v3560_v42 = vsel %vm946_vm10, %v3551_v16, %v3113_v17  ;;  %v3406_v60 = vrot.slane %v3116_v31, 4 }
 0x2e4   : > { %v3234_v0 = vld [vmem:[#allocation3 + $0x20] sm:$0xf]  ;;  %5348 = vmatmul.mubr.msk.bf16.vlgmr.msra.gmra.mrb[56].mxu0 %vm546_vm5, %v3114_v62  ;;  %v6510_v57 = vor.u32 %v3121_v49, %v3118_v13  ;;  %v3538_v1 = vld [vmem:[#allocation3 + $0x28] sm:$0xf]  ;;  %v3402_v56 = vsel %vm1356_vm12, %v3392_v20, %v3401_v36 }
 0x2e5   : > { %v3084_v32 = vld [vmem:[#allocation3 + $0x20] sm:$0xf]  ;;  %v3252_v47 = vrot.slane %v3234_v0, 4  ;;  %5368 = vmatpush3.bf16.msra.mxu0 %v6260_v4  ;;  %5382 = vmatpush3.bf16.msra.mxu1 %v5558_v52  ;;  %v3384_v4 = vor.u32 %v3383_v30, %v3380_v7  ;;  %v3580_v25 = vshrl.u32 %v3538_v1, 16  ;;  %v3583_v28 = vshll.u32 %v3538_v1, 16 }
 0x2e6   : > { %v3125_v44 = vshrl.u32 %v3084_v32, 16  ;;  %v6507_v14 = vld [vmem:[#allocation3 + $0x20] sm:$0xff]  ;;  %v3128_v33 = vshll.u32 %v3084_v32, 16  ;;  %v3123_v53 = vsel %vm946_vm10, %v3113_v17, %v6510_v57  ;;  %5369 = vmatprep.subr.bf16.mxu0 %v5559_v10  ;;  %5403 = vmatprep.subr.bf16.mxu1 %v6502_v51  ;;  %v6547_v48 = vor.u32 %v3409_v5, %v3406_v60  ;;  %v3842_v32 = vld [vmem:[#allocation3 + $0x28] sm:$0x1f] }
 0x2e7   : > { %v3571_v37 = vshrl.u32 %v6507_v14, 16  ;;  %v3574_v54 = vshll.u32 %v6507_v14, 16  ;;  %v3253_v15 = vsel %vm876_vm6, %v6485_v34, %v3252_v47  ;;  %5351 = vmatprep.mubr.msk.bf16.mxu0 %vm546_vm5, %v3123_v53  ;;  %v3393_v2 = vsel %vm1356_vm12, %v3384_v4, %v3392_v20  ;;  %v3371_v29 = vld [vmem:[#allocation3 + $0x20] sm:$0x1f]  ;;  %v4172_v4 = vld [vmem:[#allocation3 + $0x10] sm:$0xf0] }
 0x2e8   : > { %v3127_v26 = vrot.slane %v3125_v44, 3  ;;  %v3130_v9 = vrot.slane %v3128_v33, 4  ;;  %5364 = vmatmul.mubr.msk.bf16.gmra.mrb[72].mxu1 %vm546_vm5, %v3253_v15  ;;  %v3582_v40 = vrot.slane %v3580_v25, 3  ;;  %v3585_v21 = vrot.slane %v3583_v28, 4  ;;  %v5566_v15 = vld [vmem:[%s6814_s8 + $0x78] sm:$0xff]   ;;  %v5567_v20 = vld [vmem:[%s6814_s8 + $0x68] sm:$0xff]  }
 0x2e9   : > { %v3573_v35 = vrot.slane %v3571_v37, 3  ;;  %v3576_v61 = vrot.slane %v3574_v54, 4  ;;  %5383 = vmatprep.mubr.msk.bf16.mxu1 %vm546_vm5, %v3560_v42  ;;  %5370 = vmatpush3.bf16.msra.mxu0 %v5559_v10  ;;  %v3413_v27 = vshrl.u32 %v3371_v29, 16  ;;  %v3416_v43 = vshll.u32 %v3371_v29, 16  ;;  %v5565_v10 = vld [vmem:[%s6814_s8 + $0x60] sm:$0xff]  }
 0x2ea   : > { %v3131_v45 = vor.u32 %v3130_v9, %v3127_v26  ;;  %5391 = vmatprep.subr.bf16.mxu0 %v5561_v18  ;;  %v3851_v52 = vrot.slane %v3849_v38, 4  ;;  %v3586_v58 = vor.u32 %v3585_v21, %v3582_v40  ;;  %v3411_v7 = vsel %vm1356_vm12, %v3401_v36, %v6547_v48 }
 0x2eb   : > { %v6535_v50 = vor.u32 %v3576_v61, %v3573_v35  ;;  %v3415_v31 = vrot.slane %v3413_v27, 4  ;;  %v3418_v3 = vrot.slane %v3416_v43, 5  ;;  %v3877_v49 = vrot.slane %v3571_v37, 4  ;;  %v3705_v35 = vld [vmem:[#allocation3 + $0x28] sm:$0xf] }
 0x2ec   : > { %v3132_v22 = vsel %vm946_vm10, %v6510_v57, %v3131_v45  ;;  %v3855_v17 = vor.u32 %v3854_v55, %v3851_v52  ;;  %v3880_v0 = vrot.slane %v3574_v54, 5  ;;  %v3884_v44 = vshrl.u32 %v3842_v32, 16  ;;  %v4005_v54 = vld [vmem:[#allocation3 + $0x10] sm:$0xf8] }
 0x2ed   : > { %5352 = vmatmul.mubr.msk.bf16.gmra.mrb[60].mxu0 %vm546_vm5, %v3132_v22  ;;  %v6545_v41 = vsel %vm946_vm10, %v6510_v57, %v6535_v50  ;;  %v3587_v11 = vsel %vm946_vm10, %v6535_v50, %v3586_v58  ;;  %v3419_v12 = vor.u32 %v3418_v3, %v3415_v31  ;;  %v3887_v30 = vshll.u32 %v3842_v32, 16  ;;  %v4175_v22 = vld [vmem:[#allocation3 + $0x28] sm:$0xff]  ;;  %v4176_v55 = vld [vmem:[#allocation3 + $0x30] sm:$0xf] }
 0x2ee   : > { %5371 = vmatprep.mubr.msk.bf16.mxu0 %vm546_vm5, %v3393_v2  ;;  %v3864_v13 = vsel %vm1356_vm12, %v3855_v17, %v3401_v36  ;;  %v6580_v37 = vor.u32 %v3880_v0, %v3877_v49  ;;  %v3886_v26 = vrot.slane %v3884_v44, 4  ;;  %v4016_v9 = vshrl.u32 %v4005_v54, 16 }
 0x2ef   : > { %v3420_v47 = vsel %vm1356_vm12, %v6547_v48, %v3419_v12  ;;  %v3723_v24 = vrot.slane %v3705_v35, 4  ;;  %v4042_v59 = vshrl.u32 %v4175_v22, 16  ;;  %v4045_v2 = vshll.u32 %v4175_v22, 16 }
 0x2f0   : > { %5384 = vmatmul.mubr.msk.bf16.vlgmr.msra.gmra.mrb[76].mxu1 %vm546_vm5, %v3123_v53  ;;  %v3889_v53 = vrot.slane %v3887_v30, 5  ;;  %v6590_v16 = vsel %vm1356_vm12, %v6547_v48, %v6580_v37  ;;  %v4018_v61 = vrot.slane %v4016_v9, 3  ;;  %v4192_v29 = vrot.slane %v4175_v22, 4 }
 0x2f1   : > { %5387 = vmatprep.mubr.msk.bf16.mxu1 %vm546_vm5, %v6545_v41  ;;  %5404 = vmatpush3.bf16.msra.mxu1 %v6502_v51  ;;  %v3701_v51 = vld [vmem:[#allocation3 + $0x8] sm:$0xf0]  ;;  %v4044_v36 = vrot.slane %v4042_v59, 3  ;;  %v4047_v38 = vrot.slane %v4045_v2, 4  ;;  %v4051_v43 = vshrl.u32 %v4009_v63, 16  ;;  %v4054_v52 = vshll.u32 %v4009_v63, 16 }
 0x2f2   : > { %5405 = vmatprep.subr.bf16.mxu1 %v5562_v39  ;;  %v3716_v62 = vrot.slane %v3701_v51, 4  ;;  %v3890_v42 = vor.u32 %v3889_v53, %v3886_v26  ;;  %v4194_v31 = vrot.slane %v4176_v55, 4  ;;  %v4351_v12 = vrot.slane %v4045_v2, 5  ;;  %v4313_v51 = vld [vmem:[#allocation3 + $0x30] sm:$0x1f] }
 0x2f3   : > { %v4048_v40 = vor.u32 %v4047_v38, %v4044_v36  ;;  %v4053_v3 = vrot.slane %v4051_v43, 3  ;;  %v4355_v49 = vshrl.u32 %v4313_v51, 16  ;;  %v4358_v0 = vshll.u32 %v4313_v51, 16 }
 0x2f4   : > { %v3718_v33 = vsel %vm876_vm6, %v3716_v62, %v6473_v19  ;;  %v3721_v19 = vrot.slane %v6507_v14, 4  ;;  %v4187_v14 = vrot.slane %v4172_v4, 4 }
 0x2f5   : > { %5372 = vmatmul.mubr.msk.bf16.vlgmr.msra.gmra.mrb[64].mxu0 %vm546_vm5, %v3402_v56  ;;  %5406 = vmatpush3.bf16.msra.mxu1 %v5562_v39  ;;  %v4357_v62 = vrot.slane %v4355_v49, 4 }
 0x2f6   : > { %5375 = vmatprep.mubr.msk.bf16.mxu0 %vm546_vm5, %v3411_v7  ;;  %5392 = vmatpush3.bf16.msra.mxu0 %v5561_v18  ;;  %v4019_v18 = vshll.u32 %v4005_v54, 16  ;;  %v3722_v45 = vsel %vm876_vm6, %v6485_v34, %v3721_v19  ;;  %v4189_v25 = vsel %vm876_vm6, %v4187_v14, %v6485_v34  ;;  %v3724_v60 = vsel %vm876_vm6, %v3721_v19, %v3723_v24  ;;  %v4309_v34 = vld [vmem:[#allocation3 + $0x10] sm:$0xf0] }
 0x2f7   : > { %5393 = vmatprep.subr.bf16.mxu0 %v5563_v46  ;;  %5427 = vmatprep.subr.bf16.mxu1 %v5564_v6  ;;  %v4193_v39 = vsel %vm876_vm6, %v3721_v19, %v4192_v29  ;;  %v4320_v21 = vshrl.u32 %v4309_v34, 16  ;;  %v4323_v27 = vshll.u32 %v4309_v34, 16 }
 0x2f8   : > { %5388 = vmatmul.mubr.msk.bf16.gmra.mrb[80].mxu1 %vm546_vm5, %v3587_v11  ;;  %v4021_v1 = vrot.slane %v4019_v18, 4  ;;  %v4348_v11 = vrot.slane %v4042_v59, 4 }
 0x2f9   : > { %5407 = vmatprep.mubr.msk.bf16.mxu1 %vm546_vm5, %v3864_v13  ;;  %v4322_v56 = vrot.slane %v4320_v21, 4  ;;  %v4325_v58 = vrot.slane %v4323_v27, 5 }
 0x2fa   : > { %5394 = vmatpush3.bf16.msra.mxu0 %v5563_v46  ;;  %v4022_v28 = vor.u32 %v4021_v1, %v4018_v61  ;;  %v4049_v46 = vsel %vm946_vm10, %v6535_v50, %v4048_v40  ;;  %v4352_v13 = vor.u32 %v4351_v12, %v4348_v11 }
 0x2fb   : > { %5415 = vmatprep.subr.bf16.mxu0 %v5565_v10  ;;  %v4326_v17 = vor.u32 %v4325_v58, %v4322_v56 }
 0x2fc   : > { %v4031_v5 = vsel %vm946_vm10, %v4022_v28, %v6510_v57  ;;  %v5569_v57 = vld [vmem:[%s6814_s8 + $0x88] sm:$0xff]   ;;  %v4353_v32 = vsel %vm1356_vm12, %v6580_v37, %v4352_v13 }
 0x2fd   : > { %5376 = vmatmul.mubr.msk.bf16.gmra.mrb[68].mxu0 %vm546_vm5, %v3420_v47  ;;  %v4335_v50 = vsel %vm1356_vm12, %v4326_v17, %v6547_v48  ;;  %v4360_v47 = vrot.slane %v4358_v0, 5 }
 0x2fe   : > { %5395 = vmatprep.mubr.msk.bf16.mxu0 %vm546_vm5, %v3718_v33 }
 0x2ff   : > { %v4361_v44 = vor.u32 %v4360_v47, %v4357_v62 }
 0x300   : > { %5408 = vmatmul.mubr.msk.bf16.vlgmr.msra.gmra.mrb[84].mxu1 %vm546_vm5, %v3411_v7  ;;  %v4195_v7 = vsel %vm876_vm6, %v4192_v29, %v4194_v31 }
 0x301   : > { %5411 = vmatprep.mubr.msk.bf16.mxu1 %vm546_vm5, %v6590_v16  ;;  %5428 = vmatpush3.bf16.msra.mxu1 %v5564_v6  ;;  %v4056_v6 = vrot.slane %v4054_v52, 4  ;;  %v4362_v48 = vsel %vm1356_vm12, %v4352_v13, %v4361_v44 }
 0x302   : > { %5429 = vmatprep.subr.bf16.mxu1 %v5566_v15 }
 0x305   : > { %5396 = vmatmul.mubr.msk.bf16.vlgmr.msra.gmra.mrb[72].mxu0 %vm546_vm5, %v6493_v8  ;;  %5430 = vmatpush3.bf16.msra.mxu1 %v5566_v15  ;;  %v3891_v8 = vsel %vm1356_vm12, %v6580_v37, %v3890_v42 }
 0x306   : > { %5399 = vmatprep.mubr.msk.bf16.mxu0 %vm546_vm5, %v3722_v45  ;;  %5416 = vmatpush3.bf16.msra.mxu0 %v5565_v10  ;;  %v4057_v10 = vor.u32 %v4056_v6, %v4053_v3 }
 0x307   : > { %5417 = vmatprep.subr.bf16.mxu0 %v5567_v20 }
 0x308   : > { %5412 = vmatmul.mubr.msk.bf16.gmra.mrb[88].mxu1 %vm546_vm5, %v3891_v8 }
 0x309   : > { %5431 = vmatprep.mubr.msk.bf16.mxu1 %vm546_vm5, %v4189_v25 }
 0x30a   : > { %5418 = vmatpush3.bf16.msra.mxu0 %v5567_v20 }
 0x30b   : > { %5439 = vmatprep.subr.bf16.mxu0 %v5568_v23 }
 0x30d   : > { %5400 = vmatmul.mubr.msk.bf16.gmra.mrb[76].mxu0 %vm546_vm5, %v3724_v60 }
 0x30e   : > { %5419 = vmatprep.mubr.msk.bf16.mxu0 %vm546_vm5, %v4031_v5 }
 0x310   : > { %5432 = vmatmul.mubr.msk.bf16.vlgmr.msra.gmra.mrb[92].mxu1 %vm546_vm5, %v3722_v45 }
 0x311   : > { %5435 = vmatprep.mubr.msk.bf16.mxu1 %vm546_vm5, %v4193_v39 }
 0x315   : > { %5420 = vmatmul.mubr.msk.bf16.vlgmr.msra.gmra.mrb[80].mxu0 %vm546_vm5, %v6545_v41  ;;  %v4058_v41 = vsel %vm946_vm10, %v4048_v40, %v4057_v10 }
 0x316   : > { %5423 = vmatprep.mubr.msk.bf16.mxu0 %vm546_vm5, %v4049_v46  ;;  %5440 = vmatpush3.bf16.msra.mxu0 %v5568_v23 }
 0x317   : > { %5441 = vmatprep.subr.bf16.mxu0 %v5569_v57 }
 0x318   : > { %5436 = vmatmul.mubr.msk.bf16.gmra.mrb[96].mxu1 %vm546_vm5, %v4195_v7 }
 0x31a   : > { %5442 = vmatpush3.bf16.msra.mxu0 %v5569_v57 }
 0x31d   : > { %5424 = vmatmul.mubr.msk.bf16.gmra.mrb[84].mxu0 %vm546_vm5, %v4058_v41 }
 0x31e   : > { %5443 = vmatprep.mubr.msk.bf16.mxu0 %vm546_vm5, %v4335_v50 }
 0x325   : > { %5444 = vmatmul.mubr.msk.bf16.vlgmr.msra.gmra.mrb[88].mxu0 %vm546_vm5, %v6590_v16 }
 0x326   : > { %5447 = vmatprep.mubr.msk.bf16.mxu0 %vm546_vm5, %v4353_v32 }
 0x32d   : > { %5448 = vmatmul.mubr.msk.bf16.gmra.mrb[92].mxu0 %vm546_vm5, %v4362_v48 }
 0x3b3   : > { %v5361_v30 = vpop.f32.mrb[68].mxu1 }
 0x3b4   : > { %v3312_v33 = vpop.f32.mrb[69].mxu1 }
 0x3b5   : > { %v5362_v54 = vpop.f32.mrb[70].mxu1 }
 0x3b6   : > { %v3315_v15 = vpop.f32.mrb[71].mxu1 }
 0x3b7   : > { %v5349_v26 = vpop.f32.mrb[56].mxu0 }
 0x3b8   : > { %3224 = vst.msk [vmem:[#allocation5 + $0x10] sm:$0xff] %vm546_vm5, %v5349_v26  ;;  %v3191_v53 = vpop.f32.mrb[57].mxu0 }
 0x3b9   : > { %3222 = vst.msk [vmem:[#allocation5] sm:$0xff] %vm546_vm5, %v3191_v53  ;;  %v5350_v37 = vpop.f32.mrb[58].mxu0 }
 0x3ba   : > { %3225 = vst.msk [vmem:[#allocation5 + $0x18] sm:$0xff] %vm546_vm5, %v5350_v37  ;;  %v3194_v16 = vpop.f32.mrb[59].mxu0 }
 0x3bb   : > { %3223 = vst.msk [vmem:[#allocation5 + $0x8] sm:$0xff] %vm546_vm5, %v3194_v16  ;;  %v5365_v19 = vpop.f32.mrb[72].mxu1 }
 0x3bc   : > { %v3328_v9 = vpop.f32.mrb[73].mxu1 }
 0x3bd   : > { %v5366_v18 = vpop.f32.mrb[74].mxu1 }
 0x3be   : > { %v3331_v4 = vpop.f32.mrb[75].mxu1 }
 0x3bf   : > { %v3345_v20 = vld [vmem:[#allocation5 + $0x10] sm:$0xff] }
 0x3c0   : > { %v5353_v42 = vpop.f32.mrb[60].mxu0  ;;  %v3353_v45 = vadd.f32 %v5361_v30, %v3345_v20  ;;  %v3343_v14 = vld [vmem:[#allocation5] sm:$0xff] }
 0x3c1   : > { %3228 = vst.msk [vmem:[#allocation5 + $0x30] sm:$0xff] %vm546_vm5, %v5353_v42  ;;  %v3207_v35 = vpop.f32.mrb[61].mxu0  ;;  %v3351_v61 = vadd.f32 %v3343_v14, %v3312_v33  ;;  %v3346_v1 = vld [vmem:[#allocation5 + $0x18] sm:$0xff] }
 0x3c2   : > { %3226 = vst.msk [vmem:[#allocation5 + $0x20] sm:$0xff] %vm546_vm5, %v3207_v35  ;;  %v5354_v22 = vpop.f32.mrb[62].mxu0  ;;  %3361 = vst.msk [vmem:[#allocation5 + $0x10] sm:$0xff] %vm546_vm5, %v3353_v45  ;;  %v3354_v23 = vadd.f32 %v5362_v54, %v3346_v1  ;;  %v3344_v8 = vld [vmem:[#allocation5 + $0x8] sm:$0xff] }
 0x3c3   : > { %3229 = vst.msk [vmem:[#allocation5 + $0x38] sm:$0xff] %vm546_vm5, %v5354_v22  ;;  %v3210_v24 = vpop.f32.mrb[63].mxu0  ;;  %3359 = vst.msk [vmem:[#allocation5] sm:$0xff] %vm546_vm5, %v3351_v61  ;;  %v3352_v25 = vadd.f32 %v3344_v8, %v3315_v15  ;;  %v5385_v28 = vpop.f32.mrb[76].mxu1 }
 0x3c4   : > { %3227 = vst.msk [vmem:[#allocation5 + $0x28] sm:$0xff] %vm546_vm5, %v3210_v24  ;;  %3362 = vst.msk [vmem:[#allocation5 + $0x18] sm:$0xff] %vm546_vm5, %v3354_v23  ;;  %v3646_v59 = vpop.f32.mrb[77].mxu1 }
 0x3c5   : > { %3360 = vst.msk [vmem:[#allocation5 + $0x8] sm:$0xff] %vm546_vm5, %v3352_v25  ;;  %v5386_v2 = vpop.f32.mrb[78].mxu1 }
 0x3c6   : > { %v6654_v60 = vpop.f32.mrb[79].mxu1 }
 0x3c8   : > { %v3349_v5 = vld [vmem:[#allocation5 + $0x30] sm:$0xff]  ;;  %v5373_v29 = vpop.f32.mrb[64].mxu0 }
 0x3c9   : > { %v3357_v36 = vadd.f32 %v5365_v19, %v3349_v5  ;;  %v3347_v38 = vld [vmem:[#allocation5 + $0x20] sm:$0xff]  ;;  %v3479_v34 = vpop.f32.mrb[65].mxu0  ;;  %v3512_v40 = vld [vmem:[#allocation5 + $0x10] sm:$0xff] }
 0x3ca   : > { %v3355_v63 = vadd.f32 %v3347_v38, %v3328_v9  ;;  %v3350_v39 = vld [vmem:[#allocation5 + $0x38] sm:$0xff]  ;;  %v5374_v21 = vpop.f32.mrb[66].mxu0  ;;  %v3520_v52 = vadd.f32 %v5373_v29, %v3512_v40  ;;  %v3510_v55 = vld [vmem:[#allocation5] sm:$0xff] }
 0x3cb   : > { %3365 = vst.msk [vmem:[#allocation5 + $0x30] sm:$0xff] %vm546_vm5, %v3357_v36  ;;  %v3358_v27 = vadd.f32 %v5366_v18, %v3350_v39  ;;  %v3348_v43 = vld [vmem:[#allocation5 + $0x28] sm:$0xff]  ;;  %v3482_v57 = vpop.f32.mrb[67].mxu0  ;;  %v3518_v56 = vadd.f32 %v3510_v55, %v3479_v34  ;;  %v3513_v58 = vld [vmem:[#allocation5 + $0x18] sm:$0xff]  ;;  %v5389_v31 = vpop.f32.mrb[80].mxu1 }
 0x3cc   : > { %3363 = vst.msk [vmem:[#allocation5 + $0x20] sm:$0xff] %vm546_vm5, %v3355_v63  ;;  %v3356_v46 = vadd.f32 %v3348_v43, %v3331_v4  ;;  %3528 = vst.msk [vmem:[#allocation5 + $0x10] sm:$0xff] %vm546_vm5, %v3520_v52  ;;  %v3521_v3 = vadd.f32 %v5374_v21, %v3513_v58  ;;  %v3511_v6 = vld [vmem:[#allocation5 + $0x8] sm:$0xff]  ;;  %v3662_v7 = vpop.f32.mrb[81].mxu1 }
 0x3cd   : > { %3366 = vst.msk [vmem:[#allocation5 + $0x38] sm:$0xff] %vm546_vm5, %v3358_v27  ;;  %3526 = vst.msk [vmem:[#allocation5] sm:$0xff] %vm546_vm5, %v3518_v56  ;;  %v3519_v17 = vadd.f32 %v3511_v6, %v3482_v57  ;;  %v5390_v10 = vpop.f32.mrb[82].mxu1 }
 0x3ce   : > { %3364 = vst.msk [vmem:[#allocation5 + $0x28] sm:$0xff] %vm546_vm5, %v3356_v46  ;;  %3529 = vst.msk [vmem:[#allocation5 + $0x18] sm:$0xff] %vm546_vm5, %v3521_v3  ;;  %v3665_v41 = vpop.f32.mrb[83].mxu1 }
 0x3cf   : > { %3527 = vst.msk [vmem:[#allocation5 + $0x8] sm:$0xff] %vm546_vm5, %v3519_v17 }
 0x3d0   : > { %v5377_v50 = vpop.f32.mrb[68].mxu0 }
 0x3d1   : > { %v3495_v11 = vpop.f32.mrb[69].mxu0 }
 0x3d2   : > { %v3516_v12 = vld [vmem:[#allocation5 + $0x30] sm:$0xff]  ;;  %v5378_v51 = vpop.f32.mrb[70].mxu0 }
 0x3d3   : > { %v3524_v13 = vadd.f32 %v5377_v50, %v3516_v12  ;;  %v3514_v49 = vld [vmem:[#allocation5 + $0x20] sm:$0xff]  ;;  %v3498_v0 = vpop.f32.mrb[71].mxu0  ;;  %v6664_v47 = vpop.f32.mrb[84].mxu1  ;;  %v3679_v44 = vld [vmem:[#allocation5 + $0x10] sm:$0xff] }
 0x3d4   : > { %v3522_v32 = vadd.f32 %v3514_v49, %v3495_v11  ;;  %v3517_v62 = vld [vmem:[#allocation5 + $0x38] sm:$0xff]  ;;  %v6667_v33 = vpop.f32.mrb[85].mxu1  ;;  %v3687_v54 = vadd.f32 %v5385_v28, %v3679_v44  ;;  %v3677_v15 = vld [vmem:[#allocation5] sm:$0xff] }
 0x3d5   : > { %3532 = vst.msk [vmem:[#allocation5 + $0x30] sm:$0xff] %vm546_vm5, %v3524_v13  ;;  %v3525_v48 = vadd.f32 %v5378_v51, %v3517_v62  ;;  %v3515_v30 = vld [vmem:[#allocation5 + $0x28] sm:$0xff]  ;;  %v6670_v53 = vpop.f32.mrb[86].mxu1  ;;  %v3685_v37 = vadd.f32 %v3677_v15, %v3646_v59  ;;  %v3680_v16 = vld [vmem:[#allocation5 + $0x18] sm:$0xff] }
 0x3d6   : > { %3530 = vst.msk [vmem:[#allocation5 + $0x20] sm:$0xff] %vm546_vm5, %v3522_v32  ;;  %v3523_v26 = vadd.f32 %v3515_v30, %v3498_v0  ;;  %v6673_v19 = vpop.f32.mrb[87].mxu1  ;;  %3695 = vst.msk [vmem:[#allocation5 + $0x10] sm:$0xff] %vm546_vm5, %v3687_v54  ;;  %v3688_v9 = vadd.f32 %v5386_v2, %v3680_v16  ;;  %v3678_v18 = vld [vmem:[#allocation5 + $0x8] sm:$0xff] }
 0x3d7   : > { %3533 = vst.msk [vmem:[#allocation5 + $0x38] sm:$0xff] %vm546_vm5, %v3525_v48  ;;  %3693 = vst.msk [vmem:[#allocation5] sm:$0xff] %vm546_vm5, %v3685_v37  ;;  %v3686_v20 = vadd.f32 %v3678_v18, %v6654_v60 }
 0x3d8   : > { %3531 = vst.msk [vmem:[#allocation5 + $0x28] sm:$0xff] %vm546_vm5, %v3523_v26  ;;  %v5397_v4 = vpop.f32.mrb[72].mxu0  ;;  %3696 = vst.msk [vmem:[#allocation5 + $0x18] sm:$0xff] %vm546_vm5, %v3688_v9 }
 0x3d9   : > { %v3783_v42 = vpop.f32.mrb[73].mxu0  ;;  %3694 = vst.msk [vmem:[#allocation5 + $0x8] sm:$0xff] %vm546_vm5, %v3686_v20 }
 0x3da   : > { %v5398_v45 = vpop.f32.mrb[74].mxu0 }
 0x3db   : > { %v3786_v14 = vpop.f32.mrb[75].mxu0  ;;  %v6681_v35 = vpop.f32.mrb[88].mxu1 }
 0x3dc   : > { %v3683_v61 = vld [vmem:[#allocation5 + $0x30] sm:$0xff]  ;;  %v6683_v1 = vpop.f32.mrb[89].mxu1 }
 0x3dd   : > { %v3691_v22 = vadd.f32 %v5389_v31, %v3683_v61  ;;  %v3681_v23 = vld [vmem:[#allocation5 + $0x20] sm:$0xff]  ;;  %v3816_v8 = vld [vmem:[#allocation5 + $0x10] sm:$0xff]  ;;  %v6685_v24 = vpop.f32.mrb[90].mxu1 }
 0x3de   : > { %v3689_v25 = vadd.f32 %v3681_v23, %v3662_v7  ;;  %v3684_v28 = vld [vmem:[#allocation5 + $0x38] sm:$0xff]  ;;  %v3824_v59 = vadd.f32 %v5397_v4, %v3816_v8  ;;  %v3814_v2 = vld [vmem:[#allocation5] sm:$0xff]  ;;  %v6687_v60 = vpop.f32.mrb[91].mxu1 }
 0x3df   : > { %3699 = vst.msk [vmem:[#allocation5 + $0x30] sm:$0xff] %vm546_vm5, %v3691_v22  ;;  %v3692_v5 = vadd.f32 %v5390_v10, %v3684_v28  ;;  %v3682_v29 = vld [vmem:[#allocation5 + $0x28] sm:$0xff]  ;;  %v3822_v36 = vadd.f32 %v3814_v2, %v3783_v42  ;;  %v3817_v38 = vld [vmem:[#allocation5 + $0x18] sm:$0xff] }
 0x3e0   : > { %v5401_v34 = vpop.f32.mrb[76].mxu0  ;;  %3697 = vst.msk [vmem:[#allocation5 + $0x20] sm:$0xff] %vm546_vm5, %v3689_v25  ;;  %v3690_v63 = vadd.f32 %v3682_v29, %v3665_v41  ;;  %3832 = vst.msk [vmem:[#allocation5 + $0x10] sm:$0xff] %vm546_vm5, %v3824_v59  ;;  %v3825_v39 = vadd.f32 %v5398_v45, %v3817_v38  ;;  %v3815_v40 = vld [vmem:[#allocation5 + $0x8] sm:$0xff] }
 0x3e1   : > { %v3799_v21 = vpop.f32.mrb[77].mxu0  ;;  %3700 = vst.msk [vmem:[#allocation5 + $0x38] sm:$0xff] %vm546_vm5, %v3692_v5  ;;  %3830 = vst.msk [vmem:[#allocation5] sm:$0xff] %vm546_vm5, %v3822_v36  ;;  %v3823_v27 = vadd.f32 %v3815_v40, %v3786_v14 }
 0x3e2   : > { %v5402_v43 = vpop.f32.mrb[78].mxu0  ;;  %3698 = vst.msk [vmem:[#allocation5 + $0x28] sm:$0xff] %vm546_vm5, %v3690_v63  ;;  %3833 = vst.msk [vmem:[#allocation5 + $0x18] sm:$0xff] %vm546_vm5, %v3825_v39 }
 0x3e3   : > { %v3802_v52 = vpop.f32.mrb[79].mxu0  ;;  %3831 = vst.msk [vmem:[#allocation5 + $0x8] sm:$0xff] %vm546_vm5, %v3823_v27  ;;  %v6697_v55 = vpop.f32.mrb[92].mxu1 }
 0x3e4   : > { %v6699_v57 = vpop.f32.mrb[93].mxu1 }
 0x3e5   : > { %v6701_v56 = vpop.f32.mrb[94].mxu1 }
 0x3e6   : > { %v3820_v46 = vld [vmem:[#allocation5 + $0x30] sm:$0xff]  ;;  %v6703_v3 = vpop.f32.mrb[95].mxu1 }
 0x3e7   : > { %v3828_v58 = vadd.f32 %v5401_v34, %v3820_v46  ;;  %v3818_v31 = vld [vmem:[#allocation5 + $0x20] sm:$0xff]  ;;  %v3983_v17 = vld [vmem:[#allocation5 + $0x10] sm:$0xff] }
 0x3e8   : > { %v3826_v6 = vadd.f32 %v3818_v31, %v3799_v21  ;;  %v3821_v7 = vld [vmem:[#allocation5 + $0x38] sm:$0xff]  ;;  %v5421_v10 = vpop.f32.mrb[80].mxu0  ;;  %v3991_v11 = vadd.f32 %v6664_v47, %v3983_v17  ;;  %v3981_v12 = vld [vmem:[#allocation5] sm:$0xff] }
 0x3e9   : > { %3836 = vst.msk [vmem:[#allocation5 + $0x30] sm:$0xff] %vm546_vm5, %v3828_v58  ;;  %v3829_v41 = vadd.f32 %v5402_v43, %v3821_v7  ;;  %v3819_v50 = vld [vmem:[#allocation5 + $0x28] sm:$0xff]  ;;  %v4117_v51 = vpop.f32.mrb[81].mxu0  ;;  %v3989_v49 = vadd.f32 %v3981_v12, %v6667_v33  ;;  %v3984_v0 = vld [vmem:[#allocation5 + $0x18] sm:$0xff] }
 0x3ea   : > { %3834 = vst.msk [vmem:[#allocation5 + $0x20] sm:$0xff] %vm546_vm5, %v3826_v6  ;;  %v3827_v13 = vadd.f32 %v3819_v50, %v3802_v52  ;;  %v5422_v32 = vpop.f32.mrb[82].mxu0  ;;  %3999 = vst.msk [vmem:[#allocation5 + $0x10] sm:$0xff] %vm546_vm5, %v3991_v11  ;;  %v3992_v62 = vadd.f32 %v6670_v53, %v3984_v0  ;;  %v3982_v44 = vld [vmem:[#allocation5 + $0x8] sm:$0xff] }
 0x3eb   : > { %3837 = vst.msk [vmem:[#allocation5 + $0x38] sm:$0xff] %vm546_vm5, %v3829_v41  ;;  %v4120_v48 = vpop.f32.mrb[83].mxu0  ;;  %3997 = vst.msk [vmem:[#allocation5] sm:$0xff] %vm546_vm5, %v3989_v49  ;;  %v3990_v47 = vadd.f32 %v3982_v44, %v6673_v19  ;;  %v6715_v30 = vpop.f32.mrb[96].mxu1 }
 0x3ec   : > { %3835 = vst.msk [vmem:[#allocation5 + $0x28] sm:$0xff] %vm546_vm5, %v3827_v13  ;;  %4000 = vst.msk [vmem:[#allocation5 + $0x18] sm:$0xff] %vm546_vm5, %v3992_v62  ;;  %v6718_v33 = vpop.f32.mrb[97].mxu1 }
 0x3ed   : > { %3998 = vst.msk [vmem:[#allocation5 + $0x8] sm:$0xff] %vm546_vm5, %v3990_v47  ;;  %v6721_v54 = vpop.f32.mrb[98].mxu1 }
 0x3ee   : > { %v6723_v15 = vpop.f32.mrb[99].mxu1 }
 0x3f0   : > { %v3987_v26 = vld [vmem:[#allocation5 + $0x30] sm:$0xff]  ;;  %v5425_v53 = vpop.f32.mrb[84].mxu0 }
 0x3f1   : > { %v3995_v37 = vadd.f32 %v6681_v35, %v3987_v26  ;;  %v3985_v16 = vld [vmem:[#allocation5 + $0x20] sm:$0xff]  ;;  %v4133_v9 = vpop.f32.mrb[85].mxu0  ;;  %v4150_v18 = vld [vmem:[#allocation5 + $0x10] sm:$0xff] }
 0x3f2   : > { %v3993_v19 = vadd.f32 %v3985_v16, %v6683_v1  ;;  %v3988_v4 = vld [vmem:[#allocation5 + $0x38] sm:$0xff]  ;;  %v5426_v20 = vpop.f32.mrb[86].mxu0  ;;  %v4158_v42 = vadd.f32 %v5421_v10, %v4150_v18  ;;  %v4148_v45 = vld [vmem:[#allocation5] sm:$0xff] }
 0x3f3   : > { %4003 = vst.msk [vmem:[#allocation5 + $0x30] sm:$0xff] %vm546_vm5, %v3995_v37  ;;  %v3996_v14 = vadd.f32 %v6685_v24, %v3988_v4  ;;  %v3986_v61 = vld [vmem:[#allocation5 + $0x28] sm:$0xff]  ;;  %v4136_v22 = vpop.f32.mrb[87].mxu0  ;;  %v4156_v23 = vadd.f32 %v4148_v45, %v4117_v51  ;;  %v4151_v8 = vld [vmem:[#allocation5 + $0x18] sm:$0xff] }
 0x3f4   : > { %4001 = vst.msk [vmem:[#allocation5 + $0x20] sm:$0xff] %vm546_vm5, %v3993_v19  ;;  %v3994_v35 = vadd.f32 %v3986_v61, %v6687_v60  ;;  %4166 = vst.msk [vmem:[#allocation5 + $0x10] sm:$0xff] %vm546_vm5, %v4158_v42  ;;  %v4159_v25 = vadd.f32 %v5422_v32, %v4151_v8  ;;  %v4149_v1 = vld [vmem:[#allocation5 + $0x8] sm:$0xff] }
 0x3f5   : > { %4004 = vst.msk [vmem:[#allocation5 + $0x38] sm:$0xff] %vm546_vm5, %v3996_v14  ;;  %4164 = vst.msk [vmem:[#allocation5] sm:$0xff] %vm546_vm5, %v4156_v23  ;;  %v4157_v28 = vadd.f32 %v4149_v1, %v4120_v48 }
 0x3f6   : > { %4002 = vst.msk [vmem:[#allocation5 + $0x28] sm:$0xff] %vm546_vm5, %v3994_v35  ;;  %4167 = vst.msk [vmem:[#allocation5 + $0x18] sm:$0xff] %vm546_vm5, %v4159_v25 }
 0x3f7   : > { %4165 = vst.msk [vmem:[#allocation5 + $0x8] sm:$0xff] %vm546_vm5, %v4157_v28 }
 0x3f8   : > { %v5445_v24 = vpop.f32.mrb[88].mxu0 }
 0x3f9   : > { %v4421_v59 = vpop.f32.mrb[89].mxu0 }
 0x3fa   : > { %v4154_v2 = vld [vmem:[#allocation5 + $0x30] sm:$0xff]  ;;  %v5446_v5 = vpop.f32.mrb[90].mxu0 }
 0x3fb   : > { %v4162_v60 = vadd.f32 %v5425_v53, %v4154_v2  ;;  %v4152_v29 = vld [vmem:[#allocation5 + $0x20] sm:$0xff]  ;;  %v4424_v36 = vpop.f32.mrb[91].mxu0  ;;  %v4287_v63 = vld [vmem:[#allocation5 + $0x10] sm:$0xff] }
 0x3fc   : > { %v4160_v38 = vadd.f32 %v4152_v29, %v4133_v9  ;;  %v4155_v34 = vld [vmem:[#allocation5 + $0x38] sm:$0xff]  ;;  %v4295_v21 = vadd.f32 %v6697_v55, %v4287_v63  ;;  %v4285_v27 = vld [vmem:[#allocation5] sm:$0xff] }
 0x3fd   : > { %4170 = vst.msk [vmem:[#allocation5 + $0x30] sm:$0xff] %vm546_vm5, %v4162_v60  ;;  %v4163_v39 = vadd.f32 %v5426_v20, %v4155_v34  ;;  %v4153_v40 = vld [vmem:[#allocation5 + $0x28] sm:$0xff]  ;;  %v4293_v52 = vadd.f32 %v4285_v27, %v6699_v57  ;;  %v4288_v46 = vld [vmem:[#allocation5 + $0x18] sm:$0xff] }
 0x3fe   : > { %4168 = vst.msk [vmem:[#allocation5 + $0x20] sm:$0xff] %vm546_vm5, %v4160_v38  ;;  %v4161_v43 = vadd.f32 %v4153_v40, %v4136_v22  ;;  %4303 = vst.msk [vmem:[#allocation5 + $0x10] sm:$0xff] %vm546_vm5, %v4295_v21  ;;  %v4296_v58 = vadd.f32 %v6701_v56, %v4288_v46  ;;  %v4286_v31 = vld [vmem:[#allocation5 + $0x8] sm:$0xff] }
 0x3ff   : > { %4171 = vst.msk [vmem:[#allocation5 + $0x38] sm:$0xff] %vm546_vm5, %v4163_v39  ;;  %4301 = vst.msk [vmem:[#allocation5] sm:$0xff] %vm546_vm5, %v4293_v52  ;;  %v4294_v55 = vadd.f32 %v4286_v31, %v6703_v3 }
 0x400   : > { %4169 = vst.msk [vmem:[#allocation5 + $0x28] sm:$0xff] %vm546_vm5, %v4161_v43  ;;  %v5449_v6 = vpop.f32.mrb[92].mxu0  ;;  %4304 = vst.msk [vmem:[#allocation5 + $0x18] sm:$0xff] %vm546_vm5, %v4296_v58 }
 0x401   : > { %v4437_v7 = vpop.f32.mrb[93].mxu0  ;;  %4302 = vst.msk [vmem:[#allocation5 + $0x8] sm:$0xff] %vm546_vm5, %v4294_v55 }
 0x402   : > { %v5450_v57 = vpop.f32.mrb[94].mxu0 }
 0x403   : > { %v4440_v17 = vpop.f32.mrb[95].mxu0 }
 0x404   : > { %v4291_v10 = vld [vmem:[#allocation5 + $0x30] sm:$0xff] }
 0x405   : > { %v4299_v41 = vadd.f32 %v6715_v30, %v4291_v10  ;;  %v4289_v50 = vld [vmem:[#allocation5 + $0x20] sm:$0xff]  ;;  %v4454_v56 = vld [vmem:[#allocation5 + $0x10] sm:$0xff] }
 0x406   : > { %v4297_v11 = vadd.f32 %v4289_v50, %v6718_v33  ;;  %v4292_v12 = vld [vmem:[#allocation5 + $0x38] sm:$0xff]  ;;  %v4462_v51 = vadd.f32 %v5445_v24, %v4454_v56  ;;  %v4452_v13 = vld [vmem:[#allocation5] sm:$0xff] }
 0x407   : > { %4307 = vst.msk [vmem:[#allocation5 + $0x30] sm:$0xff] %vm546_vm5, %v4299_v41  ;;  %v4300_v3 = vadd.f32 %v6721_v54, %v4292_v12  ;;  %v4290_v49 = vld [vmem:[#allocation5 + $0x28] sm:$0xff]  ;;  %v4460_v0 = vadd.f32 %v4452_v13, %v4421_v59  ;;  %v4455_v32 = vld [vmem:[#allocation5 + $0x18] sm:$0xff]  ;;  %v4972_v30 = vld [vmem:[%s6815_s9] ss:$0 sm:$0xff] }
 0x408   : > { %4305 = vst.msk [vmem:[#allocation5 + $0x20] sm:$0xff] %vm546_vm5, %v4297_v11  ;;  %v4298_v62 = vadd.f32 %v4290_v49, %v6723_v15  ;;  %4470 = vst.msk [vmem:[#allocation5 + $0x10] sm:$0xff] %vm546_vm5, %v4462_v51  ;;  %v4463_v44 = vadd.f32 %v5446_v5, %v4455_v32  ;;  %v4453_v48 = vld [vmem:[#allocation5 + $0x8] sm:$0xff] }
 0x409   : > { %4308 = vst.msk [vmem:[#allocation5 + $0x38] sm:$0xff] %vm546_vm5, %v4300_v3  ;;  %4468 = vst.msk [vmem:[#allocation5] sm:$0xff] %vm546_vm5, %v4460_v0  ;;  %v4461_v47 = vadd.f32 %v4453_v48, %v4424_v36 }
 0x40a   : > { %4306 = vst.msk [vmem:[#allocation5 + $0x28] sm:$0xff] %vm546_vm5, %v4298_v62  ;;  %4471 = vst.msk [vmem:[#allocation5 + $0x18] sm:$0xff] %vm546_vm5, %v4463_v44 }
 0x40b   : > { %4469 = vst.msk [vmem:[#allocation5 + $0x8] sm:$0xff] %vm546_vm5, %v4461_v47 }
 0x40e   : > { %v4458_v33 = vld [vmem:[#allocation5 + $0x30] sm:$0xff] }
 0x40f   : > { %v4466_v54 = vadd.f32 %v5449_v6, %v4458_v33  ;;  %v4456_v15 = vld [vmem:[#allocation5 + $0x20] sm:$0xff]  ;;  %v4478_v26 = vld [vmem:[#allocation5 + $0x10] sm:$0xff] }
 0x410   : > { %v4464_v53 = vadd.f32 %v4456_v15, %v4437_v7  ;;  %v4459_v37 = vld [vmem:[#allocation5 + $0x38] sm:$0xff]  ;;  %v4493_v16 = vadd.f32 %v4972_v30, %v4478_v26  ;;  %v4476_v9 = vld [vmem:[#allocation5] sm:$0xff] }
 0x411   : > { %4474 = vst.msk [vmem:[#allocation5 + $0x30] sm:$0xff] %vm546_vm5, %v4466_v54  ;;  %v4467_v18 = vadd.f32 %v5450_v57, %v4459_v37  ;;  %v4457_v19 = vld [vmem:[#allocation5 + $0x28] sm:$0xff]  ;;  %v4491_v4 = vadd.f32 %v4972_v30, %v4476_v9  ;;  %v4479_v20 = vld [vmem:[#allocation5 + $0x18] sm:$0xff] }
 0x412   : > { %4472 = vst.msk [vmem:[#allocation5 + $0x20] sm:$0xff] %vm546_vm5, %v4464_v53  ;;  %v4465_v42 = vadd.f32 %v4457_v19, %v4440_v17  ;;  %v4501_v45 = vmax.f32 %v4493_v16, 0.0  ;;  %v4494_v14 = vadd.f32 %v4972_v30, %v4479_v20  ;;  %v4477_v61 = vld [vmem:[#allocation5 + $0x8] sm:$0xff] }
 0x413   : > { %4475 = vst.msk [vmem:[#allocation5 + $0x38] sm:$0xff] %vm546_vm5, %v4467_v18  ;;  %v4499_v22 = vmax.f32 %v4491_v4, 0.0  ;;  %v4492_v23 = vadd.f32 %v4972_v30, %v4477_v61 }
 0x414   : > { %4473 = vst.msk [vmem:[#allocation5 + $0x28] sm:$0xff] %vm546_vm5, %v4465_v42  ;;  %v4986_v8 = vpack.c.bf16 %v4501_v45, %v4501_v45  ;;  %v4502_v35 = vmax.f32 %v4494_v14, 0.0 }
 0x415   : > { %v4984_v25 = vpack.c.bf16 %v4499_v22, %v4499_v22  ;;  %v4500_v1 = vmax.f32 %v4492_v23, 0.0 }
 0x416   : > { %4541 = vst.msk [vmem:[%s6772_s30 + $0x8] sm:$0xf] %vm475_vm1, %v4986_v8  ;;  %v4987_v28 = vpack.c.bf16 %v4502_v35, %v4502_v35 }
 0x417   : > { %4539 = vst.msk [vmem:[%s6772_s30] sm:$0xf] %vm475_vm1, %v4984_v25  ;;  %v4985_v24 = vpack.c.bf16 %v4500_v1, %v4500_v1 }
 0x418   : > { %v4482_v59 = vld [vmem:[#allocation5 + $0x30] sm:$0xff]  ;;  %4542 = vst.msk [vmem:[%s6772_s30 + $0xc] sm:$0xf] %vm475_vm1, %v4987_v28 }
 0x419   : > { %v4497_v2 = vadd.f32 %v4972_v30, %v4482_v59  ;;  %v4480_v5 = vld [vmem:[#allocation5 + $0x20] sm:$0xff]  ;;  %4540 = vst.msk [vmem:[%s6772_s30 + $0x4] sm:$0xf] %vm475_vm1, %v4985_v24 }
 0x41a   : > { %v4495_v60 = vadd.f32 %v4972_v30, %v4480_v5  ;;  %v4483_v29 = vld [vmem:[#allocation5 + $0x38] sm:$0xff] }
 0x41b   : > { %v4505_v36 = vmax.f32 %v4497_v2, 0.0  ;;  %v4498_v38 = vadd.f32 %v4972_v30, %v4483_v29  ;;  %v4481_v34 = vld [vmem:[#allocation5 + $0x28] sm:$0xff] }
 0x41c   : > { %v4503_v63 = vmax.f32 %v4495_v60, 0.0  ;;  %v4496_v39 = vadd.f32 %v4972_v30, %v4481_v34 }
 0x41d   : > { %v4990_v40 = vpack.c.bf16 %v4505_v36, %v4505_v36  ;;  %v4506_v21 = vmax.f32 %v4498_v38, 0.0 }
 0x41e   : > { %v4988_v27 = vpack.c.bf16 %v4503_v63, %v4503_v63  ;;  %v4504_v43 = vmax.f32 %v4496_v39, 0.0 }
 0x41f   : > { %4545 = vst.msk [vmem:[%s6772_s30 + $0x18] sm:$0xf] %vm475_vm1, %v4990_v40  ;;  %v4991_v52 = vpack.c.bf16 %v4506_v21, %v4506_v21 }
 0x420   : > { %4543 = vst.msk [vmem:[%s6772_s30 + $0x10] sm:$0xf] %vm475_vm1, %v4988_v27  ;;  %v4989_v46 = vpack.c.bf16 %v4504_v43, %v4504_v43 }
 0x421   : > { %4546 = vst.msk [vmem:[%s6772_s30 + $0x1c] sm:$0xf] %vm475_vm1, %v4991_v52 }
 0x422   : > { %4544 = vst.msk [vmem:[%s6772_s30 + $0x14] sm:$0xf] %vm475_vm1, %v4989_v46 }
 0x423 PF: > { %s20_s17 = sadd.s32 1, %s5608_s17   ;;  %s6817_s13 = smov %s5600_s15 }
 0x424   : > { %p17_p7 = scmp.ge.s32.totalorder %s20_s17, 6   ;;  %s6818_s14 = smov %s5604_s16 }
 0x425   : > { %s6819_s15 = smov %s6822_s18  ;;  %s6820_s16 = smov %s6826_s19 }
 0x426   :  { %19 = sbr.rel (!%p17_p7) target bundleno = 3 (0x3), region = 115 }

</bundles_post_ra>
